<compile_context>
chip_gen: v5e
topology: v5e:2x2
jax: 0.10.0
libtpu: 0.0.40
codegen_flags: <defaults>
</compile_context>

<pallas_src>
import functools

import jax
import jax.numpy as jnp
from jax.experimental import pallas as pl
from jax.experimental.pallas import tpu as pltpu

_EPS = 1e-5
_MXU_DTYPE = jnp.bfloat16     # GEMM operand / weight dtype (f32 accumulation)
_ACT_DTYPE = jnp.bfloat16     # inter-kernel activation storage dtype (HBM traffic)


def _vmem_limit_bytes():
    """Scoped-VMEM budget derived from the part (v5e/v6e: 128 MiB, v7x: 64 MiB)."""
    try:
        cap = int(pltpu.get_tpu_info().vmem_capacity_bytes)
    except Exception:
        cap = 64 * 1024 * 1024
    return int(min(cap * 3 // 4, 96 * 1024 * 1024))


# ---------------------------------------------------------------------------
# in-kernel math helpers (all f32 on the VPU/EUP)
# ---------------------------------------------------------------------------

_A1, _A2, _A3, _A4, _A5 = 0.254829592, -0.284496736, 1.421413741, -1.453152027, 1.061405429
_PP = 0.3275911


def _recip(x):
    # EUP approximate reciprocal + one Newton step -> ~1e-7 relative error.
    r = pl.reciprocal(x, approx=True)
    return r * (2.0 - x * r)


def _erf(x):
    # Abramowitz & Stegun 7.1.26 (abs err ~1.5e-7) == f32-accurate erf.
    sgn = jnp.where(x >= 0.0, 1.0, -1.0)
    z = jnp.abs(x)
    t = _recip(1.0 + _PP * z)
    poly = ((((_A5 * t + _A4) * t + _A3) * t + _A2) * t + _A1) * t
    return sgn * (1.0 - poly * jnp.exp(-z * z))


def _gelu(x):
    # exact (erf-based) GELU, matching nn.GELU() default
    return 0.5 * x * (1.0 + _erf(x * 0.7071067811865476))


# ---------------------------------------------------------------------------
# Pallas kernels
# ---------------------------------------------------------------------------


def _patch_embed_kernel(x_ref, w_ref, b_ref, o_ref, stats_ref):
    """Stride-p patch conv (bf16 GEMM) + GELU; per-batch-item BN stats."""
    _, th, wp, kp = x_ref.shape
    x = x_ref[0].reshape(th * wp, kp)                        # bf16
    v = jnp.dot(x, w_ref[...], preferred_element_type=jnp.float32) + b_ref[...]
    t = _gelu(v)                                             # (rows, Dp) f32, pre-BN
    o_ref[0] = t.reshape(th, wp, -1).astype(o_ref.dtype)

    @pl.when(pl.program_id(1) == 0)
    def _():
        stats_ref[...] = jnp.zeros_like(stats_ref)

    ssum = jnp.sum(t, axis=0, keepdims=True)
    ssq = jnp.sum(t * t, axis=0, keepdims=True)
    stats_ref[0] = stats_ref[0] + jnp.concatenate([ssum, ssq], axis=0)


def _depthwise_kernel(t_ref, sc_ref, sh_ref, w_ref, b_ref, o_ref, stats_ref,
                      hpad_ref, *, ksize):
    """BN(prev) -> depthwise KxK 'same' conv -> GELU; per-(batch, ch-block) BN stats.

    The halo lives in a persistent VMEM scratch: only thin border slabs are
    zeroed and the interior rewritten each step (no concat copies); the kj (W)
    offset costs one sublane-shifted strip per kj, ki is a free leading slice.
    """
    P = ksize // 2
    Hpp, Wpp, TD = hpad_ref.shape
    Hp, Wp = Hpp - 2 * P, Wpp - 2 * P

    # zero halo borders (cheap thin slabs; interior is fully rewritten below)
    zrow = jnp.zeros((P, Wpp, TD), jnp.float32)
    hpad_ref[0:P, :, :] = zrow
    hpad_ref[Hpp - P:Hpp, :, :] = zrow
    zcol = jnp.zeros((Hpp, P, TD), jnp.float32)
    hpad_ref[:, 0:P, :] = zcol
    hpad_ref[:, Wpp - P:Wpp, :] = zcol

    x = t_ref[0].astype(jnp.float32)                         # (Hp, Wp, TD)
    h = x * sc_ref[...] + sh_ref[...]                        # normalize previous stage
    hpad_ref[P:P + Hp, P:P + Wp, :] = h                      # interior only

    w = w_ref[...]                                           # (K*K, TD) f32 (VPU path)
    acc = jnp.zeros((Hp, Wp, TD), jnp.float32)
    for kj in range(ksize):
        strip = hpad_ref[:, kj:kj + Wp, :]                   # one W-shift per kj
        for ki in range(ksize):
            kk = ki * ksize + kj
            acc = acc + strip[ki:ki + Hp] * w[kk:kk + 1, :]
    t1 = _gelu(acc + b_ref[...])                             # pre-BN1, f32
    o_ref[0] = t1.astype(o_ref.dtype)

    ssum = jnp.sum(jnp.sum(t1, axis=0), axis=0, keepdims=True)
    ssq = jnp.sum(jnp.sum(t1 * t1, axis=0), axis=0, keepdims=True)
    stats_ref[0] = jnp.concatenate([ssum, ssq], axis=0)


def _pointwise_kernel(t1_ref, tp_ref, sc1_ref, sh1_ref, scp_ref, shp_ref,
                      w_ref, b_ref, o_ref, stats_ref):
    """BN1(dw out) + residual BN_prev(prev) -> 1x1 conv (bf16 GEMM) -> GELU; BN stats."""
    _, th, wp, dp = t1_ref.shape
    a1 = t1_ref[0].astype(jnp.float32) * sc1_ref[...] + sh1_ref[...]
    hp = tp_ref[0].astype(jnp.float32) * scp_ref[...] + shp_ref[...]
    u = (a1 + hp).reshape(th * wp, dp)
    v = jnp.dot(u.astype(w_ref.dtype), w_ref[...],
                preferred_element_type=jnp.float32) + b_ref[...]
    t2 = _gelu(v)                                            # pre-BN2, f32
    o_ref[0] = t2.reshape(th, wp, -1).astype(o_ref.dtype)

    @pl.when(pl.program_id(1) == 0)
    def _():
        stats_ref[...] = jnp.zeros_like(stats_ref)

    ssum = jnp.sum(t2, axis=0, keepdims=True)
    ssq = jnp.sum(t2 * t2, axis=0, keepdims=True)
    stats_ref[0] = stats_ref[0] + jnp.concatenate([ssum, ssq], axis=0)


def _pool_kernel(t_ref, sc_ref, sh_ref, pooled_ref, *, inv_count):
    """BN(last) -> global average pool, accumulated per batch item."""
    @pl.when(pl.program_id(1) == 0)
    def _():
        pooled_ref[...] = jnp.zeros_like(pooled_ref)

    h = t_ref[0].astype(jnp.float32) * sc_ref[...] + sh_ref[...]
    pooled_ref[0] = pooled_ref[0] + jnp.sum(jnp.sum(h, axis=0), axis=0, keepdims=True)

    @pl.when(pl.program_id(1) == pl.num_programs(1) - 1)
    def _():
        pooled_ref[...] = pooled_ref[...] * inv_count


def _classifier_kernel(p_ref, w_ref, b_ref, o_ref):
    """Single (B, Dp) x (Dp, Cp) classifier GEMM (all batch rows in one pass)."""
    pooled = p_ref[...][:, 0, :].astype(w_ref.dtype)
    o_ref[...] = jnp.dot(pooled, w_ref[...],
                         preferred_element_type=jnp.float32) + b_ref[...]


# ---------------------------------------------------------------------------
# pallas_call wrappers
# ---------------------------------------------------------------------------


def _patch_embed(xp4, w, b, *, th, vmem_limit):
    B, Hp, Wp, Kp = xp4.shape
    Dp = w.shape[1]
    nH = Hp // th
    return pl.pallas_call(
        _patch_embed_kernel,
        grid=(B, nH),
        in_specs=[
            pl.BlockSpec((1, th, Wp, Kp), lambda b_, h_: (b_, h_, 0, 0)),
            pl.BlockSpec((Kp, Dp), lambda b_, h_: (0, 0)),
            pl.BlockSpec((1, Dp), lambda b_, h_: (0, 0)),
        ],
        out_specs=[
            pl.BlockSpec((1, th, Wp, Dp), lambda b_, h_: (b_, h_, 0, 0)),
            pl.BlockSpec((1, 2, Dp), lambda b_, h_: (b_, 0, 0)),
        ],
        out_shape=(
            jax.ShapeDtypeStruct((B, Hp, Wp, Dp), _ACT_DTYPE),
            jax.ShapeDtypeStruct((B, 2, Dp), jnp.float32),
        ),
        compiler_params=pltpu.CompilerParams(
            dimension_semantics=("parallel", "arbitrary"),
            vmem_limit_bytes=vmem_limit),
    )(xp4, w, b)


def _depthwise(t, scale, shift, w, b, *, ksize, td, vmem_limit):
    B, Hp, Wp, Dp = t.shape
    nD = Dp // td
    P = ksize // 2
    kern = functools.partial(_depthwise_kernel, ksize=ksize)
    return pl.pallas_call(
        kern,
        grid=(B, nD),                 # batch outer (parallel), channel blocks inner
        in_specs=[
            pl.BlockSpec((1, Hp, Wp, td), lambda b_, d_: (b_, 0, 0, d_)),
            pl.BlockSpec((1, td), lambda b_, d_: (0, d_)),
            pl.BlockSpec((1, td), lambda b_, d_: (0, d_)),
            pl.BlockSpec((ksize * ksize, td), lambda b_, d_: (0, d_)),
            pl.BlockSpec((1, td), lambda b_, d_: (0, d_)),
        ],
        out_specs=[
            pl.BlockSpec((1, Hp, Wp, td), lambda b_, d_: (b_, 0, 0, d_)),
            pl.BlockSpec((1, 2, td), lambda b_, d_: (b_, 0, d_)),
        ],
        out_shape=(
            jax.ShapeDtypeStruct((B, Hp, Wp, Dp), _ACT_DTYPE),
            jax.ShapeDtypeStruct((B, 2, Dp), jnp.float32),
        ),
        scratch_shapes=[pltpu.VMEM((Hp + 2 * P, Wp + 2 * P, td), jnp.float32)],
        compiler_params=pltpu.CompilerParams(
            dimension_semantics=("parallel", "arbitrary"),
            vmem_limit_bytes=vmem_limit),
    )(t, scale, shift, w, b)


def _pointwise(t1, t_prev, sc1, sh1, scp, shp, w, b, *, th, vmem_limit):
    B, Hp, Wp, Dp = t1.shape
    nH = Hp // th
    act = pl.BlockSpec((1, th, Wp, Dp), lambda b_, h_: (b_, h_, 0, 0))
    vec = pl.BlockSpec((1, Dp), lambda b_, h_: (0, 0))
    return pl.pallas_call(
        _pointwise_kernel,
        grid=(B, nH),
        in_specs=[act, act, vec, vec, vec, vec,
                  pl.BlockSpec((Dp, Dp), lambda b_, h_: (0, 0)), vec],
        out_specs=[act,
                   pl.BlockSpec((1, 2, Dp), lambda b_, h_: (b_, 0, 0))],
        out_shape=(
            jax.ShapeDtypeStruct((B, Hp, Wp, Dp), _ACT_DTYPE),
            jax.ShapeDtypeStruct((B, 2, Dp), jnp.float32),
        ),
        compiler_params=pltpu.CompilerParams(
            dimension_semantics=("parallel", "arbitrary"),
            vmem_limit_bytes=vmem_limit),
    )(t1, t_prev, sc1, sh1, scp, shp, w, b)


def _pool(t, scale, shift, *, th, hw, vmem_limit):
    B, Hp, Wp, Dp = t.shape
    nH = Hp // th
    kern = functools.partial(_pool_kernel, inv_count=1.0 / float(hw))
    return pl.pallas_call(
        kern,
        grid=(B, nH),
        in_specs=[
            pl.BlockSpec((1, th, Wp, Dp), lambda b_, h_: (b_, h_, 0, 0)),
            pl.BlockSpec((1, Dp), lambda b_, h_: (0, 0)),
            pl.BlockSpec((1, Dp), lambda b_, h_: (0, 0)),
        ],
        out_specs=pl.BlockSpec((1, 1, Dp), lambda b_, h_: (b_, 0, 0)),
        out_shape=jax.ShapeDtypeStruct((B, 1, Dp), jnp.float32),
        compiler_params=pltpu.CompilerParams(
            dimension_semantics=("parallel", "arbitrary"),
            vmem_limit_bytes=vmem_limit),
    )(t, scale, shift)


def _classifier(pooled, w, b, *, vmem_limit):
    B = pooled.shape[0]
    Dp, Cp = w.shape
    return pl.pallas_call(
        _classifier_kernel,
        grid=(1,),
        in_specs=[
            pl.BlockSpec((B, 1, Dp), lambda i: (0, 0, 0)),
            pl.BlockSpec((Dp, Cp), lambda i: (0, 0)),
            pl.BlockSpec((1, Cp), lambda i: (0, 0)),
        ],
        out_specs=pl.BlockSpec((B, Cp), lambda i: (0, 0)),
        out_shape=jax.ShapeDtypeStruct((B, Cp), jnp.float32),
        compiler_params=pltpu.CompilerParams(
            dimension_semantics=("arbitrary",),
            vmem_limit_bytes=vmem_limit),
    )(pooled, w, b)


# ---------------------------------------------------------------------------
# tiny epilogue / layout helpers (XLA-side, (B, 2, Dp)-sized only)
# ---------------------------------------------------------------------------


def _bn_affine(stats, gamma, beta, count):
    # training-mode BatchNorm2d: biased variance over all N*H*W rows, eps=1e-5
    s = jnp.sum(stats, axis=0)                       # sum per-batch-item stats -> (2, Dp)
    mean = s[0:1, :] / count
    var = jnp.maximum(s[1:2, :] / count - mean * mean, 0.0)
    scale = gamma * jax.lax.rsqrt(var + _EPS)
    shift = beta - mean * scale
    return scale, shift


def _round_up(x, m):
    return (x + m - 1) // m * m


def _largest_divisor(n, cap):
    cap = max(1, min(n, cap))
    for d in range(cap, 0, -1):
        if n % d == 0:
            return d
    return 1


def _pick_th(Hp, Wp, Dp, vmem_limit):
    # ~3 bf16 activation tiles (t1, prev, out), double-buffered, + f32 temporaries
    per_row = Wp * Dp * 2
    cap = max(1, (vmem_limit // 3) // (per_row * 8))
    return _largest_divisor(Hp, cap)


def _pick_td(Hp, Wp, Dp, ksize, vmem_limit):
    # per-channel bytes: bf16 in/out double-buffered + f32 halo scratch + f32 temps
    P = ksize // 2
    spatial = Hp * Wp
    padded = (Hp + 2 * P) * (Wp + 2 * P)
    per_ch = spatial * 8 + padded * 4 + spatial * 16
    groups = max(1, Dp // 128)
    cap = max(1, (vmem_limit // 2) // (per_ch * 128))
    return 128 * _largest_divisor(groups, cap)


# ---------------------------------------------------------------------------
# parameters
# ---------------------------------------------------------------------------


def init_params(key, in_channels, hidden_dim, n_layers, kernel_size, patch_size,
                num_classes):
    D, K, p, C = hidden_dim, kernel_size, patch_size, num_classes
    Dp = _round_up(D, 128)
    Cp = _round_up(C, 128)
    Kin = in_channels * p * p
    Kp = _round_up(Kin, 128)
    keys = iter(jax.random.split(key, 6 + 2 * n_layers))

    def nrm(shape, scale=0.1):
        return (scale * jax.random.normal(next(keys), shape)).astype(jnp.float32)

    def pad_to(a, shape):
        return jnp.pad(a, [(0, s - d) for d, s in zip(a.shape, shape)])

    pe_w = nrm((D, in_channels, p, p)).reshape(D, Kin).T      # (Kin, D)
    dw_w = nrm((D, 1, K, K)).reshape(D, K * K).T              # (K*K, D)

    params = {
        # patch embedding (conv stride p, lane-dense contraction dim) + its BN
        'pe_w': pad_to(pe_w, (Kp, Dp)).astype(_MXU_DTYPE),
        'pe_b': pad_to(nrm((1, D)), (1, Dp)),
        'pe_g': pad_to(jnp.ones((1, D), jnp.float32), (1, Dp)),
        'pe_beta': jnp.zeros((1, Dp), jnp.float32),
        # SHARED depthwise sublayer (same module reused in every mixer block)
        'dw_w': pad_to(dw_w, (K * K, Dp)),                    # f32 (VPU path)
        'dw_b': pad_to(nrm((1, D)), (1, Dp)),
        'bn1_g': pad_to(jnp.ones((1, D), jnp.float32), (1, Dp)),
        'bn1_b': jnp.zeros((1, Dp), jnp.float32),
        # classifier
        'cls_w': pad_to(nrm((C, D)).T, (Dp, Cp)).astype(_MXU_DTYPE),
        'cls_b': pad_to(nrm((1, C)), (1, Cp)),
        'layers': [],
    }
    for _ in range(n_layers):
        params['layers'].append({
            'pw_w': pad_to(nrm((D, D)).T, (Dp, Dp)).astype(_MXU_DTYPE),
            'pw_b': pad_to(nrm((1, D)), (1, Dp)),
            'bn2_g': pad_to(jnp.ones((1, D), jnp.float32), (1, Dp)),
            'bn2_b': jnp.zeros((1, Dp), jnp.float32),
        })
    return params


# ---------------------------------------------------------------------------
# forward
# ---------------------------------------------------------------------------


def conv_mixer_forward(x_nchw, params, *, patch_size, kernel_size, num_classes):
    B, Cin, H, W = x_nchw.shape
    p = patch_size
    Hp, Wp = H // p, W // p
    Dp = params['pe_b'].shape[1]
    Kp = params['pe_w'].shape[0]
    count = float(B * Hp * Wp)

    # one-time patchify layout glue: NCHW -> (B, Hp, Wp, Kp) bf16, lane-dense Kp
    Kin = Cin * p * p
    xp4 = (x_nchw.reshape(B, Cin, Hp, p, Wp, p)
           .transpose(0, 2, 4, 1, 3, 5)
           .reshape(B, Hp, Wp, Kin))
    if Kp > Kin:
        xp4 = jnp.pad(xp4, ((0, 0), (0, 0), (0, 0), (0, Kp - Kin)))
    xp4 = xp4.astype(_MXU_DTYPE)

    vmem_limit = _vmem_limit_bytes()
    th = _pick_th(Hp, Wp, Dp, vmem_limit)
    td = _pick_td(Hp, Wp, Dp, kernel_size, vmem_limit)

    # stage 0: patch embedding (pre-BN bf16 activation + per-batch BN stats)
    t, stats = _patch_embed(xp4, params['pe_w'], params['pe_b'],
                            th=th, vmem_limit=vmem_limit)
    scale, shift = _bn_affine(stats, params['pe_g'], params['pe_beta'], count)

    # mixer blocks.  Training-mode BN needs batch-wide depthwise stats before
    # the 1x1 conv, so depthwise and pointwise stay two kernels (bf16 traffic).
    for lp in params['layers']:
        t1, stats1 = _depthwise(t, scale, shift, params['dw_w'], params['dw_b'],
                                ksize=kernel_size, td=td, vmem_limit=vmem_limit)
        scale1, shift1 = _bn_affine(stats1, params['bn1_g'], params['bn1_b'], count)
        t2, stats2 = _pointwise(t1, t, scale1, shift1, scale, shift,
                                lp['pw_w'], lp['pw_b'], th=th, vmem_limit=vmem_limit)
        scale2, shift2 = _bn_affine(stats2, lp['bn2_g'], lp['bn2_b'], count)
        t, scale, shift = t2, scale2, shift2

    # head: BN(last) -> global avg pool -> single (B, Dp) x (Dp, Cp) GEMM
    pooled = _pool(t, scale, shift, th=th, hw=Hp * Wp, vmem_limit=vmem_limit)
    logits_p = _classifier(pooled, params['cls_w'], params['cls_b'],
                           vmem_limit=vmem_limit)
    return logits_p[:, :num_classes]


if __name__ == "__main__":
    key = jax.random.PRNGKey(0)
    B, Cin, H, W = 2, 4, 16, 16
    hidden_dim, n_layers, ksize, patch, num_classes = 32, 2, 5, 2, 10

    kx, kp = jax.random.split(key)
    x = jax.random.normal(kx, (B, Cin, H, W), jnp.float32)
    params = init_params(kp, Cin, hidden_dim, n_layers, ksize, patch, num_classes)

    fwd = jax.jit(functools.partial(conv_mixer_forward, patch_size=patch,
                                    kernel_size=ksize, num_classes=num_classes))
    logits = jax.block_until_ready(fwd(x, params))
    assert logits.shape == (B, num_classes)
    assert bool(jnp.all(jnp.isfinite(logits)))
    print("KERNEL_OK")
</pallas_src>

<mosaic_0001>
module attributes {stable_mosaic.version = 11 : i64} {
  func.func @_patch_embed_kernel(%arg0: i32, %arg1: i32, %arg2: memref<1x8x8x128xbf16, #tpu.memory_space<vmem>>, %arg3: memref<128x128xbf16, #tpu.memory_space<vmem>>, %arg4: memref<1x128xf32, #tpu.memory_space<vmem>>, %arg5: memref<1x8x8x128xbf16, #tpu.memory_space<vmem>>, %arg6: memref<1x2x128xf32, #tpu.memory_space<vmem>>) attributes {dimension_semantics = [#tpu.dimension_semantics<parallel>, #tpu.dimension_semantics<arbitrary>], iteration_bounds = array<i64: 2, 1>, scalar_prefetch = 0 : i64, scratch_operands = 0 : i64, tpu.core_type = #tpu.core_type<tc>, window_params = [{transform_indices = @transform_0, window_bounds = array<i64: 1, 8, 8, 128>}, {pipeline_mode = #tpu.pipeline_mode<synchronous>, transform_indices = @transform_1, window_bounds = array<i64: 128, 128>}, {pipeline_mode = #tpu.pipeline_mode<synchronous>, transform_indices = @transform_2, window_bounds = array<i64: 1, 128>}, {transform_indices = @transform_3, window_bounds = array<i64: 1, 8, 8, 128>}, {transform_indices = @transform_4, window_bounds = array<i64: 1, 2, 128>}]} {
    %c0 = arith.constant 0 : index
    %c0_0 = arith.constant 0 : index
    %c0_1 = arith.constant 0 : index
    %c0_2 = arith.constant 0 : index
    %0 = vector.load %arg2[%c0, %c0_0, %c0_1, %c0_2] : memref<1x8x8x128xbf16, #tpu.memory_space<vmem>>, vector<1x8x8x128xbf16>
    %1 = vector.shape_cast %0 : vector<1x8x8x128xbf16> to vector<8x8x128xbf16>
    %2 = vector.shape_cast %1 : vector<8x8x128xbf16> to vector<64x128xbf16>
    %c0_3 = arith.constant 0 : index
    %c0_4 = arith.constant 0 : index
    %3 = vector.load %arg3[%c0_3, %c0_4] : memref<128x128xbf16, #tpu.memory_space<vmem>>, vector<128x128xbf16>
    %cst = arith.constant dense<0.000000e+00> : vector<64x128xf32>
    %4 = tpu.matmul %2, %3, %cst {dimension_numbers = #tpu.dot_dimension_numbers<[1], [0], [0], [1], [0, 0, 1, 1], [], []>} : vector<64x128xbf16>, vector<128x128xbf16>, vector<64x128xf32> -> vector<64x128xf32>
    %c0_5 = arith.constant 0 : index
    %c0_6 = arith.constant 0 : index
    %5 = vector.load %arg4[%c0_5, %c0_6] : memref<1x128xf32, #tpu.memory_space<vmem>>, vector<1x128xf32>
    %6 = vector.broadcast %5 : vector<1x128xf32> to vector<64x128xf32>
    %7 = arith.addf %4, %6 : vector<64x128xf32>
    %cst_7 = arith.constant 5.000000e-01 : f32
    %8 = vector.broadcast %cst_7 : f32 to vector<64x128xf32>
    %9 = arith.mulf %8, %7 : vector<64x128xf32>
    %cst_8 = arith.constant 0.707106769 : f32
    %10 = vector.broadcast %cst_8 : f32 to vector<64x128xf32>
    %11 = arith.mulf %7, %10 : vector<64x128xf32>
    %cst_9 = arith.constant 0.000000e+00 : f32
    %12 = vector.broadcast %cst_9 : f32 to vector<64x128xf32>
    %13 = arith.cmpf oge, %11, %12 : vector<64x128xf32>
    %cst_10 = arith.constant 1.000000e+00 : f32
    %cst_11 = arith.constant -1.000000e+00 : f32
    %14 = vector.broadcast %cst_10 : f32 to vector<64x128xf32>
    %15 = vector.broadcast %cst_11 : f32 to vector<64x128xf32>
    %16 = arith.select %13, %14, %15 : vector<64x128xi1>, vector<64x128xf32>
    %17 = math.absf %11 : vector<64x128xf32>
    %cst_12 = arith.constant 0.327591091 : f32
    %18 = vector.broadcast %cst_12 : f32 to vector<64x128xf32>
    %19 = arith.mulf %18, %17 : vector<64x128xf32>
    %cst_13 = arith.constant 1.000000e+00 : f32
    %20 = vector.broadcast %cst_13 : f32 to vector<64x128xf32>
    %21 = arith.addf %20, %19 : vector<64x128xf32>
    %22 = tpu.reciprocal %21 {approx = true} : vector<64x128xf32> -> vector<64x128xf32>
    %23 = arith.mulf %21, %22 : vector<64x128xf32>
    %cst_14 = arith.constant 2.000000e+00 : f32
    %24 = vector.broadcast %cst_14 : f32 to vector<64x128xf32>
    %25 = arith.subf %24, %23 : vector<64x128xf32>
    %26 = arith.mulf %22, %25 : vector<64x128xf32>
    %cst_15 = arith.constant 1.06140542 : f32
    %27 = vector.broadcast %cst_15 : f32 to vector<64x128xf32>
    %28 = arith.mulf %27, %26 : vector<64x128xf32>
    %cst_16 = arith.constant -1.45315206 : f32
    %29 = vector.broadcast %cst_16 : f32 to vector<64x128xf32>
    %30 = arith.addf %28, %29 : vector<64x128xf32>
    %31 = arith.mulf %30, %26 : vector<64x128xf32>
    %cst_17 = arith.constant 1.42141378 : f32
    %32 = vector.broadcast %cst_17 : f32 to vector<64x128xf32>
    %33 = arith.addf %31, %32 : vector<64x128xf32>
    %34 = arith.mulf %33, %26 : vector<64x128xf32>
    %cst_18 = arith.constant -0.284496725 : f32
    %35 = vector.broadcast %cst_18 : f32 to vector<64x128xf32>
    %36 = arith.addf %34, %35 : vector<64x128xf32>
    %37 = arith.mulf %36, %26 : vector<64x128xf32>
    %cst_19 = arith.constant 0.254829586 : f32
    %38 = vector.broadcast %cst_19 : f32 to vector<64x128xf32>
    %39 = arith.addf %37, %38 : vector<64x128xf32>
    %40 = arith.mulf %39, %26 : vector<64x128xf32>
    %cst_20 = arith.constant 0.000000e+00 : f32
    %41 = vector.broadcast %cst_20 : f32 to vector<64x128xf32>
    %42 = arith.subf %41, %17 : vector<64x128xf32>
    %43 = arith.mulf %42, %17 : vector<64x128xf32>
    %44 = math.exp %43 : vector<64x128xf32>
    %45 = arith.mulf %40, %44 : vector<64x128xf32>
    %cst_21 = arith.constant 1.000000e+00 : f32
    %46 = vector.broadcast %cst_21 : f32 to vector<64x128xf32>
    %47 = arith.subf %46, %45 : vector<64x128xf32>
    %48 = arith.mulf %16, %47 : vector<64x128xf32>
    %cst_22 = arith.constant 1.000000e+00 : f32
    %49 = vector.broadcast %cst_22 : f32 to vector<64x128xf32>
    %50 = arith.addf %49, %48 : vector<64x128xf32>
    %51 = arith.mulf %9, %50 : vector<64x128xf32>
    %52 = vector.shape_cast %51 : vector<64x128xf32> to vector<8x8x128xf32>
    %53 = arith.truncf %52 : vector<8x8x128xf32> to vector<8x8x128xbf16>
    %c0_23 = arith.constant 0 : index
    %c0_24 = arith.constant 0 : index
    %c0_25 = arith.constant 0 : index
    %c0_26 = arith.constant 0 : index
    %54 = vector.load %arg5[%c0_23, %c0_24, %c0_25, %c0_26] : memref<1x8x8x128xbf16, #tpu.memory_space<vmem>>, vector<1x8x8x128xbf16>
    %55 = vector.shape_cast %54 : vector<1x8x8x128xbf16> to vector<8x8x128xbf16>
    %56 = vector.shape_cast %53 : vector<8x8x128xbf16> to vector<1x8x8x128xbf16>
    tpu.vector_store %arg5[%c0_23, %c0_24, %c0_25, %c0_26], %56 {strides = array<i32>} : memref<1x8x8x128xbf16, #tpu.memory_space<vmem>>, vector<1x8x8x128xbf16>,
    %c0_i32 = arith.constant 0 : i32
    %57 = arith.cmpi eq, %arg1, %c0_i32 : i32
    %58 = arith.extui %57 : i1 to i32
    %c0_i32_27 = arith.constant 0 : i32
    %59 = arith.cmpi ne, %58, %c0_i32_27 : i32
    scf.if %59 {
      %cst_36 = arith.constant 0.000000e+00 : f32
      %72 = vector.broadcast %cst_36 : f32 to vector<1x2x128xf32>
      %c0_37 = arith.constant 0 : index
      %c0_38 = arith.constant 0 : index
      %c0_39 = arith.constant 0 : index
      %73 = vector.load %arg6[%c0_37, %c0_38, %c0_39] : memref<1x2x128xf32, #tpu.memory_space<vmem>>, vector<1x2x128xf32>
      tpu.vector_store %arg6[%c0_37, %c0_38, %c0_39], %72 {strides = array<i32>} : memref<1x2x128xf32, #tpu.memory_space<vmem>>, vector<1x2x128xf32>,
    } else {
    }
    %cst_28 = arith.constant dense<0.000000e+00> : vector<128xf32>
    %60 = vector.multi_reduction <add>, %51, %cst_28 [0] : vector<64x128xf32> to vector<128xf32>
    %61 = vector.shape_cast %60 : vector<128xf32> to vector<1x128xf32>
    %62 = arith.mulf %51, %51 : vector<64x128xf32>
    %cst_29 = arith.constant dense<0.000000e+00> : vector<128xf32>
    %63 = vector.multi_reduction <add>, %62, %cst_29 [0] : vector<64x128xf32> to vector<128xf32>
    %64 = vector.shape_cast %63 : vector<128xf32> to vector<1x128xf32>
    %c0_30 = arith.constant 0 : index
    %c0_31 = arith.constant 0 : index
    %c0_32 = arith.constant 0 : index
    %65 = vector.load %arg6[%c0_30, %c0_31, %c0_32] : memref<1x2x128xf32, #tpu.memory_space<vmem>>, vector<1x2x128xf32>
    %66 = vector.shape_cast %65 : vector<1x2x128xf32> to vector<2x128xf32>
    %67 = tpu.concatenate %61, %64 in 0 : vector<1x128xf32>, vector<1x128xf32> -> vector<2x128xf32>
    %68 = arith.addf %66, %67 : vector<2x128xf32>
    %c0_33 = arith.constant 0 : index
    %c0_34 = arith.constant 0 : index
    %c0_35 = arith.constant 0 : index
    %69 = vector.load %arg6[%c0_33, %c0_34, %c0_35] : memref<1x2x128xf32, #tpu.memory_space<vmem>>, vector<1x2x128xf32>
    %70 = vector.shape_cast %69 : vector<1x2x128xf32> to vector<2x128xf32>
    %71 = vector.shape_cast %68 : vector<2x128xf32> to vector<1x2x128xf32>
    tpu.vector_store %arg6[%c0_33, %c0_34, %c0_35], %71 {strides = array<i32>} : memref<1x2x128xf32, #tpu.memory_space<vmem>>, vector<1x2x128xf32>,
    return
  }
  func.func @transform_0(%arg0: i32, %arg1: i32) -> (i32, i32, i32, i32) {
    %c0_i32 = arith.constant 0 : i32
    %c0_i32_0 = arith.constant 0 : i32
    %c0_i32_1 = arith.constant 0 : i32
    return %arg0, %arg1, %c0_i32, %c0_i32_0 : i32, i32, i32, i32
  }
  func.func @transform_1(%arg0: i32, %arg1: i32) -> (i32, i32) {
    %c0_i32 = arith.constant 0 : i32
    %c0_i32_0 = arith.constant 0 : i32
    %c0_i32_1 = arith.constant 0 : i32
    return %c0_i32, %c0_i32_0 : i32, i32
  }
  func.func @transform_2(%arg0: i32, %arg1: i32) -> (i32, i32) {
    %c0_i32 = arith.constant 0 : i32
    %c0_i32_0 = arith.constant 0 : i32
    %c0_i32_1 = arith.constant 0 : i32
    return %c0_i32, %c0_i32_0 : i32, i32
  }
  func.func @transform_3(%arg0: i32, %arg1: i32) -> (i32, i32, i32, i32) {
    %c0_i32 = arith.constant 0 : i32
    %c0_i32_0 = arith.constant 0 : i32
    %c0_i32_1 = arith.constant 0 : i32
    return %arg0, %arg1, %c0_i32, %c0_i32_0 : i32, i32, i32, i32
  }
  func.func @transform_4(%arg0: i32, %arg1: i32) -> (i32, i32, i32) {
    %c0_i32 = arith.constant 0 : i32
    %c0_i32_0 = arith.constant 0 : i32
    %c0_i32_1 = arith.constant 0 : i32
    return %arg0, %c0_i32, %c0_i32_0 : i32, i32, i32
  }
}

module attributes {stable_mosaic.version = 11 : i64} {
  func.func @_pool_kernel(%arg0: i32, %arg1: i32, %arg2: memref<1x8x8x128xbf16, #tpu.memory_space<vmem>>, %arg3: memref<1x128xf32, #tpu.memory_space<vmem>>, %arg4: memref<1x128xf32, #tpu.memory_space<vmem>>, %arg5: memref<1x1x128xf32, #tpu.memory_space<vmem>>) attributes {dimension_semantics = [#tpu.dimension_semantics<parallel>, #tpu.dimension_semantics<arbitrary>], iteration_bounds = array<i64: 2, 1>, scalar_prefetch = 0 : i64, scratch_operands = 0 : i64, tpu.core_type = #tpu.core_type<tc>, window_params = [{transform_indices = @transform_0, window_bounds = array<i64: 1, 8, 8, 128>}, {pipeline_mode = #tpu.pipeline_mode<synchronous>, transform_indices = @transform_1, window_bounds = array<i64: 1, 128>}, {pipeline_mode = #tpu.pipeline_mode<synchronous>, transform_indices = @transform_2, window_bounds = array<i64: 1, 128>}, {transform_indices = @transform_3, window_bounds = array<i64: 1, 1, 128>}]} {
    %c0_i32 = arith.constant 0 : i32
    %0 = arith.cmpi eq, %arg1, %c0_i32 : i32
    %1 = arith.extui %0 : i1 to i32
    %c0_i32_0 = arith.constant 0 : i32
    %2 = arith.cmpi ne, %1, %c0_i32_0 : i32
    scf.if %2 {
      %cst_17 = arith.constant 0.000000e+00 : f32
      %26 = vector.broadcast %cst_17 : f32 to vector<1x1x128xf32>
      %c0_18 = arith.constant 0 : index
      %c0_19 = arith.constant 0 : index
      %c0_20 = arith.constant 0 : index
      %27 = vector.load %arg5[%c0_18, %c0_19, %c0_20] : memref<1x1x128xf32, #tpu.memory_space<vmem>>, vector<1x1x128xf32>
      tpu.vector_store %arg5[%c0_18, %c0_19, %c0_20], %26 {strides = array<i32>} : memref<1x1x128xf32, #tpu.memory_space<vmem>>, vector<1x1x128xf32>,
    } else {
    }
    %c0 = arith.constant 0 : index
    %c0_1 = arith.constant 0 : index
    %c0_2 = arith.constant 0 : index
    %c0_3 = arith.constant 0 : index
    %3 = vector.load %arg2[%c0, %c0_1, %c0_2, %c0_3] : memref<1x8x8x128xbf16, #tpu.memory_space<vmem>>, vector<1x8x8x128xbf16>
    %4 = vector.shape_cast %3 : vector<1x8x8x128xbf16> to vector<8x8x128xbf16>
    %5 = arith.extf %4 : vector<8x8x128xbf16> to vector<8x8x128xf32>
    %c0_4 = arith.constant 0 : index
    %c0_5 = arith.constant 0 : index
    %6 = vector.load %arg3[%c0_4, %c0_5] : memref<1x128xf32, #tpu.memory_space<vmem>>, vector<1x128xf32>
    %7 = vector.shape_cast %6 : vector<1x128xf32> to vector<1x1x128xf32>
    %8 = vector.broadcast %7 : vector<1x1x128xf32> to vector<8x8x128xf32>
    %9 = arith.mulf %5, %8 : vector<8x8x128xf32>
    %c0_6 = arith.constant 0 : index
    %c0_7 = arith.constant 0 : index
    %10 = vector.load %arg4[%c0_6, %c0_7] : memref<1x128xf32, #tpu.memory_space<vmem>>, vector<1x128xf32>
    %11 = vector.shape_cast %10 : vector<1x128xf32> to vector<1x1x128xf32>
    %12 = vector.broadcast %11 : vector<1x1x128xf32> to vector<8x8x128xf32>
    %13 = arith.addf %9, %12 : vector<8x8x128xf32>
    %c0_8 = arith.constant 0 : index
    %c0_9 = arith.constant 0 : index
    %c0_10 = arith.constant 0 : index
    %14 = vector.load %arg5[%c0_8, %c0_9, %c0_10] : memref<1x1x128xf32, #tpu.memory_space<vmem>>, vector<1x1x128xf32>
    %15 = vector.shape_cast %14 : vector<1x1x128xf32> to vector<1x128xf32>
    %cst = arith.constant dense<0.000000e+00> : vector<8x128xf32>
    %16 = vector.multi_reduction <add>, %13, %cst [0] : vector<8x8x128xf32> to vector<8x128xf32>
    %cst_11 = arith.constant dense<0.000000e+00> : vector<128xf32>
    %17 = vector.multi_reduction <add>, %16, %cst_11 [0] : vector<8x128xf32> to vector<128xf32>
    %18 = vector.shape_cast %17 : vector<128xf32> to vector<1x128xf32>
    %19 = arith.addf %15, %18 : vector<1x128xf32>
    %c0_12 = arith.constant 0 : index
    %c0_13 = arith.constant 0 : index
    %c0_14 = arith.constant 0 : index
    %20 = vector.load %arg5[%c0_12, %c0_13, %c0_14] : memref<1x1x128xf32, #tpu.memory_space<vmem>>, vector<1x1x128xf32>
    %21 = vector.shape_cast %20 : vector<1x1x128xf32> to vector<1x128xf32>
    %22 = vector.shape_cast %19 : vector<1x128xf32> to vector<1x1x128xf32>
    tpu.vector_store %arg5[%c0_12, %c0_13, %c0_14], %22 {strides = array<i32>} : memref<1x1x128xf32, #tpu.memory_space<vmem>>, vector<1x1x128xf32>,
    %c0_i32_15 = arith.constant 0 : i32
    %23 = arith.cmpi eq, %arg1, %c0_i32_15 : i32
    %24 = arith.extui %23 : i1 to i32
    %c0_i32_16 = arith.constant 0 : i32
    %25 = arith.cmpi ne, %24, %c0_i32_16 : i32
    scf.if %25 {
      %c0_17 = arith.constant 0 : index
      %c0_18 = arith.constant 0 : index
      %c0_19 = arith.constant 0 : index
      %26 = vector.load %arg5[%c0_17, %c0_18, %c0_19] : memref<1x1x128xf32, #tpu.memory_space<vmem>>, vector<1x1x128xf32>
      %cst_20 = arith.constant 1.562500e-02 : f32
      %27 = vector.broadcast %cst_20 : f32 to vector<1x1x128xf32>
      %28 = arith.mulf %26, %27 : vector<1x1x128xf32>
      %c0_21 = arith.constant 0 : index
      %c0_22 = arith.constant 0 : index
      %c0_23 = arith.constant 0 : index
      %29 = vector.load %arg5[%c0_21, %c0_22, %c0_23] : memref<1x1x128xf32, #tpu.memory_space<vmem>>, vector<1x1x128xf32>
      tpu.vector_store %arg5[%c0_21, %c0_22, %c0_23], %28 {strides = array<i32>} : memref<1x1x128xf32, #tpu.memory_space<vmem>>, vector<1x1x128xf32>,
    } else {
    }
    return
  }
  func.func @transform_0(%arg0: i32, %arg1: i32) -> (i32, i32, i32, i32) {
    %c0_i32 = arith.constant 0 : i32
    %c0_i32_0 = arith.constant 0 : i32
    %c0_i32_1 = arith.constant 0 : i32
    return %arg0, %arg1, %c0_i32, %c0_i32_0 : i32, i32, i32, i32
  }
  func.func @transform_1(%arg0: i32, %arg1: i32) -> (i32, i32) {
    %c0_i32 = arith.constant 0 : i32
    %c0_i32_0 = arith.constant 0 : i32
    %c0_i32_1 = arith.constant 0 : i32
    return %c0_i32, %c0_i32_0 : i32, i32
  }
  func.func @transform_2(%arg0: i32, %arg1: i32) -> (i32, i32) {
    %c0_i32 = arith.constant 0 : i32
    %c0_i32_0 = arith.constant 0 : i32
    %c0_i32_1 = arith.constant 0 : i32
    return %c0_i32, %c0_i32_0 : i32, i32
  }
  func.func @transform_3(%arg0: i32, %arg1: i32) -> (i32, i32, i32) {
    %c0_i32 = arith.constant 0 : i32
    %c0_i32_0 = arith.constant 0 : i32
    %c0_i32_1 = arith.constant 0 : i32
    return %arg0, %c0_i32, %c0_i32_0 : i32, i32, i32
  }
}

module attributes {stable_mosaic.version = 11 : i64} {
  func.func @_pointwise_kernel(%arg0: i32, %arg1: i32, %arg2: memref<1x8x8x128xbf16, #tpu.memory_space<vmem>>, %arg3: memref<1x8x8x128xbf16, #tpu.memory_space<vmem>>, %arg4: memref<1x128xf32, #tpu.memory_space<vmem>>, %arg5: memref<1x128xf32, #tpu.memory_space<vmem>>, %arg6: memref<1x128xf32, #tpu.memory_space<vmem>>, %arg7: memref<1x128xf32, #tpu.memory_space<vmem>>, %arg8: memref<128x128xbf16, #tpu.memory_space<vmem>>, %arg9: memref<1x128xf32, #tpu.memory_space<vmem>>, %arg10: memref<1x8x8x128xbf16, #tpu.memory_space<vmem>>, %arg11: memref<1x2x128xf32, #tpu.memory_space<vmem>>) attributes {dimension_semantics = [#tpu.dimension_semantics<parallel>, #tpu.dimension_semantics<arbitrary>], iteration_bounds = array<i64: 2, 1>, scalar_prefetch = 0 : i64, scratch_operands = 0 : i64, tpu.core_type = #tpu.core_type<tc>, window_params = [{transform_indices = @transform_0, window_bounds = array<i64: 1, 8, 8, 128>}, {transform_indices = @transform_1, window_bounds = array<i64: 1, 8, 8, 128>}, {pipeline_mode = #tpu.pipeline_mode<synchronous>, transform_indices = @transform_2, window_bounds = array<i64: 1, 128>}, {pipeline_mode = #tpu.pipeline_mode<synchronous>, transform_indices = @transform_3, window_bounds = array<i64: 1, 128>}, {pipeline_mode = #tpu.pipeline_mode<synchronous>, transform_indices = @transform_4, window_bounds = array<i64: 1, 128>}, {pipeline_mode = #tpu.pipeline_mode<synchronous>, transform_indices = @transform_5, window_bounds = array<i64: 1, 128>}, {pipeline_mode = #tpu.pipeline_mode<synchronous>, transform_indices = @transform_6, window_bounds = array<i64: 128, 128>}, {pipeline_mode = #tpu.pipeline_mode<synchronous>, transform_indices = @transform_7, window_bounds = array<i64: 1, 128>}, {transform_indices = @transform_8, window_bounds = array<i64: 1, 8, 8, 128>}, {transform_indices = @transform_9, window_bounds = array<i64: 1, 2, 128>}]} {
    %c0 = arith.constant 0 : index
    %c0_0 = arith.constant 0 : index
    %c0_1 = arith.constant 0 : index
    %c0_2 = arith.constant 0 : index
    %0 = vector.load %arg2[%c0, %c0_0, %c0_1, %c0_2] : memref<1x8x8x128xbf16, #tpu.memory_space<vmem>>, vector<1x8x8x128xbf16>
    %1 = vector.shape_cast %0 : vector<1x8x8x128xbf16> to vector<8x8x128xbf16>
    %2 = arith.extf %1 : vector<8x8x128xbf16> to vector<8x8x128xf32>
    %c0_3 = arith.constant 0 : index
    %c0_4 = arith.constant 0 : index
    %3 = vector.load %arg4[%c0_3, %c0_4] : memref<1x128xf32, #tpu.memory_space<vmem>>, vector<1x128xf32>
    %4 = vector.shape_cast %3 : vector<1x128xf32> to vector<1x1x128xf32>
    %5 = vector.broadcast %4 : vector<1x1x128xf32> to vector<8x8x128xf32>
    %6 = arith.mulf %2, %5 : vector<8x8x128xf32>
    %c0_5 = arith.constant 0 : index
    %c0_6 = arith.constant 0 : index
    %7 = vector.load %arg5[%c0_5, %c0_6] : memref<1x128xf32, #tpu.memory_space<vmem>>, vector<1x128xf32>
    %8 = vector.shape_cast %7 : vector<1x128xf32> to vector<1x1x128xf32>
    %9 = vector.broadcast %8 : vector<1x1x128xf32> to vector<8x8x128xf32>
    %10 = arith.addf %6, %9 : vector<8x8x128xf32>
    %c0_7 = arith.constant 0 : index
    %c0_8 = arith.constant 0 : index
    %c0_9 = arith.constant 0 : index
    %c0_10 = arith.constant 0 : index
    %11 = vector.load %arg3[%c0_7, %c0_8, %c0_9, %c0_10] : memref<1x8x8x128xbf16, #tpu.memory_space<vmem>>, vector<1x8x8x128xbf16>
    %12 = vector.shape_cast %11 : vector<1x8x8x128xbf16> to vector<8x8x128xbf16>
    %13 = arith.extf %12 : vector<8x8x128xbf16> to vector<8x8x128xf32>
    %c0_11 = arith.constant 0 : index
    %c0_12 = arith.constant 0 : index
    %14 = vector.load %arg6[%c0_11, %c0_12] : memref<1x128xf32, #tpu.memory_space<vmem>>, vector<1x128xf32>
    %15 = vector.shape_cast %14 : vector<1x128xf32> to vector<1x1x128xf32>
    %16 = vector.broadcast %15 : vector<1x1x128xf32> to vector<8x8x128xf32>
    %17 = arith.mulf %13, %16 : vector<8x8x128xf32>
    %c0_13 = arith.constant 0 : index
    %c0_14 = arith.constant 0 : index
    %18 = vector.load %arg7[%c0_13, %c0_14] : memref<1x128xf32, #tpu.memory_space<vmem>>, vector<1x128xf32>
    %19 = vector.shape_cast %18 : vector<1x128xf32> to vector<1x1x128xf32>
    %20 = vector.broadcast %19 : vector<1x1x128xf32> to vector<8x8x128xf32>
    %21 = arith.addf %17, %20 : vector<8x8x128xf32>
    %22 = arith.addf %10, %21 : vector<8x8x128xf32>
    %23 = vector.shape_cast %22 : vector<8x8x128xf32> to vector<64x128xf32>
    %24 = arith.truncf %23 : vector<64x128xf32> to vector<64x128xbf16>
    %c0_15 = arith.constant 0 : index
    %c0_16 = arith.constant 0 : index
    %25 = vector.load %arg8[%c0_15, %c0_16] : memref<128x128xbf16, #tpu.memory_space<vmem>>, vector<128x128xbf16>
    %cst = arith.constant dense<0.000000e+00> : vector<64x128xf32>
    %26 = tpu.matmul %24, %25, %cst {dimension_numbers = #tpu.dot_dimension_numbers<[1], [0], [0], [1], [0, 0, 1, 1], [], []>} : vector<64x128xbf16>, vector<128x128xbf16>, vector<64x128xf32> -> vector<64x128xf32>
    %c0_17 = arith.constant 0 : index
    %c0_18 = arith.constant 0 : index
    %27 = vector.load %arg9[%c0_17, %c0_18] : memref<1x128xf32, #tpu.memory_space<vmem>>, vector<1x128xf32>
    %28 = vector.broadcast %27 : vector<1x128xf32> to vector<64x128xf32>
    %29 = arith.addf %26, %28 : vector<64x128xf32>
    %cst_19 = arith.constant 5.000000e-01 : f32
    %30 = vector.broadcast %cst_19 : f32 to vector<64x128xf32>
    %31 = arith.mulf %30, %29 : vector<64x128xf32>
    %cst_20 = arith.constant 0.707106769 : f32
    %32 = vector.broadcast %cst_20 : f32 to vector<64x128xf32>
    %33 = arith.mulf %29, %32 : vector<64x128xf32>
    %cst_21 = arith.constant 0.000000e+00 : f32
    %34 = vector.broadcast %cst_21 : f32 to vector<64x128xf32>
    %35 = arith.cmpf oge, %33, %34 : vector<64x128xf32>
    %cst_22 = arith.constant 1.000000e+00 : f32
    %cst_23 = arith.constant -1.000000e+00 : f32
    %36 = vector.broadcast %cst_22 : f32 to vector<64x128xf32>
    %37 = vector.broadcast %cst_23 : f32 to vector<64x128xf32>
    %38 = arith.select %35, %36, %37 : vector<64x128xi1>, vector<64x128xf32>
    %39 = math.absf %33 : vector<64x128xf32>
    %cst_24 = arith.constant 0.327591091 : f32
    %40 = vector.broadcast %cst_24 : f32 to vector<64x128xf32>
    %41 = arith.mulf %40, %39 : vector<64x128xf32>
    %cst_25 = arith.constant 1.000000e+00 : f32
    %42 = vector.broadcast %cst_25 : f32 to vector<64x128xf32>
    %43 = arith.addf %42, %41 : vector<64x128xf32>
    %44 = tpu.reciprocal %43 {approx = true} : vector<64x128xf32> -> vector<64x128xf32>
    %45 = arith.mulf %43, %44 : vector<64x128xf32>
    %cst_26 = arith.constant 2.000000e+00 : f32
    %46 = vector.broadcast %cst_26 : f32 to vector<64x128xf32>
    %47 = arith.subf %46, %45 : vector<64x128xf32>
    %48 = arith.mulf %44, %47 : vector<64x128xf32>
    %cst_27 = arith.constant 1.06140542 : f32
    %49 = vector.broadcast %cst_27 : f32 to vector<64x128xf32>
    %50 = arith.mulf %49, %48 : vector<64x128xf32>
    %cst_28 = arith.constant -1.45315206 : f32
    %51 = vector.broadcast %cst_28 : f32 to vector<64x128xf32>
    %52 = arith.addf %50, %51 : vector<64x128xf32>
    %53 = arith.mulf %52, %48 : vector<64x128xf32>
    %cst_29 = arith.constant 1.42141378 : f32
    %54 = vector.broadcast %cst_29 : f32 to vector<64x128xf32>
    %55 = arith.addf %53, %54 : vector<64x128xf32>
    %56 = arith.mulf %55, %48 : vector<64x128xf32>
    %cst_30 = arith.constant -0.284496725 : f32
    %57 = vector.broadcast %cst_30 : f32 to vector<64x128xf32>
    %58 = arith.addf %56, %57 : vector<64x128xf32>
    %59 = arith.mulf %58, %48 : vector<64x128xf32>
    %cst_31 = arith.constant 0.254829586 : f32
    %60 = vector.broadcast %cst_31 : f32 to vector<64x128xf32>
    %61 = arith.addf %59, %60 : vector<64x128xf32>
    %62 = arith.mulf %61, %48 : vector<64x128xf32>
    %cst_32 = arith.constant 0.000000e+00 : f32
    %63 = vector.broadcast %cst_32 : f32 to vector<64x128xf32>
    %64 = arith.subf %63, %39 : vector<64x128xf32>
    %65 = arith.mulf %64, %39 : vector<64x128xf32>
    %66 = math.exp %65 : vector<64x128xf32>
    %67 = arith.mulf %62, %66 : vector<64x128xf32>
    %cst_33 = arith.constant 1.000000e+00 : f32
    %68 = vector.broadcast %cst_33 : f32 to vector<64x128xf32>
    %69 = arith.subf %68, %67 : vector<64x128xf32>
    %70 = arith.mulf %38, %69 : vector<64x128xf32>
    %cst_34 = arith.constant 1.000000e+00 : f32
    %71 = vector.broadcast %cst_34 : f32 to vector<64x128xf32>
    %72 = arith.addf %71, %70 : vector<64x128xf32>
    %73 = arith.mulf %31, %72 : vector<64x128xf32>
    %74 = vector.shape_cast %73 : vector<64x128xf32> to vector<8x8x128xf32>
    %75 = arith.truncf %74 : vector<8x8x128xf32> to vector<8x8x128xbf16>
    %c0_35 = arith.constant 0 : index
    %c0_36 = arith.constant 0 : index
    %c0_37 = arith.constant 0 : index
    %c0_38 = arith.constant 0 : index
    %76 = vector.load %arg10[%c0_35, %c0_36, %c0_37, %c0_38] : memref<1x8x8x128xbf16, #tpu.memory_space<vmem>>, vector<1x8x8x128xbf16>
    %77 = vector.shape_cast %76 : vector<1x8x8x128xbf16> to vector<8x8x128xbf16>
    %78 = vector.shape_cast %75 : vector<8x8x128xbf16> to vector<1x8x8x128xbf16>
    tpu.vector_store %arg10[%c0_35, %c0_36, %c0_37, %c0_38], %78 {strides = array<i32>} : memref<1x8x8x128xbf16, #tpu.memory_space<vmem>>, vector<1x8x8x128xbf16>,
    %c0_i32 = arith.constant 0 : i32
    %79 = arith.cmpi eq, %arg1, %c0_i32 : i32
    %80 = arith.extui %79 : i1 to i32
    %c0_i32_39 = arith.constant 0 : i32
    %81 = arith.cmpi ne, %80, %c0_i32_39 : i32
    scf.if %81 {
      %cst_48 = arith.constant 0.000000e+00 : f32
      %94 = vector.broadcast %cst_48 : f32 to vector<1x2x128xf32>
      %c0_49 = arith.constant 0 : index
      %c0_50 = arith.constant 0 : index
      %c0_51 = arith.constant 0 : index
      %95 = vector.load %arg11[%c0_49, %c0_50, %c0_51] : memref<1x2x128xf32, #tpu.memory_space<vmem>>, vector<1x2x128xf32>
      tpu.vector_store %arg11[%c0_49, %c0_50, %c0_51], %94 {strides = array<i32>} : memref<1x2x128xf32, #tpu.memory_space<vmem>>, vector<1x2x128xf32>,
    } else {
    }
    %cst_40 = arith.constant dense<0.000000e+00> : vector<128xf32>
    %82 = vector.multi_reduction <add>, %73, %cst_40 [0] : vector<64x128xf32> to vector<128xf32>
    %83 = vector.shape_cast %82 : vector<128xf32> to vector<1x128xf32>
    %84 = arith.mulf %73, %73 : vector<64x128xf32>
    %cst_41 = arith.constant dense<0.000000e+00> : vector<128xf32>
    %85 = vector.multi_reduction <add>, %84, %cst_41 [0] : vector<64x128xf32> to vector<128xf32>
    %86 = vector.shape_cast %85 : vector<128xf32> to vector<1x128xf32>
    %c0_42 = arith.constant 0 : index
    %c0_43 = arith.constant 0 : index
    %c0_44 = arith.constant 0 : index
    %87 = vector.load %arg11[%c0_42, %c0_43, %c0_44] : memref<1x2x128xf32, #tpu.memory_space<vmem>>, vector<1x2x128xf32>
    %88 = vector.shape_cast %87 : vector<1x2x128xf32> to vector<2x128xf32>
    %89 = tpu.concatenate %83, %86 in 0 : vector<1x128xf32>, vector<1x128xf32> -> vector<2x128xf32>
    %90 = arith.addf %88, %89 : vector<2x128xf32>
    %c0_45 = arith.constant 0 : index
    %c0_46 = arith.constant 0 : index
    %c0_47 = arith.constant 0 : index
    %91 = vector.load %arg11[%c0_45, %c0_46, %c0_47] : memref<1x2x128xf32, #tpu.memory_space<vmem>>, vector<1x2x128xf32>
    %92 = vector.shape_cast %91 : vector<1x2x128xf32> to vector<2x128xf32>
    %93 = vector.shape_cast %90 : vector<2x128xf32> to vector<1x2x128xf32>
    tpu.vector_store %arg11[%c0_45, %c0_46, %c0_47], %93 {strides = array<i32>} : memref<1x2x128xf32, #tpu.memory_space<vmem>>, vector<1x2x128xf32>,
    return
  }
  func.func @transform_0(%arg0: i32, %arg1: i32) -> (i32, i32, i32, i32) {
    %c0_i32 = arith.constant 0 : i32
    %c0_i32_0 = arith.constant 0 : i32
    %c0_i32_1 = arith.constant 0 : i32
    return %arg0, %arg1, %c0_i32, %c0_i32_0 : i32, i32, i32, i32
  }
  func.func @transform_1(%arg0: i32, %arg1: i32) -> (i32, i32, i32, i32) {
    %c0_i32 = arith.constant 0 : i32
    %c0_i32_0 = arith.constant 0 : i32
    %c0_i32_1 = arith.constant 0 : i32
    return %arg0, %arg1, %c0_i32, %c0_i32_0 : i32, i32, i32, i32
  }
  func.func @transform_2(%arg0: i32, %arg1: i32) -> (i32, i32) {
    %c0_i32 = arith.constant 0 : i32
    %c0_i32_0 = arith.constant 0 : i32
    %c0_i32_1 = arith.constant 0 : i32
    return %c0_i32, %c0_i32_0 : i32, i32
  }
  func.func @transform_3(%arg0: i32, %arg1: i32) -> (i32, i32) {
    %c0_i32 = arith.constant 0 : i32
    %c0_i32_0 = arith.constant 0 : i32
    %c0_i32_1 = arith.constant 0 : i32
    return %c0_i32, %c0_i32_0 : i32, i32
  }
  func.func @transform_4(%arg0: i32, %arg1: i32) -> (i32, i32) {
    %c0_i32 = arith.constant 0 : i32
    %c0_i32_0 = arith.constant 0 : i32
    %c0_i32_1 = arith.constant 0 : i32
    return %c0_i32, %c0_i32_0 : i32, i32
  }
  func.func @transform_5(%arg0: i32, %arg1: i32) -> (i32, i32) {
    %c0_i32 = arith.constant 0 : i32
    %c0_i32_0 = arith.constant 0 : i32
    %c0_i32_1 = arith.constant 0 : i32
    return %c0_i32, %c0_i32_0 : i32, i32
  }
  func.func @transform_6(%arg0: i32, %arg1: i32) -> (i32, i32) {
    %c0_i32 = arith.constant 0 : i32
    %c0_i32_0 = arith.constant 0 : i32
    %c0_i32_1 = arith.constant 0 : i32
    return %c0_i32, %c0_i32_0 : i32, i32
  }
  func.func @transform_7(%arg0: i32, %arg1: i32) -> (i32, i32) {
    %c0_i32 = arith.constant 0 : i32
    %c0_i32_0 = arith.constant 0 : i32
    %c0_i32_1 = arith.constant 0 : i32
    return %c0_i32, %c0_i32_0 : i32, i32
  }
  func.func @transform_8(%arg0: i32, %arg1: i32) -> (i32, i32, i32, i32) {
    %c0_i32 = arith.constant 0 : i32
    %c0_i32_0 = arith.constant 0 : i32
    %c0_i32_1 = arith.constant 0 : i32
    return %arg0, %arg1, %c0_i32, %c0_i32_0 : i32, i32, i32, i32
  }
  func.func @transform_9(%arg0: i32, %arg1: i32) -> (i32, i32, i32) {
    %c0_i32 = arith.constant 0 : i32
    %c0_i32_0 = arith.constant 0 : i32
    %c0_i32_1 = arith.constant 0 : i32
    return %arg0, %c0_i32, %c0_i32_0 : i32, i32, i32
  }
}

module attributes {stable_mosaic.version = 11 : i64} {
  func.func @_depthwise_kernel(%arg0: i32, %arg1: i32, %arg2: memref<1x8x8x128xbf16, #tpu.memory_space<vmem>>, %arg3: memref<1x128xf32, #tpu.memory_space<vmem>>, %arg4: memref<1x128xf32, #tpu.memory_space<vmem>>, %arg5: memref<25x128xf32, #tpu.memory_space<vmem>>, %arg6: memref<1x128xf32, #tpu.memory_space<vmem>>, %arg7: memref<1x8x8x128xbf16, #tpu.memory_space<vmem>>, %arg8: memref<1x2x128xf32, #tpu.memory_space<vmem>>, %arg9: memref<12x12x128xf32, #tpu.memory_space<vmem>>) attributes {dimension_semantics = [#tpu.dimension_semantics<parallel>, #tpu.dimension_semantics<arbitrary>], iteration_bounds = array<i64: 2, 1>, scalar_prefetch = 0 : i64, scratch_operands = 1 : i64, tpu.core_type = #tpu.core_type<tc>, window_params = [{transform_indices = @transform_0, window_bounds = array<i64: 1, 8, 8, 128>}, {transform_indices = @transform_1, window_bounds = array<i64: 1, 128>}, {transform_indices = @transform_2, window_bounds = array<i64: 1, 128>}, {transform_indices = @transform_3, window_bounds = array<i64: 25, 128>}, {transform_indices = @transform_4, window_bounds = array<i64: 1, 128>}, {transform_indices = @transform_5, window_bounds = array<i64: 1, 8, 8, 128>}, {transform_indices = @transform_6, window_bounds = array<i64: 1, 2, 128>}]} {
    %cst = arith.constant 0.000000e+00 : f32
    %0 = vector.broadcast %cst : f32 to vector<2x12x128xf32>
    %c0 = arith.constant 0 : index
    %c0_0 = arith.constant 0 : index
    %c0_1 = arith.constant 0 : index
    %1 = vector.load %arg9[%c0, %c0_0, %c0_1] : memref<12x12x128xf32, #tpu.memory_space<vmem>>, vector<2x12x128xf32>
    tpu.vector_store %arg9[%c0, %c0_0, %c0_1], %0 {strides = array<i32>} : memref<12x12x128xf32, #tpu.memory_space<vmem>>, vector<2x12x128xf32>,
    %c10 = arith.constant 10 : index
    %c0_2 = arith.constant 0 : index
    %c0_3 = arith.constant 0 : index
    %2 = vector.load %arg9[%c10, %c0_2, %c0_3] : memref<12x12x128xf32, #tpu.memory_space<vmem>>, vector<2x12x128xf32>
    tpu.vector_store %arg9[%c10, %c0_2, %c0_3], %0 {strides = array<i32>} : memref<12x12x128xf32, #tpu.memory_space<vmem>>, vector<2x12x128xf32>,
    %cst_4 = arith.constant 0.000000e+00 : f32
    %3 = vector.broadcast %cst_4 : f32 to vector<12x2x128xf32>
    %c0_5 = arith.constant 0 : index
    %c0_6 = arith.constant 0 : index
    %c0_7 = arith.constant 0 : index
    %4 = vector.load %arg9[%c0_5, %c0_6, %c0_7] : memref<12x12x128xf32, #tpu.memory_space<vmem>>, vector<12x2x128xf32>
    tpu.vector_store %arg9[%c0_5, %c0_6, %c0_7], %3 {strides = array<i32>} : memref<12x12x128xf32, #tpu.memory_space<vmem>>, vector<12x2x128xf32>,
    %c0_8 = arith.constant 0 : index
    %c10_9 = arith.constant 10 : index
    %c0_10 = arith.constant 0 : index
    %5 = vector.load %arg9[%c0_8, %c10_9, %c0_10] : memref<12x12x128xf32, #tpu.memory_space<vmem>>, vector<12x2x128xf32>
    tpu.vector_store %arg9[%c0_8, %c10_9, %c0_10], %3 {strides = array<i32>} : memref<12x12x128xf32, #tpu.memory_space<vmem>>, vector<12x2x128xf32>,
    %c0_11 = arith.constant 0 : index
    %c0_12 = arith.constant 0 : index
    %c0_13 = arith.constant 0 : index
    %c0_14 = arith.constant 0 : index
    %6 = vector.load %arg2[%c0_11, %c0_12, %c0_13, %c0_14] : memref<1x8x8x128xbf16, #tpu.memory_space<vmem>>, vector<1x8x8x128xbf16>
    %7 = vector.shape_cast %6 : vector<1x8x8x128xbf16> to vector<8x8x128xbf16>
    %8 = arith.extf %7 : vector<8x8x128xbf16> to vector<8x8x128xf32>
    %c0_15 = arith.constant 0 : index
    %c0_16 = arith.constant 0 : index
    %9 = vector.load %arg3[%c0_15, %c0_16] : memref<1x128xf32, #tpu.memory_space<vmem>>, vector<1x128xf32>
    %10 = vector.shape_cast %9 : vector<1x128xf32> to vector<1x1x128xf32>
    %11 = vector.broadcast %10 : vector<1x1x128xf32> to vector<8x8x128xf32>
    %12 = arith.mulf %8, %11 : vector<8x8x128xf32>
    %c0_17 = arith.constant 0 : index
    %c0_18 = arith.constant 0 : index
    %13 = vector.load %arg4[%c0_17, %c0_18] : memref<1x128xf32, #tpu.memory_space<vmem>>, vector<1x128xf32>
    %14 = vector.shape_cast %13 : vector<1x128xf32> to vector<1x1x128xf32>
    %15 = vector.broadcast %14 : vector<1x1x128xf32> to vector<8x8x128xf32>
    %16 = arith.addf %12, %15 : vector<8x8x128xf32>
    %c2 = arith.constant 2 : index
    %c2_19 = arith.constant 2 : index
    %c0_20 = arith.constant 0 : index
    %17 = vector.load %arg9[%c2, %c2_19, %c0_20] : memref<12x12x128xf32, #tpu.memory_space<vmem>>, vector<8x8x128xf32>
    tpu.vector_store %arg9[%c2, %c2_19, %c0_20], %16 {strides = array<i32>} : memref<12x12x128xf32, #tpu.memory_space<vmem>>, vector<8x8x128xf32>,
    %c0_21 = arith.constant 0 : index
    %c0_22 = arith.constant 0 : index
    %18 = vector.load %arg5[%c0_21, %c0_22] : memref<25x128xf32, #tpu.memory_space<vmem>>, vector<25x128xf32>
    %cst_23 = arith.constant 0.000000e+00 : f32
    %19 = vector.broadcast %cst_23 : f32 to vector<8x8x128xf32>
    %c0_24 = arith.constant 0 : index
    %c0_25 = arith.constant 0 : index
    %c0_26 = arith.constant 0 : index
    %20 = vector.load %arg9[%c0_24, %c0_25, %c0_26] : memref<12x12x128xf32, #tpu.memory_space<vmem>>, vector<12x8x128xf32>
    %21 = vector.extract_strided_slice %20 {offsets = [0, 0, 0], sizes = [8, 8, 128], strides = [1, 1, 1]} : vector<12x8x128xf32> to vector<8x8x128xf32>
    %22 = vector.extract_strided_slice %18 {offsets = [0, 0], sizes = [1, 128], strides = [1, 1]} : vector<25x128xf32> to vector<1x128xf32>
    %23 = vector.shape_cast %22 : vector<1x128xf32> to vector<1x1x128xf32>
    %24 = vector.broadcast %23 : vector<1x1x128xf32> to vector<8x8x128xf32>
    %25 = arith.mulf %21, %24 : vector<8x8x128xf32>
    %26 = arith.addf %19, %25 : vector<8x8x128xf32>
    %27 = vector.extract_strided_slice %20 {offsets = [1, 0, 0], sizes = [8, 8, 128], strides = [1, 1, 1]} : vector<12x8x128xf32> to vector<8x8x128xf32>
    %28 = vector.extract_strided_slice %18 {offsets = [5, 0], sizes = [1, 128], strides = [1, 1]} : vector<25x128xf32> to vector<1x128xf32>
    %29 = vector.shape_cast %28 : vector<1x128xf32> to vector<1x1x128xf32>
    %30 = vector.broadcast %29 : vector<1x1x128xf32> to vector<8x8x128xf32>
    %31 = arith.mulf %27, %30 : vector<8x8x128xf32>
    %32 = arith.addf %26, %31 : vector<8x8x128xf32>
    %33 = vector.extract_strided_slice %20 {offsets = [2, 0, 0], sizes = [8, 8, 128], strides = [1, 1, 1]} : vector<12x8x128xf32> to vector<8x8x128xf32>
    %34 = vector.extract_strided_slice %18 {offsets = [10, 0], sizes = [1, 128], strides = [1, 1]} : vector<25x128xf32> to vector<1x128xf32>
    %35 = vector.shape_cast %34 : vector<1x128xf32> to vector<1x1x128xf32>
    %36 = vector.broadcast %35 : vector<1x1x128xf32> to vector<8x8x128xf32>
    %37 = arith.mulf %33, %36 : vector<8x8x128xf32>
    %38 = arith.addf %32, %37 : vector<8x8x128xf32>
    %39 = vector.extract_strided_slice %20 {offsets = [3, 0, 0], sizes = [8, 8, 128], strides = [1, 1, 1]} : vector<12x8x128xf32> to vector<8x8x128xf32>
    %40 = vector.extract_strided_slice %18 {offsets = [15, 0], sizes = [1, 128], strides = [1, 1]} : vector<25x128xf32> to vector<1x128xf32>
    %41 = vector.shape_cast %40 : vector<1x128xf32> to vector<1x1x128xf32>
    %42 = vector.broadcast %41 : vector<1x1x128xf32> to vector<8x8x128xf32>
    %43 = arith.mulf %39, %42 : vector<8x8x128xf32>
    %44 = arith.addf %38, %43 : vector<8x8x128xf32>
    %45 = vector.extract_strided_slice %20 {offsets = [4, 0, 0], sizes = [8, 8, 128], strides = [1, 1, 1]} : vector<12x8x128xf32> to vector<8x8x128xf32>
    %46 = vector.extract_strided_slice %18 {offsets = [20, 0], sizes = [1, 128], strides = [1, 1]} : vector<25x128xf32> to vector<1x128xf32>
    %47 = vector.shape_cast %46 : vector<1x128xf32> to vector<1x1x128xf32>
    %48 = vector.broadcast %47 : vector<1x1x128xf32> to vector<8x8x128xf32>
    %49 = arith.mulf %45, %48 : vector<8x8x128xf32>
    %50 = arith.addf %44, %49 : vector<8x8x128xf32>
    %c0_27 = arith.constant 0 : index
    %c1 = arith.constant 1 : index
    %c0_28 = arith.constant 0 : index
    %51 = vector.load %arg9[%c0_27, %c1, %c0_28] : memref<12x12x128xf32, #tpu.memory_space<vmem>>, vector<12x8x128xf32>
    %52 = vector.extract_strided_slice %51 {offsets = [0, 0, 0], sizes = [8, 8, 128], strides = [1, 1, 1]} : vector<12x8x128xf32> to vector<8x8x128xf32>
    %53 = vector.extract_strided_slice %18 {offsets = [1, 0], sizes = [1, 128], strides = [1, 1]} : vector<25x128xf32> to vector<1x128xf32>
    %54 = vector.shape_cast %53 : vector<1x128xf32> to vector<1x1x128xf32>
    %55 = vector.broadcast %54 : vector<1x1x128xf32> to vector<8x8x128xf32>
    %56 = arith.mulf %52, %55 : vector<8x8x128xf32>
    %57 = arith.addf %50, %56 : vector<8x8x128xf32>
    %58 = vector.extract_strided_slice %51 {offsets = [1, 0, 0], sizes = [8, 8, 128], strides = [1, 1, 1]} : vector<12x8x128xf32> to vector<8x8x128xf32>
    %59 = vector.extract_strided_slice %18 {offsets = [6, 0], sizes = [1, 128], strides = [1, 1]} : vector<25x128xf32> to vector<1x128xf32>
    %60 = vector.shape_cast %59 : vector<1x128xf32> to vector<1x1x128xf32>
    %61 = vector.broadcast %60 : vector<1x1x128xf32> to vector<8x8x128xf32>
    %62 = arith.mulf %58, %61 : vector<8x8x128xf32>
    %63 = arith.addf %57, %62 : vector<8x8x128xf32>
    %64 = vector.extract_strided_slice %51 {offsets = [2, 0, 0], sizes = [8, 8, 128], strides = [1, 1, 1]} : vector<12x8x128xf32> to vector<8x8x128xf32>
    %65 = vector.extract_strided_slice %18 {offsets = [11, 0], sizes = [1, 128], strides = [1, 1]} : vector<25x128xf32> to vector<1x128xf32>
    %66 = vector.shape_cast %65 : vector<1x128xf32> to vector<1x1x128xf32>
    %67 = vector.broadcast %66 : vector<1x1x128xf32> to vector<8x8x128xf32>
    %68 = arith.mulf %64, %67 : vector<8x8x128xf32>
    %69 = arith.addf %63, %68 : vector<8x8x128xf32>
    %70 = vector.extract_strided_slice %51 {offsets = [3, 0, 0], sizes = [8, 8, 128], strides = [1, 1, 1]} : vector<12x8x128xf32> to vector<8x8x128xf32>
    %71 = vector.extract_strided_slice %18 {offsets = [16, 0], sizes = [1, 128], strides = [1, 1]} : vector<25x128xf32> to vector<1x128xf32>
    %72 = vector.shape_cast %71 : vector<1x128xf32> to vector<1x1x128xf32>
    %73 = vector.broadcast %72 : vector<1x1x128xf32> to vector<8x8x128xf32>
    %74 = arith.mulf %70, %73 : vector<8x8x128xf32>
    %75 = arith.addf %69, %74 : vector<8x8x128xf32>
    %76 = vector.extract_strided_slice %51 {offsets = [4, 0, 0], sizes = [8, 8, 128], strides = [1, 1, 1]} : vector<12x8x128xf32> to vector<8x8x128xf32>
    %77 = vector.extract_strided_slice %18 {offsets = [21, 0], sizes = [1, 128], strides = [1, 1]} : vector<25x128xf32> to vector<1x128xf32>
    %78 = vector.shape_cast %77 : vector<1x128xf32> to vector<1x1x128xf32>
    %79 = vector.broadcast %78 : vector<1x1x128xf32> to vector<8x8x128xf32>
    %80 = arith.mulf %76, %79 : vector<8x8x128xf32>
    %81 = arith.addf %75, %80 : vector<8x8x128xf32>
    %c0_29 = arith.constant 0 : index
    %c2_30 = arith.constant 2 : index
    %c0_31 = arith.constant 0 : index
    %82 = vector.load %arg9[%c0_29, %c2_30, %c0_31] : memref<12x12x128xf32, #tpu.memory_space<vmem>>, vector<12x8x128xf32>
    %83 = vector.extract_strided_slice %82 {offsets = [0, 0, 0], sizes = [8, 8, 128], strides = [1, 1, 1]} : vector<12x8x128xf32> to vector<8x8x128xf32>
    %84 = vector.extract_strided_slice %18 {offsets = [2, 0], sizes = [1, 128], strides = [1, 1]} : vector<25x128xf32> to vector<1x128xf32>
    %85 = vector.shape_cast %84 : vector<1x128xf32> to vector<1x1x128xf32>
    %86 = vector.broadcast %85 : vector<1x1x128xf32> to vector<8x8x128xf32>
    %87 = arith.mulf %83, %86 : vector<8x8x128xf32>
    %88 = arith.addf %81, %87 : vector<8x8x128xf32>
    %89 = vector.extract_strided_slice %82 {offsets = [1, 0, 0], sizes = [8, 8, 128], strides = [1, 1, 1]} : vector<12x8x128xf32> to vector<8x8x128xf32>
    %90 = vector.extract_strided_slice %18 {offsets = [7, 0], sizes = [1, 128], strides = [1, 1]} : vector<25x128xf32> to vector<1x128xf32>
    %91 = vector.shape_cast %90 : vector<1x128xf32> to vector<1x1x128xf32>
    %92 = vector.broadcast %91 : vector<1x1x128xf32> to vector<8x8x128xf32>
    %93 = arith.mulf %89, %92 : vector<8x8x128xf32>
    %94 = arith.addf %88, %93 : vector<8x8x128xf32>
    %95 = vector.extract_strided_slice %82 {offsets = [2, 0, 0], sizes = [8, 8, 128], strides = [1, 1, 1]} : vector<12x8x128xf32> to vector<8x8x128xf32>
    %96 = vector.extract_strided_slice %18 {offsets = [12, 0], sizes = [1, 128], strides = [1, 1]} : vector<25x128xf32> to vector<1x128xf32>
    %97 = vector.shape_cast %96 : vector<1x128xf32> to vector<1x1x128xf32>
    %98 = vector.broadcast %97 : vector<1x1x128xf32> to vector<8x8x128xf32>
    %99 = arith.mulf %95, %98 : vector<8x8x128xf32>
    %100 = arith.addf %94, %99 : vector<8x8x128xf32>
    %101 = vector.extract_strided_slice %82 {offsets = [3, 0, 0], sizes = [8, 8, 128], strides = [1, 1, 1]} : vector<12x8x128xf32> to vector<8x8x128xf32>
    %102 = vector.extract_strided_slice %18 {offsets = [17, 0], sizes = [1, 128], strides = [1, 1]} : vector<25x128xf32> to vector<1x128xf32>
    %103 = vector.shape_cast %102 : vector<1x128xf32> to vector<1x1x128xf32>
    %104 = vector.broadcast %103 : vector<1x1x128xf32> to vector<8x8x128xf32>
    %105 = arith.mulf %101, %104 : vector<8x8x128xf32>
    %106 = arith.addf %100, %105 : vector<8x8x128xf32>
    %107 = vector.extract_strided_slice %82 {offsets = [4, 0, 0], sizes = [8, 8, 128], strides = [1, 1, 1]} : vector<12x8x128xf32> to vector<8x8x128xf32>
    %108 = vector.extract_strided_slice %18 {offsets = [22, 0], sizes = [1, 128], strides = [1, 1]} : vector<25x128xf32> to vector<1x128xf32>
    %109 = vector.shape_cast %108 : vector<1x128xf32> to vector<1x1x128xf32>
    %110 = vector.broadcast %109 : vector<1x1x128xf32> to vector<8x8x128xf32>
    %111 = arith.mulf %107, %110 : vector<8x8x128xf32>
    %112 = arith.addf %106, %111 : vector<8x8x128xf32>
    %c0_32 = arith.constant 0 : index
    %c3 = arith.constant 3 : index
    %c0_33 = arith.constant 0 : index
    %113 = vector.load %arg9[%c0_32, %c3, %c0_33] : memref<12x12x128xf32, #tpu.memory_space<vmem>>, vector<12x8x128xf32>
    %114 = vector.extract_strided_slice %113 {offsets = [0, 0, 0], sizes = [8, 8, 128], strides = [1, 1, 1]} : vector<12x8x128xf32> to vector<8x8x128xf32>
    %115 = vector.extract_strided_slice %18 {offsets = [3, 0], sizes = [1, 128], strides = [1, 1]} : vector<25x128xf32> to vector<1x128xf32>
    %116 = vector.shape_cast %115 : vector<1x128xf32> to vector<1x1x128xf32>
    %117 = vector.broadcast %116 : vector<1x1x128xf32> to vector<8x8x128xf32>
    %118 = arith.mulf %114, %117 : vector<8x8x128xf32>
    %119 = arith.addf %112, %118 : vector<8x8x128xf32>
    %120 = vector.extract_strided_slice %113 {offsets = [1, 0, 0], sizes = [8, 8, 128], strides = [1, 1, 1]} : vector<12x8x128xf32> to vector<8x8x128xf32>
    %121 = vector.extract_strided_slice %18 {offsets = [8, 0], sizes = [1, 128], strides = [1, 1]} : vector<25x128xf32> to vector<1x128xf32>
    %122 = vector.shape_cast %121 : vector<1x128xf32> to vector<1x1x128xf32>
    %123 = vector.broadcast %122 : vector<1x1x128xf32> to vector<8x8x128xf32>
    %124 = arith.mulf %120, %123 : vector<8x8x128xf32>
    %125 = arith.addf %119, %124 : vector<8x8x128xf32>
    %126 = vector.extract_strided_slice %113 {offsets = [2, 0, 0], sizes = [8, 8, 128], strides = [1, 1, 1]} : vector<12x8x128xf32> to vector<8x8x128xf32>
    %127 = vector.extract_strided_slice %18 {offsets = [13, 0], sizes = [1, 128], strides = [1, 1]} : vector<25x128xf32> to vector<1x128xf32>
    %128 = vector.shape_cast %127 : vector<1x128xf32> to vector<1x1x128xf32>
    %129 = vector.broadcast %128 : vector<1x1x128xf32> to vector<8x8x128xf32>
    %130 = arith.mulf %126, %129 : vector<8x8x128xf32>
    %131 = arith.addf %125, %130 : vector<8x8x128xf32>
    %132 = vector.extract_strided_slice %113 {offsets = [3, 0, 0], sizes = [8, 8, 128], strides = [1, 1, 1]} : vector<12x8x128xf32> to vector<8x8x128xf32>
    %133 = vector.extract_strided_slice %18 {offsets = [18, 0], sizes = [1, 128], strides = [1, 1]} : vector<25x128xf32> to vector<1x128xf32>
    %134 = vector.shape_cast %133 : vector<1x128xf32> to vector<1x1x128xf32>
    %135 = vector.broadcast %134 : vector<1x1x128xf32> to vector<8x8x128xf32>
    %136 = arith.mulf %132, %135 : vector<8x8x128xf32>
    %137 = arith.addf %131, %136 : vector<8x8x128xf32>
    %138 = vector.extract_strided_slice %113 {offsets = [4, 0, 0], sizes = [8, 8, 128], strides = [1, 1, 1]} : vector<12x8x128xf32> to vector<8x8x128xf32>
    %139 = vector.extract_strided_slice %18 {offsets = [23, 0], sizes = [1, 128], strides = [1, 1]} : vector<25x128xf32> to vector<1x128xf32>
    %140 = vector.shape_cast %139 : vector<1x128xf32> to vector<1x1x128xf32>
    %141 = vector.broadcast %140 : vector<1x1x128xf32> to vector<8x8x128xf32>
    %142 = arith.mulf %138, %141 : vector<8x8x128xf32>
    %143 = arith.addf %137, %142 : vector<8x8x128xf32>
    %c0_34 = arith.constant 0 : index
    %c4 = arith.constant 4 : index
    %c0_35 = arith.constant 0 : index
    %144 = vector.load %arg9[%c0_34, %c4, %c0_35] : memref<12x12x128xf32, #tpu.memory_space<vmem>>, vector<12x8x128xf32>
    %145 = vector.extract_strided_slice %144 {offsets = [0, 0, 0], sizes = [8, 8, 128], strides = [1, 1, 1]} : vector<12x8x128xf32> to vector<8x8x128xf32>
    %146 = vector.extract_strided_slice %18 {offsets = [4, 0], sizes = [1, 128], strides = [1, 1]} : vector<25x128xf32> to vector<1x128xf32>
    %147 = vector.shape_cast %146 : vector<1x128xf32> to vector<1x1x128xf32>
    %148 = vector.broadcast %147 : vector<1x1x128xf32> to vector<8x8x128xf32>
    %149 = arith.mulf %145, %148 : vector<8x8x128xf32>
    %150 = arith.addf %143, %149 : vector<8x8x128xf32>
    %151 = vector.extract_strided_slice %144 {offsets = [1, 0, 0], sizes = [8, 8, 128], strides = [1, 1, 1]} : vector<12x8x128xf32> to vector<8x8x128xf32>
    %152 = vector.extract_strided_slice %18 {offsets = [9, 0], sizes = [1, 128], strides = [1, 1]} : vector<25x128xf32> to vector<1x128xf32>
    %153 = vector.shape_cast %152 : vector<1x128xf32> to vector<1x1x128xf32>
    %154 = vector.broadcast %153 : vector<1x1x128xf32> to vector<8x8x128xf32>
    %155 = arith.mulf %151, %154 : vector<8x8x128xf32>
    %156 = arith.addf %150, %155 : vector<8x8x128xf32>
    %157 = vector.extract_strided_slice %144 {offsets = [2, 0, 0], sizes = [8, 8, 128], strides = [1, 1, 1]} : vector<12x8x128xf32> to vector<8x8x128xf32>
    %158 = vector.extract_strided_slice %18 {offsets = [14, 0], sizes = [1, 128], strides = [1, 1]} : vector<25x128xf32> to vector<1x128xf32>
    %159 = vector.shape_cast %158 : vector<1x128xf32> to vector<1x1x128xf32>
    %160 = vector.broadcast %159 : vector<1x1x128xf32> to vector<8x8x128xf32>
    %161 = arith.mulf %157, %160 : vector<8x8x128xf32>
    %162 = arith.addf %156, %161 : vector<8x8x128xf32>
    %163 = vector.extract_strided_slice %144 {offsets = [3, 0, 0], sizes = [8, 8, 128], strides = [1, 1, 1]} : vector<12x8x128xf32> to vector<8x8x128xf32>
    %164 = vector.extract_strided_slice %18 {offsets = [19, 0], sizes = [1, 128], strides = [1, 1]} : vector<25x128xf32> to vector<1x128xf32>
    %165 = vector.shape_cast %164 : vector<1x128xf32> to vector<1x1x128xf32>
    %166 = vector.broadcast %165 : vector<1x1x128xf32> to vector<8x8x128xf32>
    %167 = arith.mulf %163, %166 : vector<8x8x128xf32>
    %168 = arith.addf %162, %167 : vector<8x8x128xf32>
    %169 = vector.extract_strided_slice %144 {offsets = [4, 0, 0], sizes = [8, 8, 128], strides = [1, 1, 1]} : vector<12x8x128xf32> to vector<8x8x128xf32>
    %170 = vector.extract_strided_slice %18 {offsets = [24, 0], sizes = [1, 128], strides = [1, 1]} : vector<25x128xf32> to vector<1x128xf32>
    %171 = vector.shape_cast %170 : vector<1x128xf32> to vector<1x1x128xf32>
    %172 = vector.broadcast %171 : vector<1x1x128xf32> to vector<8x8x128xf32>
    %173 = arith.mulf %169, %172 : vector<8x8x128xf32>
    %174 = arith.addf %168, %173 : vector<8x8x128xf32>
    %c0_36 = arith.constant 0 : index
    %c0_37 = arith.constant 0 : index
    %175 = vector.load %arg6[%c0_36, %c0_37] : memref<1x128xf32, #tpu.memory_space<vmem>>, vector<1x128xf32>
    %176 = vector.shape_cast %175 : vector<1x128xf32> to vector<1x1x128xf32>
    %177 = vector.broadcast %176 : vector<1x1x128xf32> to vector<8x8x128xf32>
    %178 = arith.addf %174, %177 : vector<8x8x128xf32>
    %cst_38 = arith.constant 5.000000e-01 : f32
    %179 = vector.broadcast %cst_38 : f32 to vector<8x8x128xf32>
    %180 = arith.mulf %179, %178 : vector<8x8x128xf32>
    %cst_39 = arith.constant 0.707106769 : f32
    %181 = vector.broadcast %cst_39 : f32 to vector<8x8x128xf32>
    %182 = arith.mulf %178, %181 : vector<8x8x128xf32>
    %cst_40 = arith.constant 0.000000e+00 : f32
    %183 = vector.broadcast %cst_40 : f32 to vector<8x8x128xf32>
    %184 = arith.cmpf oge, %182, %183 : vector<8x8x128xf32>
    %cst_41 = arith.constant 1.000000e+00 : f32
    %cst_42 = arith.constant -1.000000e+00 : f32
    %185 = vector.broadcast %cst_41 : f32 to vector<8x8x128xf32>
    %186 = vector.broadcast %cst_42 : f32 to vector<8x8x128xf32>
    %187 = arith.select %184, %185, %186 : vector<8x8x128xi1>, vector<8x8x128xf32>
    %188 = math.absf %182 : vector<8x8x128xf32>
    %cst_43 = arith.constant 0.327591091 : f32
    %189 = vector.broadcast %cst_43 : f32 to vector<8x8x128xf32>
    %190 = arith.mulf %189, %188 : vector<8x8x128xf32>
    %cst_44 = arith.constant 1.000000e+00 : f32
    %191 = vector.broadcast %cst_44 : f32 to vector<8x8x128xf32>
    %192 = arith.addf %191, %190 : vector<8x8x128xf32>
    %193 = tpu.reciprocal %192 {approx = true} : vector<8x8x128xf32> -> vector<8x8x128xf32>
    %194 = arith.mulf %192, %193 : vector<8x8x128xf32>
    %cst_45 = arith.constant 2.000000e+00 : f32
    %195 = vector.broadcast %cst_45 : f32 to vector<8x8x128xf32>
    %196 = arith.subf %195, %194 : vector<8x8x128xf32>
    %197 = arith.mulf %193, %196 : vector<8x8x128xf32>
    %cst_46 = arith.constant 1.06140542 : f32
    %198 = vector.broadcast %cst_46 : f32 to vector<8x8x128xf32>
    %199 = arith.mulf %198, %197 : vector<8x8x128xf32>
    %cst_47 = arith.constant -1.45315206 : f32
    %200 = vector.broadcast %cst_47 : f32 to vector<8x8x128xf32>
    %201 = arith.addf %199, %200 : vector<8x8x128xf32>
    %202 = arith.mulf %201, %197 : vector<8x8x128xf32>
    %cst_48 = arith.constant 1.42141378 : f32
    %203 = vector.broadcast %cst_48 : f32 to vector<8x8x128xf32>
    %204 = arith.addf %202, %203 : vector<8x8x128xf32>
    %205 = arith.mulf %204, %197 : vector<8x8x128xf32>
    %cst_49 = arith.constant -0.284496725 : f32
    %206 = vector.broadcast %cst_49 : f32 to vector<8x8x128xf32>
    %207 = arith.addf %205, %206 : vector<8x8x128xf32>
    %208 = arith.mulf %207, %197 : vector<8x8x128xf32>
    %cst_50 = arith.constant 0.254829586 : f32
    %209 = vector.broadcast %cst_50 : f32 to vector<8x8x128xf32>
    %210 = arith.addf %208, %209 : vector<8x8x128xf32>
    %211 = arith.mulf %210, %197 : vector<8x8x128xf32>
    %cst_51 = arith.constant 0.000000e+00 : f32
    %212 = vector.broadcast %cst_51 : f32 to vector<8x8x128xf32>
    %213 = arith.subf %212, %188 : vector<8x8x128xf32>
    %214 = arith.mulf %213, %188 : vector<8x8x128xf32>
    %215 = math.exp %214 : vector<8x8x128xf32>
    %216 = arith.mulf %211, %215 : vector<8x8x128xf32>
    %cst_52 = arith.constant 1.000000e+00 : f32
    %217 = vector.broadcast %cst_52 : f32 to vector<8x8x128xf32>
    %218 = arith.subf %217, %216 : vector<8x8x128xf32>
    %219 = arith.mulf %187, %218 : vector<8x8x128xf32>
    %cst_53 = arith.constant 1.000000e+00 : f32
    %220 = vector.broadcast %cst_53 : f32 to vector<8x8x128xf32>
    %221 = arith.addf %220, %219 : vector<8x8x128xf32>
    %222 = arith.mulf %180, %221 : vector<8x8x128xf32>
    %223 = arith.truncf %222 : vector<8x8x128xf32> to vector<8x8x128xbf16>
    %c0_54 = arith.constant 0 : index
    %c0_55 = arith.constant 0 : index
    %c0_56 = arith.constant 0 : index
    %c0_57 = arith.constant 0 : index
    %224 = vector.load %arg7[%c0_54, %c0_55, %c0_56, %c0_57] : memref<1x8x8x128xbf16, #tpu.memory_space<vmem>>, vector<1x8x8x128xbf16>
    %225 = vector.shape_cast %224 : vector<1x8x8x128xbf16> to vector<8x8x128xbf16>
    %226 = vector.shape_cast %223 : vector<8x8x128xbf16> to vector<1x8x8x128xbf16>
    tpu.vector_store %arg7[%c0_54, %c0_55, %c0_56, %c0_57], %226 {strides = array<i32>} : memref<1x8x8x128xbf16, #tpu.memory_space<vmem>>, vector<1x8x8x128xbf16>,
    %cst_58 = arith.constant dense<0.000000e+00> : vector<8x128xf32>
    %227 = vector.multi_reduction <add>, %222, %cst_58 [0] : vector<8x8x128xf32> to vector<8x128xf32>
    %cst_59 = arith.constant dense<0.000000e+00> : vector<128xf32>
    %228 = vector.multi_reduction <add>, %227, %cst_59 [0] : vector<8x128xf32> to vector<128xf32>
    %229 = vector.shape_cast %228 : vector<128xf32> to vector<1x128xf32>
    %230 = arith.mulf %222, %222 : vector<8x8x128xf32>
    %cst_60 = arith.constant dense<0.000000e+00> : vector<8x128xf32>
    %231 = vector.multi_reduction <add>, %230, %cst_60 [0] : vector<8x8x128xf32> to vector<8x128xf32>
    %cst_61 = arith.constant dense<0.000000e+00> : vector<128xf32>
    %232 = vector.multi_reduction <add>, %231, %cst_61 [0] : vector<8x128xf32> to vector<128xf32>
    %233 = vector.shape_cast %232 : vector<128xf32> to vector<1x128xf32>
    %234 = tpu.concatenate %229, %233 in 0 : vector<1x128xf32>, vector<1x128xf32> -> vector<2x128xf32>
    %c0_62 = arith.constant 0 : index
    %c0_63 = arith.constant 0 : index
    %c0_64 = arith.constant 0 : index
    %235 = vector.load %arg8[%c0_62, %c0_63, %c0_64] : memref<1x2x128xf32, #tpu.memory_space<vmem>>, vector<1x2x128xf32>
    %236 = vector.shape_cast %235 : vector<1x2x128xf32> to vector<2x128xf32>
    %237 = vector.shape_cast %234 : vector<2x128xf32> to vector<1x2x128xf32>
    tpu.vector_store %arg8[%c0_62, %c0_63, %c0_64], %237 {strides = array<i32>} : memref<1x2x128xf32, #tpu.memory_space<vmem>>, vector<1x2x128xf32>,
    return
  }
  func.func @transform_0(%arg0: i32, %arg1: i32) -> (i32, i32, i32, i32) {
    %c0_i32 = arith.constant 0 : i32
    %c0_i32_0 = arith.constant 0 : i32
    %c0_i32_1 = arith.constant 0 : i32
    return %arg0, %c0_i32, %c0_i32_0, %arg1 : i32, i32, i32, i32
  }
  func.func @transform_1(%arg0: i32, %arg1: i32) -> (i32, i32) {
    %c0_i32 = arith.constant 0 : i32
    %c0_i32_0 = arith.constant 0 : i32
    return %c0_i32, %arg1 : i32, i32
  }
  func.func @transform_2(%arg0: i32, %arg1: i32) -> (i32, i32) {
    %c0_i32 = arith.constant 0 : i32
    %c0_i32_0 = arith.constant 0 : i32
    return %c0_i32, %arg1 : i32, i32
  }
  func.func @transform_3(%arg0: i32, %arg1: i32) -> (i32, i32) {
    %c0_i32 = arith.constant 0 : i32
    %c0_i32_0 = arith.constant 0 : i32
    return %c0_i32, %arg1 : i32, i32
  }
  func.func @transform_4(%arg0: i32, %arg1: i32) -> (i32, i32) {
    %c0_i32 = arith.constant 0 : i32
    %c0_i32_0 = arith.constant 0 : i32
    return %c0_i32, %arg1 : i32, i32
  }
  func.func @transform_5(%arg0: i32, %arg1: i32) -> (i32, i32, i32, i32) {
    %c0_i32 = arith.constant 0 : i32
    %c0_i32_0 = arith.constant 0 : i32
    %c0_i32_1 = arith.constant 0 : i32
    return %arg0, %c0_i32, %c0_i32_0, %arg1 : i32, i32, i32, i32
  }
  func.func @transform_6(%arg0: i32, %arg1: i32) -> (i32, i32, i32) {
    %c0_i32 = arith.constant 0 : i32
    %c0_i32_0 = arith.constant 0 : i32
    return %arg0, %c0_i32, %arg1 : i32, i32, i32
  }
}

module attributes {stable_mosaic.version = 11 : i64} {
  func.func @_classifier_kernel(%arg0: i32, %arg1: memref<2x1x128xf32, #tpu.memory_space<vmem>>, %arg2: memref<128x128xbf16, #tpu.memory_space<vmem>>, %arg3: memref<1x128xf32, #tpu.memory_space<vmem>>, %arg4: memref<2x128xf32, #tpu.memory_space<vmem>>) attributes {dimension_semantics = [#tpu.dimension_semantics<arbitrary>], iteration_bounds = array<i64: 1>, scalar_prefetch = 0 : i64, scratch_operands = 0 : i64, tpu.core_type = #tpu.core_type<tc>, window_params = [{pipeline_mode = #tpu.pipeline_mode<synchronous>, transform_indices = @transform_0, window_bounds = array<i64: 2, 1, 128>}, {pipeline_mode = #tpu.pipeline_mode<synchronous>, transform_indices = @transform_1, window_bounds = array<i64: 128, 128>}, {pipeline_mode = #tpu.pipeline_mode<synchronous>, transform_indices = @transform_2, window_bounds = array<i64: 1, 128>}, {pipeline_mode = #tpu.pipeline_mode<synchronous>, transform_indices = @transform_3, window_bounds = array<i64: 2, 128>}]} {
    %c0 = arith.constant 0 : index
    %c0_0 = arith.constant 0 : index
    %c0_1 = arith.constant 0 : index
    %0 = vector.load %arg1[%c0, %c0_0, %c0_1] : memref<2x1x128xf32, #tpu.memory_space<vmem>>, vector<2x1x128xf32>
    %1 = vector.shape_cast %0 : vector<2x1x128xf32> to vector<2x128xf32>
    %2 = arith.truncf %1 : vector<2x128xf32> to vector<2x128xbf16>
    %c0_2 = arith.constant 0 : index
    %c0_3 = arith.constant 0 : index
    %3 = vector.load %arg2[%c0_2, %c0_3] : memref<128x128xbf16, #tpu.memory_space<vmem>>, vector<128x128xbf16>
    %cst = arith.constant dense<0.000000e+00> : vector<2x128xf32>
    %4 = tpu.matmul %2, %3, %cst {dimension_numbers = #tpu.dot_dimension_numbers<[1], [0], [0], [1], [0, 0, 1, 1], [], []>} : vector<2x128xbf16>, vector<128x128xbf16>, vector<2x128xf32> -> vector<2x128xf32>
    %c0_4 = arith.constant 0 : index
    %c0_5 = arith.constant 0 : index
    %5 = vector.load %arg3[%c0_4, %c0_5] : memref<1x128xf32, #tpu.memory_space<vmem>>, vector<1x128xf32>
    %6 = vector.broadcast %5 : vector<1x128xf32> to vector<2x128xf32>
    %7 = arith.addf %4, %6 : vector<2x128xf32>
    %c0_6 = arith.constant 0 : index
    %c0_7 = arith.constant 0 : index
    %8 = vector.load %arg4[%c0_6, %c0_7] : memref<2x128xf32, #tpu.memory_space<vmem>>, vector<2x128xf32>
    tpu.vector_store %arg4[%c0_6, %c0_7], %7 {strides = array<i32>} : memref<2x128xf32, #tpu.memory_space<vmem>>, vector<2x128xf32>,
    return
  }
  func.func @transform_0(%arg0: i32) -> (i32, i32, i32) {
    %c0_i32 = arith.constant 0 : i32
    %c0_i32_0 = arith.constant 0 : i32
    %c0_i32_1 = arith.constant 0 : i32
    %c0_i32_2 = arith.constant 0 : i32
    return %c0_i32, %c0_i32_0, %c0_i32_1 : i32, i32, i32
  }
  func.func @transform_1(%arg0: i32) -> (i32, i32) {
    %c0_i32 = arith.constant 0 : i32
    %c0_i32_0 = arith.constant 0 : i32
    %c0_i32_1 = arith.constant 0 : i32
    return %c0_i32, %c0_i32_0 : i32, i32
  }
  func.func @transform_2(%arg0: i32) -> (i32, i32) {
    %c0_i32 = arith.constant 0 : i32
    %c0_i32_0 = arith.constant 0 : i32
    %c0_i32_1 = arith.constant 0 : i32
    return %c0_i32, %c0_i32_0 : i32, i32
  }
  func.func @transform_3(%arg0: i32) -> (i32, i32) {
    %c0_i32 = arith.constant 0 : i32
    %c0_i32_0 = arith.constant 0 : i32
    %c0_i32_1 = arith.constant 0 : i32
    return %c0_i32, %c0_i32_0 : i32, i32
  }
}

</mosaic_0001>

<bundles_post_ra>
// kernel: conv_mixer_forward.12
= control target key start
LH: loop header
LB: loop body
LE: loop exit
PB: predicated region body
PF: predicated region fallthrough
CT: control target
= control target key end

     0   :  { %s424_s12 = smov 0   ;;  %s426_s13 = smov 0   ;;  %s470_s0 = inlined_call_operand.vmem [shape: bf16[2,8,8,128], index: 0, kind: input, shape index: {}]   ;;  %s471_s1 = inlined_call_operand.vmem [shape: f32[1,128], index: 1, kind: input, shape index: {}]   ;;  %s472_s2 = inlined_call_operand.vmem [shape: f32[1,128], index: 2, kind: input, shape index: {}]   ;;  %s473_s3 = inlined_call_operand.vmem [shape: f32[2,1,128], index: 3, kind: output, shape index: {}]  }
   0x1   :  { %s428_s14 = smov 0  }
   0x2 LB: > { %s25_s15 = sadd.s32 1, %s397_s13  ;;  %p327_p0 = scmp.ge.s32.totalorder %s401_s14, 1  ;;  %s401_s14 = sphi %s428_s14, %s13_s14   ;;  %s397_s13 = sphi %s426_s13, %s475_s13   ;;  %s393_s12 = sphi %s424_s12, %s474_s12  }
   0x3   : > { %p27_p1 = scmp.ge.s32.totalorder %s25_s15, 2  ;;  %p156_p2 = scmp.lt.s32.totalorder %s401_s14, 3 }
   0x5   : > { %s477_s15 = smov (%p27_p1, %s25_s15), 0  ;;  %p157_p3 = pnand %p327_p0, %p156_p2 }
   0x6   : > { %p183_p4 = scmp.lt.s32.totalorder (!%p157_p3), %s393_s12, 1 }
   0x7   : > { %160 = sbr.rel (%p157_p3) target bundleno = 61 (0x3d), region = 32 }
   0xc   : > { %s479_s12 = smov (!%p183_p4, %s393_s12), 1  ;;  %v403_v0 = vmov 0.0   ;;  %v377_v1 = vld [vmem:[%s471_s1] ss:$0 sm:$0xff] }
   0xd   : > { %s332_s16 = sshll.u32 %s479_s12, 5  ;;  %s445_s19 = scalar_lea.vmem %s473_s3, %s479_s12  ;;  %v378_v10 = vld [vmem:[%s472_s2] ss:$0 sm:$0xff] }
   0xe   : > { %s190_s22 = scalar_lea.vmem %s470_s0, %s332_s16  ;;  %199 = vst [vmem:[%s445_s19] sm:$0x1] %v403_v0 }
   0xf   : > { %v334_v2 = vld [vmem:[%s190_s22] sm:$0xff]   ;;  %v349_v3 = vld [vmem:[%s190_s22 + $0x8] sm:$0xff]   ;;  %v350_v4 = vld [vmem:[%s190_s22 + $0x10] sm:$0xff]  }
  0x10   : > { %v335_v5 = vunpack.c.l.bf16 %v334_v2  ;;  %v336_v6 = vunpack.c.h.bf16 %v334_v2  ;;  %v339_v7 = vunpack.c.l.bf16 %v349_v3  ;;  %v340_v8 = vunpack.c.h.bf16 %v349_v3  ;;  %v351_v9 = vld [vmem:[%s190_s22 + $0x18] sm:$0xff]  }
  0x11   : > { %v343_v11 = vunpack.c.l.bf16 %v350_v4  ;;  %v344_v12 = vunpack.c.h.bf16 %v350_v4  ;;  %v347_v17 = vunpack.c.l.bf16 %v351_v9  ;;  %v348_v22 = vunpack.c.h.bf16 %v351_v9 }
  0x12   : > { %v220_v13 = vmul.f32 %v377_v1, %v335_v5  ;;  %v221_v14 = vmul.f32 %v377_v1, %v336_v6  ;;  %v222_v15 = vmul.f32 %v377_v1, %v339_v7  ;;  %v223_v16 = vmul.f32 %v377_v1, %v340_v8 }
  0x13   : > { %v224_v18 = vmul.f32 %v377_v1, %v343_v11  ;;  %v225_v23 = vmul.f32 %v377_v1, %v344_v12  ;;  %v226_v26 = vmul.f32 %v377_v1, %v347_v17  ;;  %v227_v29 = vmul.f32 %v377_v1, %v348_v22 }
  0x14   : > { %v232_v19 = vadd.f32 %v378_v10, %v220_v13  ;;  %v233_v20 = vadd.f32 %v378_v10, %v221_v14  ;;  %v234_v21 = vadd.f32 %v378_v10, %v222_v15  ;;  %v235_v24 = vadd.f32 %v378_v10, %v223_v16 }
  0x15   : > { %v236_v27 = vadd.f32 %v378_v10, %v224_v18  ;;  %v237_v30 = vadd.f32 %v378_v10, %v225_v23  ;;  %v238_v32 = vadd.f32 %v378_v10, %v226_v26  ;;  %v239_v34 = vadd.f32 %v378_v10, %v227_v29  ;;  %v240_v43 = vld [vmem:[%s445_s19] sm:$0x1] }
  0x16   : > { %v241_v25 = vadd.f32 %v233_v20, %v232_v19 }
  0x18   : > { %v242_v28 = vadd.f32 %v241_v25, %v234_v21 }
  0x1a   : > { %v243_v31 = vadd.f32 %v242_v28, %v235_v24 }
  0x1c   : > { %v244_v33 = vadd.f32 %v243_v31, %v236_v27 }
  0x1e   : > { %v245_v35 = vadd.f32 %v244_v33, %v237_v30 }
  0x20   : > { %v246_v36 = vadd.f32 %v245_v35, %v238_v32 }
  0x22   : > { %v247_v37 = vadd.f32 %v246_v36, %v239_v34 }
  0x24   : > { %v248_v38 = vrot.slane %v247_v37, 4 }
  0x26   : > { %v249_v39 = vadd.f32 %v248_v38, %v247_v37 }
  0x28   : > { %v250_v40 = vrot.slane %v249_v39, 2 }
  0x2a   : > { %v251_v41 = vadd.f32 %v250_v40, %v249_v39 }
  0x2c   : > { %v252_v42 = vrot.slane %v251_v41, 1 }
  0x2e   : > { %v253_v44 = vadd.f32 %v252_v42, %v251_v41 }
  0x30   : > { %v254_v45 = vadd.f32 %v253_v44, %v240_v43 }
  0x32   : > { %255 = vst [vmem:[%s445_s19] sm:$0x1] %v254_v45 }
  0x39   : > { %v259_v46 = vld [vmem:[%s445_s19] sm:$0x1] }
  0x3a   : > { %v260_v47 = vmul.f32 0.015625, %v259_v46 }
  0x3c   : > { %261 = vst [vmem:[%s445_s19] sm:$0x1] %v260_v47 }
  0x3d PF: > { %s13_s14 = sadd.s32 1, %s401_s14   ;;  %s474_s12 = smov %s397_s13 }
  0x3e   : > { %p10_p5 = scmp.ge.s32.totalorder %s13_s14, 4   ;;  %s475_s13 = smov %s477_s15 }
  0x40   :  { %12 = sbr.rel (!%p10_p5) target bundleno = 2 (0x2), region = 70 }

// kernel: conv_mixer_forward.7
= control target key start
LH: loop header
LB: loop body
LE: loop exit
PB: predicated region body
PF: predicated region fallthrough
CT: control target
= control target key end

     0   :  { %s1018_s15 = smov 0   ;;  %s1020_s16 = smov 0   ;;  %s1284_s0 = inlined_call_operand.vmem [shape: bf16[2,8,8,128], index: 0, kind: input, shape index: {}]   ;;  %s1285_s1 = inlined_call_operand.vmem [shape: bf16[128,128], index: 1, kind: input, shape index: {}]   ;;  %s1286_s2 = inlined_call_operand.vmem [shape: f32[1,128], index: 2, kind: input, shape index: {}]   ;;  %s1287_s3 = inlined_call_operand.vmem [shape: bf16[2,8,8,128], index: 3, kind: output, shape index: {0}]   ;;  %s1288_s4 = inlined_call_operand.vmem [shape: f32[2,2,128], index: 4, kind: output, shape index: {1}]  }
   0x1   :  { %s1022_s17 = smov 0  }
   0x2 LB: > { %s27_s18 = sadd.s32 1, %s985_s16  ;;  %p791_p0 = scmp.ge.s32.totalorder %s989_s17, 1  ;;  %s989_s17 = sphi %s1022_s17, %s15_s17   ;;  %s985_s16 = sphi %s1020_s16, %s1290_s16   ;;  %s981_s15 = sphi %s1018_s15, %s1289_s15  }
   0x3   : > { %p29_p1 = scmp.ge.s32.totalorder %s27_s18, 2  ;;  %p186_p2 = scmp.lt.s32.totalorder %s989_s17, 3 }
   0x5   : > { %s1292_s18 = smov (%p29_p1, %s27_s18), 0  ;;  %p187_p3 = pnand %p791_p0, %p186_p2 }
   0x6   : > { %p225_p4 = scmp.lt.s32.totalorder (!%p187_p3), %s981_s15, 1 }
   0x7   : > { %190 = sbr.rel (%p187_p3) target bundleno = 274 (0x112), region = 32 }
   0xc   : > { %v860_v0 = vld [vmem:[%s1285_s1 + $0x38] sm:$0xff]  ;;  %v859_v1 = vld [vmem:[%s1285_s1 + $0x30] sm:$0xff]  ;;  %v858_v2 = vld [vmem:[%s1285_s1 + $0x28] sm:$0xff]  ;;  %s1294_s15 = smov (!%p225_p4, %s981_s15), 1  ;;  %vm665_vm8 = vcmask 1040384  }
   0xd   : > { %348 = vmatpush.bf16.msra.mxu0 %v860_v0  ;;  %884 = vmatpush.bf16.msra.mxu1 %v860_v0  ;;  %v857_v3 = vld [vmem:[%s1285_s1 + $0x20] sm:$0xff]  ;;  %v856_v4 = vld [vmem:[%s1285_s1 + $0x18] sm:$0xff]  ;;  %v855_v5 = vld [vmem:[%s1285_s1 + $0x10] sm:$0xff]  ;;  %s847_s7 = sshll.u32 %s1294_s15, 5  ;;  %s796_s19 = sshll.u32 %s1294_s15, 1 }
   0xe   : > { %885 = vmatpush.bf16.msra.mxu2 %v860_v0  ;;  %886 = vmatpush.bf16.msra.mxu3 %v860_v0  ;;  %v854_v6 = vld [vmem:[%s1285_s1 + $0x8] sm:$0xff]  ;;  %v853_v7 = vld [vmem:[%s1285_s1] sm:$0xff]  ;;  %s232_s12 = scalar_lea.vmem %s1284_s0, %s847_s7  ;;  %s1225_s22 = scalar_lea.vmem %s1288_s4, %s796_s19 }
   0xf   : > { %v849_v8 = vld [vmem:[%s232_s12] sm:$0xff]  ;;  %v850_v9 = vld [vmem:[%s232_s12 + $0x8] sm:$0xff]  ;;  %v851_v10 = vld [vmem:[%s232_s12 + $0x10] sm:$0xff]  ;;  %s1248_s25 = scalar_lea.vmem %s1287_s3, %s847_s7 }
  0x10   : > { %v852_v11 = vld [vmem:[%s232_s12 + $0x18] sm:$0xff]  ;;  %v1075_v12 = vld [vmem:[%s1286_s2] ss:$0 sm:$0xff] }
  0x11   : > { %349 = vmatpush.bf16.msra.mxu0 %v859_v1  ;;  %887 = vmatpush.bf16.msra.mxu1 %v859_v1 }
  0x12   : > { %888 = vmatpush.bf16.msra.mxu2 %v859_v1  ;;  %889 = vmatpush.bf16.msra.mxu3 %v859_v1 }
  0x15   : > { %350 = vmatpush.bf16.msra.mxu0 %v858_v2  ;;  %890 = vmatpush.bf16.msra.mxu1 %v858_v2 }
  0x16   : > { %891 = vmatpush.bf16.msra.mxu2 %v858_v2  ;;  %892 = vmatpush.bf16.msra.mxu3 %v858_v2 }
  0x19   : > { %351 = vmatpush.bf16.msra.mxu0 %v857_v3  ;;  %893 = vmatpush.bf16.msra.mxu1 %v857_v3 }
  0x1a   : > { %894 = vmatpush.bf16.msra.mxu2 %v857_v3  ;;  %895 = vmatpush.bf16.msra.mxu3 %v857_v3 }
  0x1d   : > { %352 = vmatpush.bf16.msra.mxu0 %v856_v4  ;;  %896 = vmatpush.bf16.msra.mxu1 %v856_v4 }
  0x1e   : > { %897 = vmatpush.bf16.msra.mxu2 %v856_v4  ;;  %898 = vmatpush.bf16.msra.mxu3 %v856_v4 }
  0x21   : > { %353 = vmatpush.bf16.msra.mxu0 %v855_v5  ;;  %899 = vmatpush.bf16.msra.mxu1 %v855_v5 }
  0x22   : > { %900 = vmatpush.bf16.msra.mxu2 %v855_v5  ;;  %901 = vmatpush.bf16.msra.mxu3 %v855_v5 }
  0x25   : > { %354 = vmatpush.bf16.msra.mxu0 %v854_v6  ;;  %902 = vmatpush.bf16.msra.mxu1 %v854_v6 }
  0x26   : > { %903 = vmatpush.bf16.msra.mxu2 %v854_v6  ;;  %904 = vmatpush.bf16.msra.mxu3 %v854_v6 }
  0x29   : > { %355 = vmatpush.bf16.msra.mxu0 %v853_v7  ;;  %905 = vmatpush.bf16.msra.mxu1 %v853_v7 }
  0x2a   : > { %906 = vmatpush.bf16.msra.mxu2 %v853_v7  ;;  %907 = vmatpush.bf16.msra.mxu3 %v853_v7 }
  0x2c   : > { %356 = vmatmul.bf16.vlgmr.msra.gmra.mxu0 %v849_v8  ;;  %361 = vmatmul.bf16.vlgmr.msra.gmra.mxu1 %v850_v9 }
  0x2d   : > { %366 = vmatmul.bf16.vlgmr.msra.gmra.mxu2 %v851_v10  ;;  %371 = vmatmul.bf16.vlgmr.msra.gmra.mxu3 %v852_v11 }
  0xa9   : > { %v357_v13 = vpop.f32.mrf.mxu0  ;;  %v362_v14 = vpop.f32.mrf.mxu1 }
  0xaa   : > { %v358_v15 = vadd.f32 %v1075_v12, %v357_v13  ;;  %v363_v16 = vadd.f32 %v1075_v12, %v362_v14 }
  0xac   : > { %v1079_v17 = vmul.f32 0.70710677, %v358_v15  ;;  %v1081_v18 = vmul.f32 0.70710677, %v363_v16  ;;  %v1137_v5 = vmul.f32 0.5, %v358_v15  ;;  %v1139_v7 = vmul.f32 0.5, %v363_v16 }
  0xae   : > { %v409_v19 = vand.u32 2147483647, %v1079_v17  ;;  %v411_v20 = vand.u32 2147483647, %v1081_v18  ;;  %vm393_vm0 = vcmp.ge.f32.partialorder %v1079_v17, 0.0  ;;  %vm395_vm1 = vcmp.ge.f32.partialorder %v1081_v18, 0.0 }
  0xb0   : > { %v417_v21 = vmul.f32 0.3275911, %v409_v19  ;;  %v419_v22 = vmul.f32 0.3275911, %v411_v20  ;;  %v367_v23 = vpop.f32.mrf.mxu2  ;;  %v372_v24 = vpop.f32.mrf.mxu3  ;;  %v537_v39 = vsub.f32 0.0, %v409_v19  ;;  %v539_v54 = vsub.f32 0.0, %v411_v20 }
  0xb1   : > { %v1086_v25 = vadd.f32 %v1075_v12, %v367_v23  ;;  %v1089_v26 = vadd.f32 %v1075_v12, %v372_v24  ;;  %v359_v27 = vpop.f32.mrf.mxu0  ;;  %v364_v36 = vpop.f32.mrf.mxu1 }
  0xb2   : > { %v425_v28 = vadd.f32 1.0, %v417_v21  ;;  %v427_v29 = vadd.f32 1.0, %v419_v22  ;;  %v1098_v32 = vadd.f32 %v1075_v12, %v359_v27  ;;  %v1115_v44 = vadd.f32 %v1075_v12, %v364_v36 }
  0xb3   : > { %v1092_v30 = vmul.f32 0.70710677, %v1086_v25  ;;  %v1095_v31 = vmul.f32 0.70710677, %v1089_v26  ;;  %v545_v51 = vmul.f32 %v537_v39, %v409_v19  ;;  %v547_v2 = vmul.f32 %v539_v54, %v411_v20 }
  0xb4   : > { %935 = vrcp.f32 %v425_v28  ;;  %v1109_v38 = vmul.f32 0.70710677, %v1098_v32  ;;  %v1122_v56 = vmul.f32 0.70710677, %v1115_v44 }
  0xb5   : > { %937 = vrcp.f32 %v427_v29  ;;  %v1101_v33 = vand.u32 2147483647, %v1092_v30  ;;  %v1104_v34 = vand.u32 2147483647, %v1095_v31  ;;  %v553_v62 = vmul.f32 1.442695, %v545_v51 }
  0xb6   : > { %v1112_v43 = vand.u32 2147483647, %v1109_v38  ;;  %v1129_v59 = vand.u32 2147483647, %v1122_v56  ;;  %v557_v22 = vmul.f32 1.442695, %v547_v2 }
  0xb7   : > { %v421_v35 = vmul.f32 0.3275911, %v1101_v33  ;;  %v423_v37 = vmul.f32 0.3275911, %v1104_v34  ;;  %vm397_vm2 = vcmp.ge.f32.partialorder %v1092_v30, 0.0  ;;  %vm394_vm3 = vcmp.ge.f32.partialorder %v1109_v38, 0.0 }
  0xb8   : > { %v369_v45 = vpop.f32.mrf.mxu2  ;;  %v418_v49 = vmul.f32 0.3275911, %v1112_v43  ;;  %v420_v4 = vmul.f32 0.3275911, %v1129_v59  ;;  %v374_v20 = vpop.f32.mrf.mxu3  ;;  %v538_v36 = vsub.f32 0.0, %v1112_v43  ;;  %vm396_vm4 = vcmp.ge.f32.partialorder %v1122_v56, 0.0 }
  0xb9   : > { %v429_v40 = vadd.f32 1.0, %v421_v35  ;;  %v431_v42 = vadd.f32 1.0, %v423_v37  ;;  %v1119_v52 = vadd.f32 %v1075_v12, %v369_v45  ;;  %v1155_v37 = vadd.f32 %v1075_v12, %v374_v20 }
  0xba   : > { %v936_v41 = vpop.eup %935  ;;  %v426_v55 = vadd.f32 1.0, %v418_v49  ;;  %v428_v11 = vadd.f32 1.0, %v420_v4  ;;  %vm399_vm6 = vcmp.ge.f32.partialorder %v1095_v31, 0.0 }
  0xbb   : > { %v938_v46 = vpop.eup %937  ;;  %v441_v47 = vmul.f32 %v936_v41, %v425_v28  ;;  %939 = vrcp.f32 %v429_v40  ;;  %v1133_v63 = vmul.f32 0.70710677, %v1119_v52 }
  0xbc   : > { %v443_v48 = vmul.f32 %v938_v46, %v427_v29  ;;  %941 = vrcp.f32 %v431_v42 }
  0xbd   : > { %v449_v50 = vsub.f32 2.0, %v441_v47  ;;  %943 = vrcp.f32 %v426_v55  ;;  %v1144_v19 = vand.u32 2147483647, %v1133_v63  ;;  %v541_v47 = vsub.f32 0.0, %v1101_v33 }
  0xbe   : > { %v451_v53 = vsub.f32 2.0, %v443_v48  ;;  %945 = vpow2.f32 %v553_v62  ;;  %v543_v48 = vsub.f32 0.0, %v1104_v34  ;;  %vm398_vm5 = vcmp.ge.f32.partialorder %v1133_v63, 0.0 }
  0xbf   : > { %v1124_v57 = vmul.f32 %v936_v41, %v449_v50  ;;  %947 = vrcp.f32 %v428_v11  ;;  %v422_v28 = vmul.f32 0.3275911, %v1144_v19 }
  0xc0   : > { %v1126_v58 = vmul.f32 %v938_v46, %v451_v53 }
  0xc1   : > { %v940_v60 = vpop.eup %939  ;;  %v465_v61 = vmul.f32 1.0614054, %v1124_v57 }
  0xc2   : > { %v942_v0 = vpop.eup %941  ;;  %v467_v1 = vmul.f32 1.0614054, %v1126_v58  ;;  %v445_v3 = vmul.f32 %v940_v60, %v429_v40 }
  0xc3   : > { %v473_v6 = vadd.f32 -1.4531521, %v465_v61  ;;  %v447_v8 = vmul.f32 %v942_v0, %v431_v42  ;;  %v944_v21 = vpop.eup %943  ;;  %v430_v42 = vadd.f32 1.0, %v422_v28  ;;  %v1167_v61 = vmul.f32 0.70710677, %v1155_v37 }
  0xc4   : > { %v475_v9 = vadd.f32 -1.4531521, %v467_v1  ;;  %v453_v10 = vsub.f32 2.0, %v445_v3  ;;  %v442_v27 = vmul.f32 %v944_v21, %v426_v55  ;;  %v946_v49 = vpop.eup %945  ;;  %v991_v3 = vmov -1.0  }
  0xc5   : > { %v481_v13 = vmul.f32 %v473_v6, %v1124_v57  ;;  %v455_v14 = vsub.f32 2.0, %v447_v8  ;;  %949 = vrcp.f32 %v430_v42  ;;  %v948_v12 = vpop.eup %947  ;;  %v401_v4 = vsel %vm393_vm0, 1.0, %v991_v3 }
  0xc6   : > { %v483_v15 = vmul.f32 %v475_v9, %v1126_v58  ;;  %v1147_v16 = vmul.f32 %v940_v60, %v453_v10  ;;  %v450_v41 = vsub.f32 2.0, %v442_v27  ;;  %v546_v60 = vmul.f32 %v538_v36, %v1112_v43 }
  0xc7   : > { %v489_v23 = vadd.f32 1.4214138, %v481_v13  ;;  %v1149_v24 = vmul.f32 %v942_v0, %v455_v14  ;;  %v444_v2 = vmul.f32 %v948_v12, %v428_v11  ;;  %951 = vpow2.f32 %v557_v22 }
  0xc8   : > { %v491_v29 = vadd.f32 1.4214138, %v483_v15  ;;  %v469_v35 = vmul.f32 1.0614054, %v1147_v16  ;;  %v1162_v53 = vmul.f32 %v944_v21, %v450_v41  ;;  %v549_v9 = vmul.f32 %v541_v47, %v1101_v33 }
  0xc9   : > { %v497_v39 = vmul.f32 %v489_v23, %v1124_v57  ;;  %v471_v40 = vmul.f32 1.0614054, %v1149_v24  ;;  %v452_v11 = vsub.f32 2.0, %v444_v2  ;;  %v1180_v21 = vand.u32 2147483647, %v1167_v61 }
  0xca   : > { %v499_v45 = vmul.f32 %v491_v29, %v1126_v58  ;;  %v477_v46 = vadd.f32 -1.4531521, %v469_v35  ;;  %v466_v1 = vmul.f32 1.0614054, %v1162_v53  ;;  %v551_v22 = vmul.f32 %v543_v48, %v1104_v34 }
  0xcb   : > { %v505_v50 = vadd.f32 -0.28449672, %v497_v39  ;;  %v479_v51 = vadd.f32 -1.4531521, %v471_v40  ;;  %v950_v17 = vpop.eup %949  ;;  %v555_v27 = vmul.f32 1.442695, %v546_v60  ;;  %v1187_v29 = vmul.f32 %v948_v12, %v452_v11 }
  0xcc   : > { %v507_v54 = vadd.f32 -0.28449672, %v499_v45  ;;  %v485_v55 = vmul.f32 %v477_v46, %v1147_v16  ;;  %v474_v13 = vadd.f32 -1.4531521, %v466_v1  ;;  %v446_v35 = vmul.f32 %v950_v17, %v430_v42 }
  0xcd   : > { %v513_v62 = vmul.f32 %v505_v50, %v1124_v57  ;;  %v487_v0 = vmul.f32 %v479_v51, %v1149_v24  ;;  %v540_v40 = vsub.f32 0.0, %v1129_v59  ;;  %v952_v41 = vpop.eup %951  ;;  %v468_v46 = vmul.f32 1.0614054, %v1187_v29 }
  0xce   : > { %v515_v6 = vmul.f32 %v507_v54, %v1126_v58  ;;  %v493_v8 = vadd.f32 1.4214138, %v485_v55  ;;  %v482_v23 = vmul.f32 %v474_v13, %v1162_v53  ;;  %v454_v47 = vsub.f32 2.0, %v446_v35 }
  0xcf   : > { %v521_v43 = vadd.f32 0.2548296, %v513_v62  ;;  %v495_v10 = vadd.f32 1.4214138, %v487_v0  ;;  %v561_v48 = vmul.f32 1.442695, %v549_v9  ;;  %953 = vpow2.f32 %v555_v27 }
  0xd0   : > { %v523_v14 = vadd.f32 0.2548296, %v515_v6  ;;  %v501_v20 = vmul.f32 %v493_v8, %v1147_v16  ;;  %v490_v39 = vadd.f32 1.4214138, %v482_v23  ;;  %v542_v51 = vsub.f32 0.0, %v1144_v19 }
  0xd1   : > { %v529_v15 = vmul.f32 %v521_v43, %v1124_v57  ;;  %v503_v28 = vmul.f32 %v495_v10, %v1149_v24  ;;  %v424_v57 = vmul.f32 0.3275911, %v1180_v21  ;;  %v1196_v54 = vmul.f32 %v950_v17, %v454_v47 }
  0xd2   : > { %v509_v33 = vadd.f32 -0.28449672, %v501_v20  ;;  %v531_v36 = vmul.f32 %v523_v14, %v1126_v58  ;;  %v498_v50 = vmul.f32 %v490_v39, %v1162_v53  ;;  %v476_v58 = vadd.f32 -1.4531521, %v468_v46 }
  0xd3   : > { %v569_v34 = vmul.f32 %v946_v49, %v529_v15  ;;  %v432_v42 = vadd.f32 1.0, %v424_v57  ;;  %v511_v12 = vadd.f32 -0.28449672, %v503_v28  ;;  %v548_v49 = vmul.f32 %v540_v40, %v1129_v59 }
  0xd4   : > { %v517_v45 = vmul.f32 %v509_v33, %v1147_v16  ;;  %v571_v55 = vmul.f32 %v952_v41, %v531_v36  ;;  %v506_v60 = vadd.f32 -0.28449672, %v498_v50  ;;  %v484_v1 = vmul.f32 %v476_v58, %v1187_v29 }
  0xd5   : > { %955 = vrcp.f32 %v432_v42  ;;  %v577_v62 = vsub.f32 1.0, %v569_v34  ;;  %v470_v2 = vmul.f32 1.0614054, %v1196_v54  ;;  %v550_v8 = vmul.f32 %v542_v51, %v1144_v19  ;;  %v954_v17 = vpop.eup %953 }
  0xd6   : > { %v525_v0 = vadd.f32 0.2548296, %v517_v45  ;;  %957 = vpow2.f32 %v561_v48  ;;  %v514_v6 = vmul.f32 %v506_v60, %v1162_v53  ;;  %v519_v43 = vmul.f32 %v511_v12, %v1149_v24 }
  0xd7   : > { %v565_v9 = vmul.f32 1.442695, %v551_v22  ;;  %v492_v10 = vadd.f32 1.4214138, %v484_v1  ;;  %v478_v59 = vadd.f32 -1.4531521, %v470_v2  ;;  %v585_v15 = vmul.f32 %v577_v62, %v401_v4 }
  0xd8   : > { %v403_v13 = vsel %vm395_vm1, 1.0, %v991_v3  ;;  %v579_v14 = vsub.f32 1.0, %v571_v55  ;;  %v522_v20 = vadd.f32 0.2548296, %v514_v6  ;;  %v559_v11 = vmul.f32 1.442695, %v548_v49 }
  0xd9   : > { %v533_v23 = vmul.f32 %v525_v0, %v1147_v16  ;;  %v500_v27 = vmul.f32 %v492_v10, %v1187_v29  ;;  %v486_v19 = vmul.f32 %v478_v59, %v1196_v54  ;;  %v405_v22 = vsel %vm397_vm2, 1.0, %v991_v3 }
  0xda   : > { %v402_v18 = vsel %vm394_vm3, 1.0, %v991_v3  ;;  %v530_v28 = vmul.f32 %v522_v20, %v1162_v53  ;;  %v563_v35 = vmul.f32 1.442695, %v550_v8  ;;  %v527_v4 = vadd.f32 0.2548296, %v519_v43 }
  0xdb   : > { %v956_v33 = vpop.eup %955  ;;  %959 = vpow2.f32 %v565_v9  ;;  %v508_v16 = vadd.f32 -0.28449672, %v500_v27  ;;  %v494_v36 = vadd.f32 1.4214138, %v486_v19  ;;  %v587_v40 = vmul.f32 %v579_v14, %v403_v13 }
  0xdc   : > { %v958_v39 = vpop.eup %957  ;;  %v570_v57 = vmul.f32 %v954_v17, %v530_v28  ;;  %961 = vpow2.f32 %v559_v11  ;;  %v448_v41 = vmul.f32 %v956_v33, %v432_v42  ;;  %v593_v34 = vadd.f32 1.0, %v585_v15 }
  0xdd   : > { %v573_v45 = vmul.f32 %v958_v39, %v533_v23  ;;  %v516_v30 = vmul.f32 %v508_v16, %v1187_v29  ;;  %v502_v46 = vmul.f32 %v494_v36, %v1196_v54  ;;  %963 = vpow2.f32 %v563_v35 }
  0xde   : > { %v578_v38 = vsub.f32 1.0, %v570_v57  ;;  %v456_v53 = vsub.f32 2.0, %v448_v41  ;;  %v535_v47 = vmul.f32 %v527_v4, %v1149_v24  ;;  %v544_v51 = vsub.f32 0.0, %v1180_v21 }
  0xdf   : > { %v524_v48 = vadd.f32 0.2548296, %v516_v30  ;;  %v510_v50 = vadd.f32 -0.28449672, %v502_v46  ;;  %v595_v42 = vadd.f32 1.0, %v587_v40  ;;  %v601_v60 = vmul.f32 %v593_v34, %v1137_v5 }
  0xe0   : > { %v586_v12 = vmul.f32 %v578_v38, %v402_v18  ;;  %v1229_v58 = vmul.f32 %v956_v33, %v456_v53  ;;  %v581_v49 = vsub.f32 1.0, %v573_v45  ;;  %v992_v1 = vmov 0.0  }
  0xe1   : > { %v960_v55 = vpop.eup %959  ;;  %v532_v62 = vmul.f32 %v524_v48, %v1187_v29  ;;  %v518_v0 = vmul.f32 %v510_v50, %v1196_v54  ;;  %629 = vst [vmem:[%s1225_s22] sm:$0x3] %v992_v1  ;;  %v378_v24 = vmul.f32 0.5, %v1098_v32  ;;  %v404_v8 = vsel %vm396_vm4, 1.0, %v991_v3 }
  0xe2   : > { %v962_v2 = vpop.eup %961  ;;  %v594_v6 = vadd.f32 1.0, %v586_v12  ;;  %v472_v43 = vmul.f32 1.0614054, %v1229_v58  ;;  %v575_v9 = vmul.f32 %v960_v55, %v535_v47  ;;  %v603_v59 = vmul.f32 %v595_v42, %v1139_v7 }
  0xe3   : > { %v572_v5 = vmul.f32 %v962_v2, %v532_v62  ;;  %v526_v29 = vadd.f32 0.2548296, %v518_v0  ;;  %v964_v10 = vpop.eup %963  ;;  %v552_v20 = vmul.f32 %v544_v51, %v1180_v21  ;;  %v643_v32 = vmul.f32 %v601_v60, %v601_v60 }
  0xe4   : > { %v602_v13 = vmul.f32 %v594_v6, %v378_v24  ;;  %v480_v14 = vadd.f32 -1.4531521, %v472_v43  ;;  %v589_v11 = vmul.f32 %v581_v49, %v405_v22  ;;  %v380_v22 = vmul.f32 0.5, %v1115_v44 }
  0xe5   : > { %v580_v56 = vsub.f32 1.0, %v572_v5  ;;  %v534_v17 = vmul.f32 %v526_v29, %v1196_v54  ;;  %v406_v18 = vsel %vm398_vm5, 1.0, %v991_v3  ;;  %v583_v35 = vsub.f32 1.0, %v575_v9 }
  0xe6   : > { %v864_v15 = vpack.c.bf16 %v602_v13, %v601_v60  ;;  %v630_v23 = vadd.f32 %v602_v13, %v601_v60  ;;  %v644_v27 = vmul.f32 %v602_v13, %v602_v13  ;;  %v488_v7 = vmul.f32 %v480_v14, %v1229_v58 }
  0xe7   : > { %v588_v21 = vmul.f32 %v580_v56, %v404_v8  ;;  %v574_v19 = vmul.f32 %v964_v10, %v534_v17  ;;  %v567_v16 = vmul.f32 1.442695, %v552_v20  ;;  %v645_v36 = vmul.f32 %v603_v59, %v603_v59 }
  0xe8   : > { %865 = vst [vmem:[%s1248_s25] sm:$0xff] %v864_v15   ;;  %v651_v33 = vadd.f32 %v644_v27, %v643_v32  ;;  %v496_v28 = vadd.f32 1.4214138, %v488_v7  ;;  %v597_v39 = vadd.f32 1.0, %v589_v11  ;;  %v631_v40 = vadd.f32 %v630_v23, %v603_v59 }
  0xe9   : > { %v596_v54 = vadd.f32 1.0, %v588_v21  ;;  %v582_v4 = vsub.f32 1.0, %v574_v19  ;;  %v381_v41 = vmul.f32 0.5, %v1086_v25  ;;  %v407_v44 = vsel %vm399_vm6, 1.0, %v991_v3 }
  0xea   : > { %v504_v57 = vmul.f32 %v496_v28, %v1229_v58  ;;  %v652_v63 = vadd.f32 %v651_v33, %v645_v36  ;;  %v382_v30 = vmul.f32 0.5, %v1119_v52  ;;  %v591_v38 = vmul.f32 %v583_v35, %v407_v44  ;;  %v664_v28 = vld [vmem:[%s1225_s22] sm:$0x3] }
  0xeb   : > { %v604_v34 = vmul.f32 %v596_v54, %v380_v22  ;;  %v590_v45 = vmul.f32 %v582_v4, %v406_v18  ;;  %965 = vpow2.f32 %v567_v16  ;;  %v605_v48 = vmul.f32 %v597_v39, %v381_v41 }
  0xec   : > { %v512_v46 = vadd.f32 -0.28449672, %v504_v57  ;;  %v599_v49 = vadd.f32 1.0, %v591_v38  ;;  %v383_v1 = vmul.f32 0.5, %v1089_v26  ;;  %vm400_vm7 = vcmp.ge.f32.partialorder %v1167_v61, 0.0 }
  0xed   : > { %v869_v53 = vpack.c.bf16 %v604_v34, %v603_v59  ;;  %v598_v47 = vadd.f32 1.0, %v590_v45  ;;  %v632_v50 = vadd.f32 %v631_v40, %v604_v34  ;;  %v646_v51 = vmul.f32 %v604_v34, %v604_v34 }
  0xee   : > { %v520_v25 = vmul.f32 %v512_v46, %v1229_v58  ;;  %v647_v60 = vmul.f32 %v605_v48, %v605_v48  ;;  %v607_v6 = vmul.f32 %v599_v49, %v383_v1  ;;  %v408_v5 = vsel %vm400_vm7, 1.0, %v991_v3 }
  0xef   : > { %881 = vst [vmem:[%s1248_s25 + $0x8] sm:$0xff] %v869_v53   ;;  %v606_v42 = vmul.f32 %v598_v47, %v382_v30  ;;  %v653_v12 = vadd.f32 %v652_v63, %v646_v51  ;;  %v633_v62 = vadd.f32 %v632_v50, %v605_v48 }
  0xf0   : > { %v528_v55 = vadd.f32 0.2548296, %v520_v25  ;;  %v649_v59 = vmul.f32 %v607_v6, %v607_v6 }
  0xf1   : > { %v874_v31 = vpack.c.bf16 %v606_v42, %v605_v48  ;;  %v966_v0 = vpop.eup %965  ;;  %v654_v2 = vadd.f32 %v653_v12, %v647_v60  ;;  %v634_v8 = vadd.f32 %v633_v62, %v606_v42  ;;  %v648_v43 = vmul.f32 %v606_v42, %v606_v42 }
  0xf2   : > { %v536_v52 = vmul.f32 %v528_v55, %v1229_v58  ;;  %v384_v58 = vmul.f32 0.5, %v1155_v37 }
  0xf3   : > { %882 = vst [vmem:[%s1248_s25 + $0x10] sm:$0xff] %v874_v31   ;;  %v655_v29 = vadd.f32 %v654_v2, %v648_v43  ;;  %v635_v14 = vadd.f32 %v634_v8, %v607_v6 }
  0xf4   : > { %v576_v24 = vmul.f32 %v966_v0, %v536_v52 }
  0xf5   : > { %v656_v26 = vadd.f32 %v655_v29, %v649_v59 }
  0xf6   : > { %v584_v9 = vsub.f32 1.0, %v576_v24 }
  0xf8   : > { %v592_v10 = vmul.f32 %v584_v9, %v408_v5 }
  0xfa   : > { %v600_v13 = vadd.f32 1.0, %v592_v10 }
  0xfc   : > { %v608_v20 = vmul.f32 %v600_v13, %v384_v58 }
  0xfe   : > { %v879_v32 = vpack.c.bf16 %v608_v20, %v607_v6  ;;  %v636_v11 = vadd.f32 %v635_v14, %v608_v20  ;;  %v650_v61 = vmul.f32 %v608_v20, %v608_v20 }
 0x100   : > { %883 = vst [vmem:[%s1248_s25 + $0x18] sm:$0xff] %v879_v32   ;;  %v637_v56 = vrot.slane %v636_v11, 4  ;;  %v657_v17 = vadd.f32 %v656_v26, %v650_v61 }
 0x102   : > { %v638_v15 = vadd.f32 %v637_v56, %v636_v11  ;;  %v658_v23 = vrot.slane %v657_v17, 4 }
 0x104   : > { %v639_v3 = vrot.slane %v638_v15, 2  ;;  %v659_v27 = vadd.f32 %v658_v23, %v657_v17 }
 0x106   : > { %v640_v7 = vadd.f32 %v639_v3, %v638_v15  ;;  %v660_v21 = vrot.slane %v659_v27, 2 }
 0x108   : > { %v641_v19 = vrot.slane %v640_v7, 1  ;;  %v661_v37 = vadd.f32 %v660_v21, %v659_v27 }
 0x10a   : > { %v662_v33 = vrot.slane %v661_v37, 1  ;;  %v642_v22 = vadd.f32 %v641_v19, %v640_v7 }
 0x10c   : > { %v663_v18 = vadd.f32 %v662_v33, %v661_v37 }
 0x10e   : > { %v666_v35 = vsel %vm665_vm8, %v642_v22, %v663_v18 }
 0x10f   : > { %v667_v54 = vadd.f32 %v666_v35, %v664_v28 }
 0x111   : > { %668 = vst [vmem:[%s1225_s22] sm:$0x3] %v667_v54 }
 0x112 PF: > { %s15_s17 = sadd.s32 1, %s989_s17   ;;  %s1289_s15 = smov %s985_s16 }
 0x113   : > { %p12_p5 = scmp.ge.s32.totalorder %s15_s17, 4   ;;  %s1290_s16 = smov %s1292_s18 }
 0x115   :  { %14 = sbr.rel (!%p12_p5) target bundleno = 2 (0x2), region = 78 }

// kernel: conv_mixer_forward.9
= control target key start
LH: loop header
LB: loop body
LE: loop exit
PB: predicated region body
PF: predicated region fallthrough
CT: control target
= control target key end

     0   :  { %s1317_s30 = smov 0   ;;  %s1319_s10 = smov 0   ;;  %s1603_s0 = inlined_call_operand.vmem [shape: bf16[2,8,8,128], index: 0, kind: input, shape index: {}]   ;;  %s1604_s1 = inlined_call_operand.vmem [shape: bf16[2,8,8,128], index: 1, kind: input, shape index: {}]   ;;  %s1605_s2 = inlined_call_operand.vmem [shape: f32[1,128], index: 2, kind: input, shape index: {}]   ;;  %s1606_s3 = inlined_call_operand.vmem [shape: f32[1,128], index: 3, kind: input, shape index: {}]   ;;  %s1607_s4 = inlined_call_operand.vmem [shape: f32[1,128], index: 4, kind: input, shape index: {}]   ;;  %s1608_s5 = inlined_call_operand.vmem [shape: f32[1,128], index: 5, kind: input, shape index: {}]   ;;  %s1609_s6 = inlined_call_operand.vmem [shape: bf16[128,128], index: 6, kind: input, shape index: {}]   ;;  %s1610_s7 = inlined_call_operand.vmem [shape: f32[1,128], index: 7, kind: input, shape index: {}]   ;;  %s1611_s8 = inlined_call_operand.vmem [shape: bf16[2,8,8,128], index: 8, kind: output, shape index: {0}]   ;;  %s1612_s9 = inlined_call_operand.vmem [shape: f32[2,2,128], index: 9, kind: output, shape index: {1}]  }
   0x1   :  { %s1321_s11 = smov 0  }
   0x2 LB: > { %s32_s12 = sadd.s32 1, %s1259_s10  ;;  %p1040_p0 = scmp.ge.s32.totalorder %s1263_s11, 1  ;;  %s1263_s11 = sphi %s1321_s11, %s20_s11   ;;  %s1259_s10 = sphi %s1319_s10, %s1614_s10   ;;  %s1255_s30 = sphi %s1317_s30, %s1613_s30  }
   0x3   : > { %p34_p1 = scmp.ge.s32.totalorder %s32_s12, 2  ;;  %p328_p2 = scmp.lt.s32.totalorder %s1263_s11, 3 }
   0x5   : > { %s1616_s12 = smov (%p34_p1, %s32_s12), 0  ;;  %p329_p3 = pnand %p1040_p0, %p328_p2 }
   0x6   : > { %p386_p4 = scmp.lt.s32.totalorder (!%p329_p3), %s1255_s30, 1 }
   0x7   : > { %332 = sbr.rel (%p329_p3) target bundleno = 274 (0x112), region = 52 }
   0xc   : > { %v1092_v0 = vld [vmem:[%s1609_s6 + $0x38] sm:$0xff]  ;;  %v1091_v1 = vld [vmem:[%s1609_s6 + $0x30] sm:$0xff]  ;;  %s1618_s30 = smov (!%p386_p4, %s1255_s30), 1  ;;  %v1090_v2 = vld [vmem:[%s1609_s6 + $0x28] sm:$0xff]  ;;  %v1265_v9 = vmov 0.0   ;;  %vm896_vm8 = vcmask 1040384  }
   0xd   : > { %579 = vmatpush.bf16.msra.mxu0 %v1092_v0  ;;  %1154 = vmatpush.bf16.msra.mxu1 %v1092_v0  ;;  %s1341_s17 = sshll.u32 %s1618_s30, 5  ;;  %s1047_s18 = sshll.u32 %s1618_s30, 1  ;;  %v1204_v8 = vld [vmem:[%s1605_s2] ss:$0 sm:$0xff]  ;;  %v1088_v30 = vld [vmem:[%s1609_s6 + $0x18] sm:$0xff]  ;;  %v1087_v49 = vld [vmem:[%s1609_s6 + $0x10] sm:$0xff] }
   0xe   : > { %1155 = vmatpush.bf16.msra.mxu2 %v1092_v0  ;;  %1156 = vmatpush.bf16.msra.mxu3 %v1092_v0  ;;  %s1350_s23 = scalar_lea.vmem %s1603_s0, %s1341_s17  ;;  %s1356_s26 = scalar_lea.vmem %s1604_s1, %s1341_s17  ;;  %v1206_v13 = vld [vmem:[%s1607_s4] ss:$0 sm:$0xff]  ;;  %v1086_v0 = vld [vmem:[%s1609_s6 + $0x8] sm:$0xff] }
   0xf   : > { %s1361_s29 = scalar_lea.vmem %s1612_s9, %s1047_s18  ;;  %v1094_v3 = vld [vmem:[%s1350_s23] sm:$0xff]   ;;  %v1145_v5 = vld [vmem:[%s1350_s23 + $0x8] sm:$0xff]   ;;  %v1146_v15 = vld [vmem:[%s1350_s23 + $0x10] sm:$0xff]   ;;  %s1567_s19 = scalar_lea.vmem %s1611_s8, %s1341_s17 }
  0x10   : > { %v1110_v4 = vld [vmem:[%s1356_s26] sm:$0xff]   ;;  %v1095_v6 = vunpack.c.l.bf16 %v1094_v3  ;;  %v1096_v7 = vunpack.c.h.bf16 %v1094_v3  ;;  %860 = vst [vmem:[%s1361_s29] sm:$0x3] %v1265_v9  ;;  %v1148_v10 = vld [vmem:[%s1356_s26 + $0x8] sm:$0xff]   ;;  %v1099_v14 = vunpack.c.l.bf16 %v1145_v5  ;;  %v1100_v17 = vunpack.c.h.bf16 %v1145_v5  ;;  %v1149_v23 = vld [vmem:[%s1356_s26 + $0x10] sm:$0xff]  }
  0x11   : > { %580 = vmatpush.bf16.msra.mxu0 %v1091_v1  ;;  %1157 = vmatpush.bf16.msra.mxu1 %v1091_v1  ;;  %v1111_v11 = vunpack.c.l.bf16 %v1110_v4  ;;  %v1112_v12 = vunpack.c.h.bf16 %v1110_v4  ;;  %v1089_v16 = vld [vmem:[%s1609_s6 + $0x20] sm:$0xff]  ;;  %v1115_v18 = vunpack.c.l.bf16 %v1148_v10  ;;  %v1116_v22 = vunpack.c.h.bf16 %v1148_v10  ;;  %v1147_v26 = vld [vmem:[%s1350_s23 + $0x18] sm:$0xff]  }
  0x12   : > { %1158 = vmatpush.bf16.msra.mxu2 %v1091_v1  ;;  %1159 = vmatpush.bf16.msra.mxu3 %v1091_v1  ;;  %v439_v19 = vmul.f32 %v1204_v8, %v1095_v6  ;;  %v440_v20 = vmul.f32 %v1204_v8, %v1096_v7  ;;  %v1205_v21 = vld [vmem:[%s1606_s3] ss:$0 sm:$0xff]  ;;  %v1103_v24 = vunpack.c.l.bf16 %v1146_v15  ;;  %v1104_v25 = vunpack.c.h.bf16 %v1146_v15  ;;  %v1150_v36 = vld [vmem:[%s1356_s26 + $0x18] sm:$0xff]  }
  0x13   : > { %v479_v27 = vmul.f32 %v1206_v13, %v1111_v11  ;;  %v480_v28 = vmul.f32 %v1206_v13, %v1112_v12  ;;  %v441_v29 = vmul.f32 %v1204_v8, %v1099_v14  ;;  %v1207_v31 = vld [vmem:[%s1608_s5] ss:$0 sm:$0xff]  ;;  %v442_v32 = vmul.f32 %v1204_v8, %v1100_v17 }
  0x14   : > { %v481_v33 = vmul.f32 %v1206_v13, %v1115_v18  ;;  %v1119_v34 = vunpack.c.l.bf16 %v1149_v23  ;;  %v1120_v35 = vunpack.c.h.bf16 %v1149_v23  ;;  %v451_v37 = vadd.f32 %v1205_v21, %v439_v19  ;;  %v1085_v9 = vld [vmem:[%s1609_s6] sm:$0xff] }
  0x15   : > { %581 = vmatpush.bf16.msra.mxu0 %v1090_v2  ;;  %1160 = vmatpush.bf16.msra.mxu1 %v1090_v2  ;;  %v452_v38 = vadd.f32 %v1205_v21, %v440_v20  ;;  %v482_v39 = vmul.f32 %v1206_v13, %v1116_v22  ;;  %v1107_v40 = vunpack.c.l.bf16 %v1147_v26  ;;  %v443_v41 = vmul.f32 %v1204_v8, %v1103_v24  ;;  %v1402_v17 = vld [vmem:[%s1610_s7] ss:$0 sm:$0xff] }
  0x16   : > { %1161 = vmatpush.bf16.msra.mxu2 %v1090_v2  ;;  %1162 = vmatpush.bf16.msra.mxu3 %v1090_v2  ;;  %v444_v42 = vmul.f32 %v1204_v8, %v1104_v25  ;;  %v483_v43 = vmul.f32 %v1206_v13, %v1119_v34  ;;  %v484_v44 = vmul.f32 %v1206_v13, %v1120_v35  ;;  %v1108_v45 = vunpack.c.h.bf16 %v1147_v26 }
  0x17   : > { %v445_v46 = vmul.f32 %v1204_v8, %v1107_v40  ;;  %v1123_v47 = vunpack.c.l.bf16 %v1150_v36  ;;  %v1124_v48 = vunpack.c.h.bf16 %v1150_v36  ;;  %v491_v50 = vadd.f32 %v1207_v31, %v479_v27 }
  0x18   : > { %v492_v51 = vadd.f32 %v1207_v31, %v480_v28  ;;  %v453_v52 = vadd.f32 %v1205_v21, %v441_v29  ;;  %v454_v53 = vadd.f32 %v1205_v21, %v442_v32  ;;  %v446_v54 = vmul.f32 %v1204_v8, %v1108_v45 }
  0x19   : > { %582 = vmatpush.bf16.msra.mxu0 %v1089_v16  ;;  %1163 = vmatpush.bf16.msra.mxu1 %v1089_v16  ;;  %v485_v55 = vmul.f32 %v1206_v13, %v1123_v47  ;;  %v493_v56 = vadd.f32 %v1207_v31, %v481_v33  ;;  %v494_v57 = vadd.f32 %v1207_v31, %v482_v39 }
  0x1a   : > { %1164 = vmatpush.bf16.msra.mxu2 %v1089_v16  ;;  %1165 = vmatpush.bf16.msra.mxu3 %v1089_v16  ;;  %v455_v58 = vadd.f32 %v1205_v21, %v443_v41  ;;  %v486_v59 = vmul.f32 %v1206_v13, %v1124_v48  ;;  %v456_v60 = vadd.f32 %v1205_v21, %v444_v42 }
  0x1b   : > { %v495_v61 = vadd.f32 %v1207_v31, %v483_v43  ;;  %v496_v62 = vadd.f32 %v1207_v31, %v484_v44  ;;  %v457_v63 = vadd.f32 %v1205_v21, %v445_v46  ;;  %v458_v1 = vadd.f32 %v1205_v21, %v446_v54 }
  0x1c   : > { %v497_v2 = vadd.f32 %v1207_v31, %v485_v55  ;;  %v498_v3 = vadd.f32 %v1207_v31, %v486_v59  ;;  %v499_v4 = vadd.f32 %v491_v50, %v451_v37  ;;  %v500_v5 = vadd.f32 %v492_v51, %v452_v38 }
  0x1d   : > { %583 = vmatpush.bf16.msra.mxu0 %v1088_v30  ;;  %1166 = vmatpush.bf16.msra.mxu1 %v1088_v30  ;;  %v501_v6 = vadd.f32 %v493_v56, %v453_v52  ;;  %v502_v7 = vadd.f32 %v494_v57, %v454_v53  ;;  %v503_v8 = vadd.f32 %v495_v61, %v455_v58 }
  0x1e   : > { %1167 = vmatpush.bf16.msra.mxu2 %v1088_v30  ;;  %1168 = vmatpush.bf16.msra.mxu3 %v1088_v30  ;;  %v504_v10 = vadd.f32 %v496_v62, %v456_v60  ;;  %v505_v11 = vadd.f32 %v497_v2, %v457_v63  ;;  %v506_v12 = vadd.f32 %v498_v3, %v458_v1 }
  0x1f   : > { %v507_v13 = vpack.c.bf16 %v500_v5, %v499_v4  ;;  %v508_v14 = vpack.c.bf16 %v502_v7, %v501_v6 }
  0x20   : > { %v509_v15 = vpack.c.bf16 %v504_v10, %v503_v8  ;;  %v510_v16 = vpack.c.bf16 %v506_v12, %v505_v11 }
  0x21   : > { %584 = vmatpush.bf16.msra.mxu0 %v1087_v49  ;;  %1169 = vmatpush.bf16.msra.mxu1 %v1087_v49 }
  0x22   : > { %1170 = vmatpush.bf16.msra.mxu2 %v1087_v49  ;;  %1171 = vmatpush.bf16.msra.mxu3 %v1087_v49 }
  0x25   : > { %585 = vmatpush.bf16.msra.mxu0 %v1086_v0  ;;  %1172 = vmatpush.bf16.msra.mxu1 %v1086_v0 }
  0x26   : > { %1173 = vmatpush.bf16.msra.mxu2 %v1086_v0  ;;  %1174 = vmatpush.bf16.msra.mxu3 %v1086_v0 }
  0x29   : > { %586 = vmatpush.bf16.msra.mxu0 %v1085_v9  ;;  %1175 = vmatpush.bf16.msra.mxu1 %v1085_v9 }
  0x2a   : > { %1176 = vmatpush.bf16.msra.mxu2 %v1085_v9  ;;  %1177 = vmatpush.bf16.msra.mxu3 %v1085_v9 }
  0x2c   : > { %587 = vmatmul.bf16.vlgmr.msra.gmra.mxu0 %v507_v13  ;;  %592 = vmatmul.bf16.vlgmr.msra.gmra.mxu1 %v508_v14 }
  0x2d   : > { %597 = vmatmul.bf16.vlgmr.msra.gmra.mxu2 %v509_v15  ;;  %602 = vmatmul.bf16.vlgmr.msra.gmra.mxu3 %v510_v16 }
  0xa9   : > { %v588_v18 = vpop.f32.mrf.mxu0  ;;  %v593_v19 = vpop.f32.mrf.mxu1 }
  0xaa   : > { %v589_v20 = vadd.f32 %v1402_v17, %v588_v18  ;;  %v594_v21 = vadd.f32 %v1402_v17, %v593_v19 }
  0xac   : > { %v1406_v22 = vmul.f32 0.70710677, %v589_v20  ;;  %v1408_v23 = vmul.f32 0.70710677, %v594_v21  ;;  %v1464_v10 = vmul.f32 0.5, %v589_v20  ;;  %v1466_v12 = vmul.f32 0.5, %v594_v21 }
  0xae   : > { %v640_v24 = vand.u32 2147483647, %v1406_v22  ;;  %v642_v25 = vand.u32 2147483647, %v1408_v23  ;;  %vm624_vm0 = vcmp.ge.f32.partialorder %v1406_v22, 0.0  ;;  %vm626_vm1 = vcmp.ge.f32.partialorder %v1408_v23, 0.0 }
  0xb0   : > { %v648_v26 = vmul.f32 0.3275911, %v640_v24  ;;  %v650_v27 = vmul.f32 0.3275911, %v642_v25  ;;  %v598_v28 = vpop.f32.mrf.mxu2  ;;  %v603_v29 = vpop.f32.mrf.mxu3  ;;  %v768_v44 = vsub.f32 0.0, %v640_v24  ;;  %v770_v59 = vsub.f32 0.0, %v642_v25 }
  0xb1   : > { %v1413_v30 = vadd.f32 %v1402_v17, %v598_v28  ;;  %v1416_v31 = vadd.f32 %v1402_v17, %v603_v29  ;;  %v590_v32 = vpop.f32.mrf.mxu0  ;;  %v595_v41 = vpop.f32.mrf.mxu1 }
  0xb2   : > { %v656_v33 = vadd.f32 1.0, %v648_v26  ;;  %v658_v34 = vadd.f32 1.0, %v650_v27  ;;  %v1425_v37 = vadd.f32 %v1402_v17, %v590_v32  ;;  %v1442_v49 = vadd.f32 %v1402_v17, %v595_v41 }
  0xb3   : > { %v1419_v35 = vmul.f32 0.70710677, %v1413_v30  ;;  %v1422_v36 = vmul.f32 0.70710677, %v1416_v31  ;;  %v776_v56 = vmul.f32 %v768_v44, %v640_v24  ;;  %v778_v7 = vmul.f32 %v770_v59, %v642_v25 }
  0xb4   : > { %1209 = vrcp.f32 %v656_v33  ;;  %v1436_v43 = vmul.f32 0.70710677, %v1425_v37  ;;  %v1449_v61 = vmul.f32 0.70710677, %v1442_v49 }
  0xb5   : > { %1211 = vrcp.f32 %v658_v34  ;;  %v1428_v38 = vand.u32 2147483647, %v1419_v35  ;;  %v1431_v39 = vand.u32 2147483647, %v1422_v36  ;;  %v784_v3 = vmul.f32 1.442695, %v776_v56 }
  0xb6   : > { %v1439_v48 = vand.u32 2147483647, %v1436_v43  ;;  %v1456_v0 = vand.u32 2147483647, %v1449_v61  ;;  %v788_v27 = vmul.f32 1.442695, %v778_v7 }
  0xb7   : > { %v652_v40 = vmul.f32 0.3275911, %v1428_v38  ;;  %v654_v42 = vmul.f32 0.3275911, %v1431_v39  ;;  %vm628_vm2 = vcmp.ge.f32.partialorder %v1419_v35, 0.0  ;;  %vm625_vm3 = vcmp.ge.f32.partialorder %v1436_v43, 0.0 }
  0xb8   : > { %v600_v50 = vpop.f32.mrf.mxu2  ;;  %v649_v54 = vmul.f32 0.3275911, %v1439_v48  ;;  %v651_v9 = vmul.f32 0.3275911, %v1456_v0  ;;  %v605_v25 = vpop.f32.mrf.mxu3  ;;  %v769_v41 = vsub.f32 0.0, %v1439_v48  ;;  %vm627_vm4 = vcmp.ge.f32.partialorder %v1449_v61, 0.0 }
  0xb9   : > { %v660_v45 = vadd.f32 1.0, %v652_v40  ;;  %v662_v47 = vadd.f32 1.0, %v654_v42  ;;  %v1446_v57 = vadd.f32 %v1402_v17, %v600_v50  ;;  %v1482_v42 = vadd.f32 %v1402_v17, %v605_v25 }
  0xba   : > { %v1210_v46 = vpop.eup %1209  ;;  %v657_v60 = vadd.f32 1.0, %v649_v54  ;;  %v659_v16 = vadd.f32 1.0, %v651_v9  ;;  %vm630_vm6 = vcmp.ge.f32.partialorder %v1422_v36, 0.0 }
  0xbb   : > { %v1212_v51 = vpop.eup %1211  ;;  %v672_v52 = vmul.f32 %v1210_v46, %v656_v33  ;;  %1213 = vrcp.f32 %v660_v45  ;;  %v1460_v4 = vmul.f32 0.70710677, %v1446_v57 }
  0xbc   : > { %v674_v53 = vmul.f32 %v1212_v51, %v658_v34  ;;  %1215 = vrcp.f32 %v662_v47 }
  0xbd   : > { %v680_v55 = vsub.f32 2.0, %v672_v52  ;;  %1217 = vrcp.f32 %v657_v60  ;;  %v1471_v24 = vand.u32 2147483647, %v1460_v4  ;;  %v772_v52 = vsub.f32 0.0, %v1428_v38 }
  0xbe   : > { %v682_v58 = vsub.f32 2.0, %v674_v53  ;;  %1219 = vpow2.f32 %v784_v3  ;;  %v774_v53 = vsub.f32 0.0, %v1431_v39  ;;  %vm629_vm5 = vcmp.ge.f32.partialorder %v1460_v4, 0.0 }
  0xbf   : > { %v1451_v62 = vmul.f32 %v1210_v46, %v680_v55  ;;  %1221 = vrcp.f32 %v659_v16  ;;  %v653_v33 = vmul.f32 0.3275911, %v1471_v24 }
  0xc0   : > { %v1453_v63 = vmul.f32 %v1212_v51, %v682_v58 }
  0xc1   : > { %v1214_v1 = vpop.eup %1213  ;;  %v696_v2 = vmul.f32 1.0614054, %v1451_v62 }
  0xc2   : > { %v1216_v5 = vpop.eup %1215  ;;  %v698_v6 = vmul.f32 1.0614054, %v1453_v63  ;;  %v676_v8 = vmul.f32 %v1214_v1, %v660_v45 }
  0xc3   : > { %v704_v11 = vadd.f32 -1.4531521, %v696_v2  ;;  %v678_v13 = vmul.f32 %v1216_v5, %v662_v47  ;;  %v1218_v26 = vpop.eup %1217  ;;  %v661_v47 = vadd.f32 1.0, %v653_v33  ;;  %v1494_v2 = vmul.f32 0.70710677, %v1482_v42 }
  0xc4   : > { %v706_v14 = vadd.f32 -1.4531521, %v698_v6  ;;  %v684_v15 = vsub.f32 2.0, %v676_v8  ;;  %v673_v32 = vmul.f32 %v1218_v26, %v657_v60  ;;  %v1220_v54 = vpop.eup %1219  ;;  %v1266_v8 = vmov -1.0  }
  0xc5   : > { %v712_v18 = vmul.f32 %v704_v11, %v1451_v62  ;;  %v686_v19 = vsub.f32 2.0, %v678_v13  ;;  %1223 = vrcp.f32 %v661_v47  ;;  %v1222_v17 = vpop.eup %1221  ;;  %v632_v9 = vsel %vm624_vm0, 1.0, %v1266_v8 }
  0xc6   : > { %v714_v20 = vmul.f32 %v706_v14, %v1453_v63  ;;  %v1474_v21 = vmul.f32 %v1214_v1, %v684_v15  ;;  %v681_v46 = vsub.f32 2.0, %v673_v32  ;;  %v777_v1 = vmul.f32 %v769_v41, %v1439_v48 }
  0xc7   : > { %v720_v28 = vadd.f32 1.4214138, %v712_v18  ;;  %v1476_v29 = vmul.f32 %v1216_v5, %v686_v19  ;;  %v675_v7 = vmul.f32 %v1222_v17, %v659_v16  ;;  %1225 = vpow2.f32 %v788_v27 }
  0xc8   : > { %v722_v34 = vadd.f32 1.4214138, %v714_v20  ;;  %v700_v40 = vmul.f32 1.0614054, %v1474_v21  ;;  %v1489_v58 = vmul.f32 %v1218_v26, %v681_v46  ;;  %v780_v14 = vmul.f32 %v772_v52, %v1428_v38 }
  0xc9   : > { %v728_v44 = vmul.f32 %v720_v28, %v1451_v62  ;;  %v702_v45 = vmul.f32 1.0614054, %v1476_v29  ;;  %v683_v16 = vsub.f32 2.0, %v675_v7  ;;  %v1507_v26 = vand.u32 2147483647, %v1494_v2 }
  0xca   : > { %v730_v50 = vmul.f32 %v722_v34, %v1453_v63  ;;  %v708_v51 = vadd.f32 -1.4531521, %v700_v40  ;;  %v697_v6 = vmul.f32 1.0614054, %v1489_v58  ;;  %v782_v27 = vmul.f32 %v774_v53, %v1431_v39 }
  0xcb   : > { %v736_v55 = vadd.f32 -0.28449672, %v728_v44  ;;  %v710_v56 = vadd.f32 -1.4531521, %v702_v45  ;;  %v1224_v22 = vpop.eup %1223  ;;  %v786_v32 = vmul.f32 1.442695, %v777_v1  ;;  %v1513_v34 = vmul.f32 %v1222_v17, %v683_v16 }
  0xcc   : > { %v738_v59 = vadd.f32 -0.28449672, %v730_v50  ;;  %v716_v60 = vmul.f32 %v708_v51, %v1474_v21  ;;  %v705_v18 = vadd.f32 -1.4531521, %v697_v6  ;;  %v677_v40 = vmul.f32 %v1224_v22, %v661_v47 }
  0xcd   : > { %v744_v3 = vmul.f32 %v736_v55, %v1451_v62  ;;  %v718_v5 = vmul.f32 %v710_v56, %v1476_v29  ;;  %v771_v45 = vsub.f32 0.0, %v1456_v0  ;;  %v655_v46 = vmul.f32 0.3275911, %v1507_v26  ;;  %v1226_v50 = vpop.eup %1225 }
  0xce   : > { %v746_v11 = vmul.f32 %v738_v59, %v1453_v63  ;;  %v724_v13 = vadd.f32 1.4214138, %v716_v60  ;;  %v713_v28 = vmul.f32 %v705_v18, %v1489_v58  ;;  %v699_v51 = vmul.f32 1.0614054, %v1513_v34 }
  0xcf   : > { %v752_v48 = vadd.f32 0.2548296, %v744_v3  ;;  %v726_v15 = vadd.f32 1.4214138, %v718_v5  ;;  %v685_v52 = vsub.f32 2.0, %v677_v40  ;;  %v773_v56 = vsub.f32 0.0, %v1471_v24 }
  0xd0   : > { %v754_v19 = vadd.f32 0.2548296, %v746_v11  ;;  %v732_v25 = vmul.f32 %v724_v13, %v1474_v21  ;;  %v721_v44 = vadd.f32 1.4214138, %v713_v28  ;;  %v792_v53 = vmul.f32 1.442695, %v780_v14 }
  0xd1   : > { %v760_v20 = vmul.f32 %v752_v48, %v1451_v62  ;;  %v734_v33 = vmul.f32 %v726_v15, %v1476_v29  ;;  %v663_v47 = vadd.f32 1.0, %v655_v46  ;;  %1227 = vpow2.f32 %v786_v32 }
  0xd2   : > { %v740_v38 = vadd.f32 -0.28449672, %v732_v25  ;;  %v762_v41 = vmul.f32 %v754_v19, %v1453_v63  ;;  %v729_v55 = vmul.f32 %v721_v44, %v1489_v58  ;;  %v707_v63 = vadd.f32 -1.4531521, %v699_v51 }
  0xd3   : > { %v800_v62 = vmul.f32 %v1220_v54, %v760_v20  ;;  %v742_v17 = vadd.f32 -0.28449672, %v734_v33  ;;  %v1522_v59 = vmul.f32 %v1224_v22, %v685_v52  ;;  %v779_v54 = vmul.f32 %v771_v45, %v1456_v0 }
  0xd4   : > { %v748_v39 = vmul.f32 %v740_v38, %v1474_v21  ;;  %v802_v60 = vmul.f32 %v1226_v50, %v762_v41  ;;  %v737_v1 = vadd.f32 -0.28449672, %v729_v55  ;;  %1229 = vrcp.f32 %v663_v47 }
  0xd5   : > { %v808_v3 = vsub.f32 1.0, %v800_v62  ;;  %v715_v6 = vmul.f32 %v707_v63, %v1513_v34  ;;  %v701_v7 = vmul.f32 1.0614054, %v1522_v59  ;;  %1231 = vpow2.f32 %v792_v53 }
  0xd6   : > { %v756_v5 = vadd.f32 0.2548296, %v748_v39  ;;  %v745_v11 = vmul.f32 %v737_v1, %v1489_v58  ;;  %v781_v13 = vmul.f32 %v773_v56, %v1471_v24  ;;  %v750_v48 = vmul.f32 %v742_v17, %v1476_v29 }
  0xd7   : > { %v796_v14 = vmul.f32 1.442695, %v782_v27  ;;  %v723_v15 = vadd.f32 1.4214138, %v715_v6  ;;  %v709_v18 = vadd.f32 -1.4531521, %v701_v7  ;;  %v1228_v22 = vpop.eup %1227  ;;  %v816_v20 = vmul.f32 %v808_v3, %v632_v9 }
  0xd8   : > { %v634_v0 = vsel %vm626_vm1, 1.0, %v1266_v8  ;;  %v810_v19 = vsub.f32 1.0, %v802_v60  ;;  %v753_v25 = vadd.f32 0.2548296, %v745_v11  ;;  %v790_v16 = vmul.f32 1.442695, %v779_v54 }
  0xd9   : > { %v764_v28 = vmul.f32 %v756_v5, %v1474_v21  ;;  %v731_v32 = vmul.f32 %v723_v15, %v1513_v34  ;;  %v717_v24 = vmul.f32 %v709_v18, %v1522_v59  ;;  %v636_v27 = vsel %vm628_vm2, 1.0, %v1266_v8 }
  0xda   : > { %v1230_v38 = vpop.eup %1229  ;;  %v761_v23 = vmul.f32 %v753_v25, %v1489_v58  ;;  %v794_v33 = vmul.f32 1.442695, %v781_v13  ;;  %v758_v40 = vadd.f32 0.2548296, %v750_v48  ;;  %1233 = vpow2.f32 %v796_v14 }
  0xdb   : > { %v739_v41 = vadd.f32 -0.28449672, %v731_v32  ;;  %v725_v9 = vadd.f32 1.4214138, %v717_v24  ;;  %v1232_v44 = vpop.eup %1231  ;;  %v818_v21 = vmul.f32 %v810_v19, %v634_v0  ;;  %1235 = vpow2.f32 %v790_v16 }
  0xdc   : > { %v801_v45 = vmul.f32 %v1228_v22, %v761_v23  ;;  %v679_v46 = vmul.f32 %v1230_v38, %v663_v47  ;;  %v824_v50 = vadd.f32 1.0, %v816_v20  ;;  %v804_v62 = vmul.f32 %v1232_v44, %v764_v28 }
  0xdd   : > { %v747_v39 = vmul.f32 %v739_v41, %v1513_v34  ;;  %v733_v35 = vmul.f32 %v725_v9, %v1522_v59  ;;  %v633_v58 = vsel %vm625_vm3, 1.0, %v1266_v8  ;;  %v766_v53 = vmul.f32 %v758_v40, %v1476_v29 }
  0xde   : > { %v809_v51 = vsub.f32 1.0, %v801_v45  ;;  %v687_v52 = vsub.f32 2.0, %v679_v46  ;;  %1237 = vpow2.f32 %v794_v33  ;;  %v826_v47 = vadd.f32 1.0, %v818_v21 }
  0xdf   : > { %v755_v55 = vadd.f32 0.2548296, %v747_v39  ;;  %v741_v56 = vadd.f32 -0.28449672, %v733_v35  ;;  %v775_v60 = vsub.f32 0.0, %v1507_v26  ;;  %v832_v54 = vmul.f32 %v824_v50, %v1464_v10 }
  0xe0   : > { %v817_v17 = vmul.f32 %v809_v51, %v633_v58  ;;  %v1549_v63 = vmul.f32 %v1230_v38, %v687_v52  ;;  %v1234_v1 = vpop.eup %1233  ;;  %v812_v43 = vsub.f32 1.0, %v804_v62  ;;  %v609_v29 = vmul.f32 0.5, %v1425_v37 }
  0xe1   : > { %v763_v3 = vmul.f32 %v755_v55, %v1513_v34  ;;  %v749_v5 = vmul.f32 %v741_v56, %v1522_v59  ;;  %v1236_v6 = vpop.eup %1235  ;;  %v635_v11 = vsel %vm627_vm4, 1.0, %v1266_v8  ;;  %v806_v48 = vmul.f32 %v1234_v1, %v766_v53 }
  0xe2   : > { %v825_v7 = vadd.f32 1.0, %v817_v17  ;;  %v703_v13 = vmul.f32 1.0614054, %v1549_v63  ;;  %v834_v34 = vmul.f32 %v826_v47, %v1466_v12  ;;  %v783_v0 = vmul.f32 %v775_v60, %v1507_v26 }
  0xe3   : > { %v803_v14 = vmul.f32 %v1236_v6, %v763_v3  ;;  %v757_v10 = vadd.f32 0.2548296, %v749_v5  ;;  %v874_v37 = vmul.f32 %v832_v54, %v832_v54  ;;  %v820_v25 = vmul.f32 %v812_v43, %v636_v27 }
  0xe4   : > { %v833_v15 = vmul.f32 %v825_v7, %v609_v29  ;;  %v711_v18 = vadd.f32 -1.4531521, %v703_v13  ;;  %v1238_v19 = vpop.eup %1237  ;;  %v611_v38 = vmul.f32 0.5, %v1442_v49  ;;  %v637_v27 = vsel %vm629_vm5, 1.0, %v1266_v8 }
  0xe5   : > { %v811_v61 = vsub.f32 1.0, %v803_v14  ;;  %v765_v16 = vmul.f32 %v757_v10, %v1522_v59  ;;  %v814_v33 = vsub.f32 1.0, %v806_v48  ;;  %v798_v41 = vmul.f32 1.442695, %v783_v0 }
  0xe6   : > { %v1128_v22 = vpack.c.bf16 %v833_v15, %v832_v54  ;;  %v861_v20 = vadd.f32 %v833_v15, %v832_v54  ;;  %v875_v28 = vmul.f32 %v833_v15, %v833_v15  ;;  %v719_v12 = vmul.f32 %v711_v18, %v1549_v63 }
  0xe7   : > { %v819_v26 = vmul.f32 %v811_v61, %v635_v11  ;;  %v805_v32 = vmul.f32 %v1238_v19, %v765_v16  ;;  %v876_v9 = vmul.f32 %v834_v34, %v834_v34  ;;  %v828_v44 = vadd.f32 1.0, %v820_v25 }
  0xe8   : > { %1129 = vst [vmem:[%s1567_s19] sm:$0xff] %v1128_v22   ;;  %v882_v24 = vadd.f32 %v875_v28, %v874_v37  ;;  %v727_v23 = vadd.f32 1.4214138, %v719_v12  ;;  %v862_v21 = vadd.f32 %v861_v20, %v834_v34  ;;  %v612_v46 = vmul.f32 0.5, %v1413_v30 }
  0xe9   : > { %v827_v59 = vadd.f32 1.0, %v819_v26  ;;  %v813_v40 = vsub.f32 1.0, %v805_v32  ;;  %v638_v49 = vsel %vm630_vm6, 1.0, %v1266_v8  ;;  %v613_v39 = vmul.f32 0.5, %v1446_v57 }
  0xea   : > { %v735_v45 = vmul.f32 %v727_v23, %v1549_v63  ;;  %v883_v4 = vadd.f32 %v882_v24, %v876_v9  ;;  %v822_v58 = vmul.f32 %v814_v33, %v638_v49  ;;  %1239 = vpow2.f32 %v798_v41  ;;  %v895_v23 = vld [vmem:[%s1361_s29] sm:$0x3] }
  0xeb   : > { %v835_v50 = vmul.f32 %v827_v59, %v611_v38  ;;  %v821_v62 = vmul.f32 %v813_v40, %v637_v27  ;;  %v836_v53 = vmul.f32 %v828_v44, %v612_v46  ;;  %v614_v5 = vmul.f32 0.5, %v1416_v31 }
  0xec   : > { %v743_v35 = vadd.f32 -0.28449672, %v735_v45  ;;  %v830_v54 = vadd.f32 1.0, %v822_v58  ;;  %vm631_vm7 = vcmp.ge.f32.partialorder %v1494_v2, 0.0 }
  0xed   : > { %v1133_v51 = vpack.c.bf16 %v835_v50, %v834_v34  ;;  %v829_v52 = vadd.f32 1.0, %v821_v62  ;;  %v863_v55 = vadd.f32 %v862_v21, %v835_v50  ;;  %v877_v56 = vmul.f32 %v835_v50, %v835_v50 }
  0xee   : > { %v751_v30 = vmul.f32 %v743_v35, %v1549_v63  ;;  %v878_v1 = vmul.f32 %v836_v53, %v836_v53  ;;  %v838_v7 = vmul.f32 %v830_v54, %v614_v5  ;;  %v639_v14 = vsel %vm631_vm7, 1.0, %v1266_v8 }
  0xef   : > { %1151 = vst [vmem:[%s1567_s19 + $0x8] sm:$0xff] %v1133_v51   ;;  %v837_v47 = vmul.f32 %v829_v52, %v613_v39  ;;  %v884_v17 = vadd.f32 %v883_v4, %v877_v56  ;;  %v864_v43 = vadd.f32 %v863_v55, %v836_v53 }
  0xf0   : > { %v759_v60 = vadd.f32 0.2548296, %v751_v30  ;;  %v1240_v3 = vpop.eup %1239  ;;  %v880_v15 = vmul.f32 %v838_v7, %v838_v7 }
  0xf1   : > { %v1138_v36 = vpack.c.bf16 %v837_v47, %v836_v53  ;;  %v885_v6 = vadd.f32 %v884_v17, %v878_v1  ;;  %v865_v11 = vadd.f32 %v864_v43, %v837_v47  ;;  %v879_v13 = vmul.f32 %v837_v47, %v837_v47 }
  0xf2   : > { %v767_v57 = vmul.f32 %v759_v60, %v1549_v63  ;;  %v615_v63 = vmul.f32 0.5, %v1482_v42 }
  0xf3   : > { %1152 = vst [vmem:[%s1567_s19 + $0x10] sm:$0xff] %v1138_v36   ;;  %v886_v10 = vadd.f32 %v885_v6, %v879_v13  ;;  %v866_v0 = vadd.f32 %v865_v11, %v838_v7 }
  0xf4   : > { %v807_v29 = vmul.f32 %v1240_v3, %v767_v57 }
  0xf5   : > { %v887_v31 = vadd.f32 %v886_v10, %v880_v15 }
  0xf6   : > { %v815_v48 = vsub.f32 1.0, %v807_v29 }
  0xf8   : > { %v823_v34 = vmul.f32 %v815_v48, %v639_v14 }
  0xfa   : > { %v831_v18 = vadd.f32 1.0, %v823_v34 }
  0xfc   : > { %v839_v19 = vmul.f32 %v831_v18, %v615_v63 }
  0xfe   : > { %v1143_v37 = vpack.c.bf16 %v839_v19, %v838_v7  ;;  %v867_v25 = vadd.f32 %v866_v0, %v839_v19  ;;  %v881_v2 = vmul.f32 %v839_v19, %v839_v19 }
 0x100   : > { %1153 = vst [vmem:[%s1567_s19 + $0x18] sm:$0xff] %v1143_v37   ;;  %v868_v61 = vrot.slane %v867_v25, 4  ;;  %v888_v16 = vadd.f32 %v887_v31, %v881_v2 }
 0x102   : > { %v869_v22 = vadd.f32 %v868_v61, %v867_v25  ;;  %v889_v20 = vrot.slane %v888_v16, 4 }
 0x104   : > { %v870_v8 = vrot.slane %v869_v22, 2  ;;  %v890_v28 = vadd.f32 %v889_v20, %v888_v16 }
 0x106   : > { %v871_v12 = vadd.f32 %v870_v8, %v869_v22  ;;  %v891_v26 = vrot.slane %v890_v28, 2 }
 0x108   : > { %v872_v32 = vrot.slane %v871_v12, 1  ;;  %v892_v42 = vadd.f32 %v891_v26, %v890_v28 }
 0x10a   : > { %v893_v24 = vrot.slane %v892_v42, 1  ;;  %v873_v38 = vadd.f32 %v872_v32, %v871_v12 }
 0x10c   : > { %v894_v27 = vadd.f32 %v893_v24, %v892_v42 }
 0x10e   : > { %v897_v33 = vsel %vm896_vm8, %v873_v38, %v894_v27 }
 0x10f   : > { %v898_v59 = vadd.f32 %v897_v33, %v895_v23 }
 0x111   : > { %899 = vst [vmem:[%s1361_s29] sm:$0x3] %v898_v59 }
 0x112 PF: > { %s20_s11 = sadd.s32 1, %s1263_s11   ;;  %s1613_s30 = smov %s1259_s10 }
 0x113   : > { %p17_p5 = scmp.ge.s32.totalorder %s20_s11, 4   ;;  %s1614_s10 = smov %s1616_s12 }
 0x115   :  { %19 = sbr.rel (!%p17_p5) target bundleno = 2 (0x2), region = 101 }

// kernel: conv_mixer_forward.13
= control target key start
LH: loop header
LB: loop body
LE: loop exit
PB: predicated region body
PF: predicated region fallthrough
CT: control target
= control target key end

     0   :  { %s251_s0 = inlined_call_operand.vmem [shape: f32[2,1,128], index: 0, kind: input, shape index: {}]   ;;  %s252_s1 = inlined_call_operand.vmem [shape: bf16[128,128], index: 1, kind: input, shape index: {}]   ;;  %s253_s2 = inlined_call_operand.vmem [shape: f32[1,128], index: 2, kind: input, shape index: {}]   ;;  %s254_s3 = inlined_call_operand.hbm [shape: f32[2,128], index: 3, kind: output, shape index: {}]  }
   0x1   :  { %v165_v0 = vld [vmem:[%s252_s1 + $0x38] sm:$0xff]  ;;  %v164_v1 = vld [vmem:[%s252_s1 + $0x30] sm:$0xff] }
   0x2   :  { %96 = vmatpush.bf16.msra.mxu0 %v165_v0 }
   0x3   :  { %8 = vsyncpa [#allocation3], 0  ;;  %v163_v2 = vld [vmem:[%s252_s1 + $0x28] sm:$0xff]  ;;  %v162_v3 = vld [vmem:[%s252_s1 + $0x20] sm:$0xff]  ;;  %vm44_vm0 = vcmask 1041409   ;;  %s194_s6 = smov [#allocation2]  }
   0x4   :  { %v16_v4 = vld [vmem:[%s251_s0 + $0x1] sm:$0x1]  ;;  %v161_v5 = vld [vmem:[%s252_s1 + $0x18] sm:$0xff]  ;;  %v15_v7 = vld [vmem:[%s251_s0] sm:$0x1]  ;;  %s115_s7 = sshll.u32 %s194_s6, 4  ;;  %s116_s7 = int_to_ptr.vmem [resolvable:$true] %s115_s7 }
   0x5   :  { %v18_v6 = vpack.c.bf16 %v16_v4, %v16_v4  ;;  %v160_v8 = vld [vmem:[%s252_s1 + $0x10] sm:$0xff]  ;;  %v17_v9 = vpack.c.bf16 %v15_v7, %v15_v7  ;;  %v159_v11 = vld [vmem:[%s252_s1 + $0x8] sm:$0xff]  ;;  %v158_v14 = vld [vmem:[%s252_s1] sm:$0xff]  ;;  %s117_s10 = sshll.u32 %s254_s3, 4  ;;  %s118_s10 = int_to_ptr.hbm [resolvable:$true] %s117_s10 }
   0x6   :  { %97 = vmatpush.bf16.msra.mxu0 %v164_v1  ;;  %v167_v17 = vld [vmem:[%s253_s2] ss:$0 sm:$0xff] }
   0x7   :  { %v42_v10 = vunpack.c.l.b16 %v18_v6  ;;  %v41_v12 = vunpack.c.l.b16 %v17_v9 }
   0x9   :  { %v43_v13 = vrot.slane %v42_v10, 7 }
   0xa   :  { %98 = vmatpush.bf16.msra.mxu0 %v163_v2 }
   0xb   :  { %v45_v15 = vsel %vm44_vm0, %v43_v13, %v41_v12 }
   0xc   :  { %v46_v16 = vpack.c.b16 %v45_v15, %v45_v15 }
   0xe   :  { %99 = vmatpush.bf16.msra.mxu0 %v162_v3 }
  0x12   :  { %100 = vmatpush.bf16.msra.mxu0 %v161_v5 }
  0x16   :  { %101 = vmatpush.bf16.msra.mxu0 %v160_v8 }
  0x1a   :  { %102 = vmatpush.bf16.msra.mxu0 %v159_v11 }
  0x1e   :  { %103 = vmatpush.bf16.msra.mxu0 %v158_v14 }
  0x21   :  { %104 = vmatmul.bf16.vlgmr.msra.gmra.mxu0 %v46_v16 }
  0x9e   :  { %v105_v18 = vpop.f32.mrf.mxu0 }
  0x9f   :  { %v106_v19 = vadd.f32 %v167_v17, %v105_v18 }
  0xa1   :  { %109 = vst [vmem:[#allocation2] sm:$0x3] %v106_v19 }
  0xa2   :  { %120 = dma.vmem_to_hbm [thread:$0]  %s116_s7, 32, %s118_s10, [#allocation3]  }
  0xa6   :  { %v107_v20 = vpop.f32.mrf.mxu0 }
  0xa7   :  { %192 = dma.done.wait [#allocation3], 32  }
  0xa8   :  { %193 = vsyncadd [#allocation3], 4294967264 }
  0xa9   :  { %125 = vsyncpa [#allocation3], 1 }

// kernel: conv_mixer_forward.8
= control target key start
LH: loop header
LB: loop body
LE: loop exit
PB: predicated region body
PF: predicated region fallthrough
CT: control target
= control target key end

     0   :  { %s1588_s21 = smov 0   ;;  %s1590_s22 = smov 0   ;;  %s2464_s0 = inlined_call_operand.vmem [shape: bf16[2,8,8,128], index: 0, kind: input, shape index: {}]   ;;  %s2465_s1 = inlined_call_operand.vmem [shape: f32[1,128], index: 1, kind: input, shape index: {}]   ;;  %s2466_s2 = inlined_call_operand.vmem [shape: f32[1,128], index: 2, kind: input, shape index: {}]   ;;  %s2467_s3 = inlined_call_operand.vmem [shape: f32[25,128], index: 3, kind: input, shape index: {}]   ;;  %s2468_s4 = inlined_call_operand.vmem [shape: f32[1,128], index: 4, kind: input, shape index: {}]   ;;  %s2469_s5 = inlined_call_operand.vmem [shape: bf16[2,8,8,128], index: 5, kind: output, shape index: {0}]   ;;  %s2470_s6 = inlined_call_operand.vmem [shape: f32[2,2,128], index: 6, kind: output, shape index: {1}]  }
   0x1   :  { %s1592_s23 = smov 0  }
   0x2 LB: > { %s29_s24 = sadd.s32 1, %s1545_s22  ;;  %p1413_p0 = scmp.ge.s32.totalorder %s1549_s23, 1  ;;  %s1549_s23 = sphi %s1592_s23, %s17_s23   ;;  %s1545_s22 = sphi %s1590_s22, %s2566_s22   ;;  %s1541_s21 = sphi %s1588_s21, %s2565_s21  }
   0x3   : > { %p31_p1 = scmp.ge.s32.totalorder %s29_s24, 2  ;;  %p269_p2 = scmp.lt.s32.totalorder %s1549_s23, 3 }
   0x5   : > { %s2568_s24 = smov (%p31_p1, %s29_s24), 0  ;;  %p270_p3 = pnand %p1413_p0, %p269_p2 }
   0x7   : > { %273 = sbr.rel (%p270_p3) target bundleno = 276 (0x114), region = 40 }
   0xc   : > { %v1551_v0 = vmov 0.0   ;;  %p325_p4 = scmp.lt.s32.totalorder %s1541_s21, 1  ;;  %v1491_v4 = vld [vmem:[%s2465_s1] ss:$0 sm:$0xff]  ;;  %v1659_v15 = vld [vmem:[%s2467_s3 + $0x8] sm:$0xff]  ;;  %v1686_v31 = vld [vmem:[%s2467_s3 + $0x10] sm:$0xff] }
   0xd   : > { %361 = vst [vmem:[#allocation2] sm:$0xff] %v1551_v0  ;;  %v1643_v7 = vld [vmem:[%s2467_s3] sm:$0xff]  ;;  %v1681_v30 = vperm.slane %v1659_v15, 2  ;;  %v1690_v33 = vperm.slane %v1659_v15, 3  ;;  %v1693_v34 = vperm.slane %v1659_v15, 4  ;;  %v1701_v38 = vperm.slane %v1659_v15, 7 }
   0xe   : > { %362 = vst [vmem:[#allocation2 + $0x8] sm:$0xf] %v1551_v0  ;;  %s2570_s21 = smov (!%p325_p4, %s1541_s21), 1  ;;  %v1650_v12 = vld [vmem:[%s2466_s2] ss:$0 sm:$0xff]  ;;  %v1653_v14 = vperm.slane %v1643_v7, 0 }
   0xf   : > { %363 = vst [vmem:[#allocation2 + $0x10] sm:$0xff] %v1551_v0  ;;  %s1421_s25 = sshll.u32 %s2570_s21, 5  ;;  %v1662_v18 = vperm.slane %v1643_v7, 1  ;;  %v1665_v19 = vperm.slane %v1643_v7, 2  ;;  %v1669_v23 = vperm.slane %v1643_v7, 7  ;;  %v1673_v24 = vperm.slane %v1643_v7, 5 }
  0x10   : > { %364 = vst [vmem:[#allocation2 + $0x18] sm:$0xf] %v1551_v0  ;;  %s332_s28 = scalar_lea.vmem %s2464_s0, %s1421_s25  ;;  %v1677_v28 = vperm.slane %v1643_v7, 6  ;;  %v1711_v43 = vperm.slane %v1686_v31, 0  ;;  %v1723_v49 = vperm.slane %v1686_v31, 1  ;;  %s2362_s26 = scalar_lea.vmem %s2469_s5, %s1421_s25  ;;  %vm1226_vm8 = vcmask 1040384  }
  0x11   : > { %366 = vst [vmem:[#allocation2 + $0xa0] sm:$0xff] %v1551_v0  ;;  %v1424_v1 = vld [vmem:[%s332_s28] sm:$0xff]   ;;  %v1459_v2 = vld [vmem:[%s332_s28 + $0x8] sm:$0xff]   ;;  %v1460_v6 = vld [vmem:[%s332_s28 + $0x10] sm:$0xff]   ;;  %s1418_s25 = sshll.u32 %s2570_s21, 1 }
  0x12   : > { %367 = vst [vmem:[#allocation2 + $0xa8] sm:$0xf] %v1551_v0  ;;  %v1425_v3 = vunpack.c.l.bf16 %v1424_v1  ;;  %v1426_v5 = vunpack.c.h.bf16 %v1424_v1  ;;  %v1429_v8 = vunpack.c.l.bf16 %v1459_v2  ;;  %v1430_v9 = vunpack.c.h.bf16 %v1459_v2  ;;  %v1461_v10 = vld [vmem:[%s332_s28 + $0x18] sm:$0xff]   ;;  %s360_s29 = scalar_lea.vmem %s2470_s6, %s1418_s25 }
  0x13   : > { %368 = vst [vmem:[#allocation2 + $0xb0] sm:$0xff] %v1551_v0  ;;  %v1433_v13 = vunpack.c.l.bf16 %v1460_v6  ;;  %v1434_v17 = vunpack.c.h.bf16 %v1460_v6  ;;  %v1437_v21 = vunpack.c.l.bf16 %v1461_v10  ;;  %v1438_v26 = vunpack.c.h.bf16 %v1461_v10 }
  0x14   : > { %369 = vst [vmem:[#allocation2 + $0xb8] sm:$0xf] %v1551_v0  ;;  %v414_v11 = vmul.f32 %v1491_v4, %v1425_v3  ;;  %v415_v16 = vmul.f32 %v1491_v4, %v1426_v5  ;;  %v416_v20 = vmul.f32 %v1491_v4, %v1429_v8  ;;  %v417_v25 = vmul.f32 %v1491_v4, %v1430_v9 }
  0x15   : > { %370 = vst [vmem:[#allocation2] sm:$0x3] %v1551_v0  ;;  %v641_v22 = vld [vmem:[#allocation2 + $0x2] sm:$0xff]  ;;  %v418_v32 = vmul.f32 %v1491_v4, %v1433_v13  ;;  %v419_v36 = vmul.f32 %v1491_v4, %v1434_v17  ;;  %v420_v40 = vmul.f32 %v1491_v4, %v1437_v21  ;;  %v421_v45 = vmul.f32 %v1491_v4, %v1438_v26 }
  0x16   : > { %372 = vst [vmem:[#allocation2 + $0x20] sm:$0x3] %v1551_v0  ;;  %v426_v29 = vadd.f32 %v1650_v12, %v414_v11  ;;  %v427_v35 = vadd.f32 %v1650_v12, %v415_v16  ;;  %v1697_v37 = vmul.f32 %v1665_v19, %v641_v22  ;;  %v1704_v39 = vadd.f32 %v1650_v12, %v416_v20 }
  0x17   : > { %373 = vst [vmem:[#allocation2 + $0x30] sm:$0x3] %v1551_v0  ;;  %v642_v27 = vld [vmem:[#allocation2 + $0x12] sm:$0xff]  ;;  %v1714_v44 = vadd.f32 %v1650_v12, %v417_v25  ;;  %v1726_v50 = vadd.f32 %v1650_v12, %v418_v32  ;;  %v1740_v56 = vadd.f32 %v1650_v12, %v419_v36  ;;  %v1749_v60 = vadd.f32 %v1650_v12, %v420_v40 }
  0x18   : > { %374 = vst [vmem:[#allocation2 + $0x40] sm:$0x3] %v1551_v0  ;;  %v1707_v42 = vmul.f32 %v1665_v19, %v642_v27  ;;  %v1717_v46 = vmul.f32 %v1669_v23, %v642_v27  ;;  %v1720_v48 = vmul.f32 %v1665_v19, %v426_v29  ;;  %v1731_v53 = vmul.f32 %v1669_v23, %v426_v29 }
  0x19   : > { %375 = vst [vmem:[#allocation2 + $0x50] sm:$0x3] %v1551_v0  ;;  %v1728_v52 = vld [vmem:[#allocation2 + $0xa2] sm:$0xff]  ;;  %v1734_v54 = vmul.f32 %v1693_v34, %v426_v29  ;;  %v1737_v55 = vmul.f32 %v1665_v19, %v427_v35  ;;  %v1745_v59 = vmul.f32 %v1669_v23, %v427_v35  ;;  %v1752_v61 = vmul.f32 %v1693_v34, %v427_v35 }
  0x1a   : > { %376 = vst [vmem:[#allocation2 + $0x60] sm:$0x3] %v1551_v0  ;;  %v1755_v62 = vmul.f32 %v1723_v49, %v427_v35  ;;  %v1760_v63 = vmul.f32 %v1665_v19, %v1726_v50  ;;  %v1770_v3 = vmul.f32 %v1723_v49, %v1728_v52  ;;  %v1773_v4 = vperm.slane %v1686_v31, 4 }
  0x1b   : > { %377 = vst [vmem:[#allocation2 + $0x70] sm:$0x3] %v1551_v0  ;;  %v1776_v5 = vperm.slane %v1686_v31, 5  ;;  %v1781_v8 = vmul.f32 %v1665_v19, %v1704_v39  ;;  %v1785_v9 = vmul.f32 %v1669_v23, %v1704_v39  ;;  %v1789_v10 = vmul.f32 %v1693_v34, %v1704_v39 }
  0x1c   : > { %378 = vst [vmem:[#allocation2 + $0x80] sm:$0x3] %v1551_v0  ;;  %v447_v41 = vld [vmem:[#allocation2] sm:$0xff]  ;;  %v1793_v11 = vmul.f32 %v1665_v19, %v1714_v44  ;;  %v1799_v17 = vmul.f32 %v1669_v23, %v1714_v44  ;;  %v1803_v20 = vmul.f32 %v1693_v34, %v1714_v44  ;;  %v1814_v26 = vperm.slane %v1643_v7, 3 }
  0x1d   : > { %379 = vst [vmem:[#allocation2 + $0x90] sm:$0x3] %v1551_v0  ;;  %v544_v51 = vld [vmem:[#allocation2 + $0x1] sm:$0xff]  ;;  %v460_v57 = vmul.f32 %v1653_v14, %v447_v41  ;;  %v1817_v27 = vperm.slane %v1659_v15, 0 }
  0x1e   : > { %384 = vst [vmem:[#allocation2 + $0x2a] sm:$0x3] %v1551_v0  ;;  %v1766_v1 = vmul.f32 %v1662_v18, %v544_v51 }
  0x1f   : > { %385 = vst [vmem:[#allocation2 + $0x3a] sm:$0x3] %v1551_v0 }
  0x20   : > { %386 = vst [vmem:[#allocation2 + $0x4a] sm:$0x3] %v1551_v0 }
  0x21   : > { %387 = vst [vmem:[#allocation2 + $0x5a] sm:$0x3] %v1551_v0 }
  0x22   : > { %388 = vst [vmem:[#allocation2 + $0x6a] sm:$0x3] %v1551_v0 }
  0x23   : > { %389 = vst [vmem:[#allocation2 + $0x7a] sm:$0x3] %v1551_v0 }
  0x24   : > { %2492 = vst [vmem:[#allocation3_spill] sm:$0xff] %v1643_v7 }
  0x25   : > { %390 = vst [vmem:[#allocation2 + $0x8a] sm:$0x3] %v1551_v0 }
  0x26   : > { %391 = vst [vmem:[#allocation2 + $0x9a] sm:$0x3] %v1551_v0 }
  0x27   : > { %371 = vst [vmem:[#allocation2 + $0x10] sm:$0x3] %v1551_v0 }
  0x28   : > { %2493 = vst [vmem:[#allocation4_spill] sm:$0xff] %v1659_v15 }
  0x29   : > { %380 = vst [vmem:[#allocation2 + $0xa0] sm:$0x3] %v1551_v0 }
  0x2a   : > { %2494 = vst [vmem:[#allocation5_spill] sm:$0xff] %v1669_v23 }
  0x2b   : > { %381 = vst [vmem:[#allocation2 + $0xb0] sm:$0x3] %v1551_v0 }
  0x2c   : > { %382 = vst [vmem:[#allocation2 + $0xa] sm:$0x3] %v1551_v0 }
  0x2d   : > { %383 = vst [vmem:[#allocation2 + $0x1a] sm:$0x3] %v1551_v0 }
  0x2e   : > { %392 = vst [vmem:[#allocation2 + $0xaa] sm:$0x3] %v1551_v0  ;;  %v448_v47 = vld [vmem:[#allocation2 + $0x10] sm:$0xff] }
  0x2f   : > { %393 = vst [vmem:[#allocation2 + $0xba] sm:$0x3] %v1551_v0  ;;  %v477_v58 = vmul.f32 %v1673_v24, %v448_v47  ;;  %v1763_v0 = vadd.f32 %v1650_v12, %v421_v45  ;;  %v545_v2 = vld [vmem:[#allocation2 + $0x11] sm:$0xff]  ;;  %v461_v12 = vmul.f32 %v1653_v14, %v448_v47 }
  0x30   : > { %2495 = vst [vmem:[#allocation6_spill] sm:$0xff] %v1714_v44  ;;  %v457_v6 = vld [vmem:[#allocation2 + $0xa0] sm:$0xff]  ;;  %v1807_v21 = vmul.f32 %v1662_v18, %v545_v2  ;;  %v1810_v22 = vmul.f32 %v1677_v28, %v545_v2 }
  0x31   : > { %435 = vst [vmem:[#allocation2 + $0x22] sm:$0xff] %v426_v29  ;;  %v485_v13 = vadd.f32 %v477_v58, %v460_v57  ;;  %v554_v16 = vld [vmem:[#allocation2 + $0xa1] sm:$0xff]  ;;  %v1823_v45 = vmul.f32 %v1701_v38, %v457_v6  ;;  %v1830_v57 = vmul.f32 %v1773_v4, %v457_v6  ;;  %v1845_v6 = vmul.f32 %v1669_v23, %v1726_v50 }
  0x32   : > { %2496 = vst [vmem:[#allocation7_spill] sm:$0xff] %v1720_v48  ;;  %v458_v29 = vld [vmem:[#allocation2 + $0xb0] sm:$0xff]  ;;  %v1827_v51 = vmul.f32 %v1711_v43, %v554_v16  ;;  %v1833_v58 = vmul.f32 %v1776_v5, %v554_v16 }
  0x33   : > { %2497 = vst [vmem:[#allocation8_spill] sm:$0xff] %v1726_v50  ;;  %v555_v32 = vld [vmem:[#allocation2 + $0xb1] sm:$0xff] }
  0x34   : > { %2498 = vst [vmem:[#allocation9_spill] sm:$0xff] %v1728_v52  ;;  %v739_v16 = vld [vmem:[#allocation2 + $0x13] sm:$0xff] }
  0x35   : > { %436 = vst [vmem:[#allocation2 + $0x32] sm:$0xff] %v427_v35 }
  0x36   : > { %2499 = vst [vmem:[#allocation10_spill] sm:$0xff] %v1737_v55  ;;  %v1841_v55 = vmul.f32 %v1776_v5, %v555_v32 }
  0x37   : > { %2500 = vst [vmem:[#allocation11_spill] sm:$0xff] %v1740_v56 }
  0x38   : > { %2501 = vst [vmem:[#allocation12_spill] sm:$0xff] %v1745_v59  ;;  %v449_v25 = vld [vmem:[#allocation2 + $0x20] sm:$0xff]  ;;  %v1838_v59 = vmul.f32 %v1773_v4, %v458_v29 }
  0x39   : > { %437 = vst [vmem:[#allocation2 + $0x42] sm:$0xff] %v1704_v39  ;;  %v462_v35 = vmul.f32 %v1653_v14, %v449_v25  ;;  %v478_v36 = vmul.f32 %v1673_v24, %v449_v25  ;;  %v494_v40 = vmul.f32 %v1681_v30, %v449_v25 }
  0x3a   : > { %2502 = vst [vmem:[#allocation13_spill] sm:$0xff] %v1749_v60 }
  0x3b   : > { %2503 = vst [vmem:[#allocation14_spill] sm:$0xff] %v1752_v61  ;;  %v486_v2 = vadd.f32 %v478_v36, %v461_v12 }
  0x3c   : > { %2504 = vst [vmem:[#allocation15_spill] sm:$0xff] %v1755_v62  ;;  %v450_v41 = vld [vmem:[#allocation2 + $0x30] sm:$0xff] }
  0x3d   : > { %438 = vst [vmem:[#allocation2 + $0x52] sm:$0xff] %v1714_v44  ;;  %v479_v47 = vmul.f32 %v1673_v24, %v450_v41  ;;  %v511_v25 = vmul.f32 %v1701_v38, %v450_v41  ;;  %v463_v12 = vmul.f32 %v1653_v14, %v450_v41 }
  0x3e   : > { %2505 = vst [vmem:[#allocation16_spill] sm:$0xff] %v1760_v63 }
  0x3f   : > { %2506 = vst [vmem:[#allocation17_spill] sm:$0xff] %v1770_v3  ;;  %v502_v3 = vadd.f32 %v494_v40, %v485_v13  ;;  %v1850_v40 = vmul.f32 %v1693_v34, %v1726_v50 }
  0x40   : > { %439 = vst [vmem:[#allocation2 + $0x62] sm:$0xff] %v1726_v50  ;;  %v548_v7 = vld [vmem:[#allocation2 + $0x41] sm:$0xff] }
  0x41   : > { %2507 = vst [vmem:[#allocation18_spill] sm:$0xff] %v1781_v8  ;;  %v519_v36 = vadd.f32 %v511_v25, %v502_v3  ;;  %v1864_v3 = vmul.f32 %v1814_v26, %v739_v16 }
  0x42   : > { %2508 = vst [vmem:[#allocation19_spill] sm:$0xff] %v1785_v9  ;;  %v487_v9 = vadd.f32 %v479_v47, %v462_v35  ;;  %v546_v35 = vld [vmem:[#allocation2 + $0x21] sm:$0xff] }
  0x43   : > { %2509 = vst [vmem:[#allocation20_spill] sm:$0xff] %v1789_v10  ;;  %v738_v10 = vld [vmem:[#allocation2 + $0x3] sm:$0xff] }
  0x44   : > { %2510 = vst [vmem:[#allocation21_spill] sm:$0xff] %v1793_v11  ;;  %v452_v52 = vld [vmem:[#allocation2 + $0x50] sm:$0xff]  ;;  %v1871_v11 = vmul.f32 %v1669_v23, %v1740_v56 }
  0x45   : > { %440 = vst [vmem:[#allocation2 + $0x72] sm:$0xff] %v1740_v56 }
  0x46   : > { %2511 = vst [vmem:[#allocation22_spill] sm:$0xff] %v1799_v17  ;;  %v495_v17 = vmul.f32 %v1681_v30, %v450_v41  ;;  %v1867_v41 = vmul.f32 %v1817_v27, %v739_v16  ;;  %v575_v16 = vmul.f32 %v1677_v28, %v546_v35 }
  0x47   : > { %2512 = vst [vmem:[#allocation23_spill] sm:$0xff] %v1803_v20  ;;  %v451_v20 = vld [vmem:[#allocation2 + $0x40] sm:$0xff] }
  0x48   : > { %441 = vst [vmem:[#allocation2 + $0x82] sm:$0xff] %v1749_v60  ;;  %v503_v13 = vadd.f32 %v495_v17, %v486_v2  ;;  %v480_v29 = vmul.f32 %v1673_v24, %v451_v20  ;;  %v496_v47 = vmul.f32 %v1681_v30, %v451_v20  ;;  %v512_v32 = vmul.f32 %v1701_v38, %v451_v20  ;;  %v547_v2 = vld [vmem:[#allocation2 + $0x31] sm:$0xff] }
  0x49   : > { %442 = vst [vmem:[#allocation2 + $0x92] sm:$0xff] %v1763_v0  ;;  %v528_v48 = vmul.f32 %v1773_v4, %v451_v20  ;;  %v1861_v17 = vmul.f32 %v1814_v26, %v738_v10  ;;  %v497_v10 = vmul.f32 %v1681_v30, %v452_v52 }
  0x4a   : > { %2513 = vst [vmem:[#allocation24_spill] sm:$0xff] %v1814_v26  ;;  %v504_v25 = vadd.f32 %v496_v47, %v487_v9  ;;  %v488_v8 = vadd.f32 %v480_v29, %v463_v12  ;;  %v1877_v26 = vmul.f32 %v1693_v34, %v1740_v56  ;;  %v1885_v47 = vmul.f32 %v1662_v18, %v547_v2 }
  0x4b   : > { %2514 = vst [vmem:[#allocation25_spill] sm:$0xff] %v1817_v27  ;;  %v536_v50 = vadd.f32 %v528_v48, %v519_v36  ;;  %v513_v48 = vmul.f32 %v1701_v38, %v452_v52  ;;  %v591_v36 = vmul.f32 %v1690_v33, %v546_v35  ;;  %v576_v12 = vmul.f32 %v1677_v28, %v547_v2  ;;  %v549_v27 = vld [vmem:[#allocation2 + $0x51] sm:$0xff] }
  0x4c   : > { %2515 = vst [vmem:[#allocation26_spill] sm:$0xff] %v1827_v51  ;;  %v592_v29 = vmul.f32 %v1690_v33, %v547_v2 }
  0x4d   : > { %2516 = vst [vmem:[#allocation27_spill] sm:$0xff] %v1833_v58  ;;  %v565_v9 = vadd.f32 %v1766_v1, %v536_v50  ;;  %v453_v50 = vld [vmem:[#allocation2 + $0x60] sm:$0xff]  ;;  %v608_v1 = vmul.f32 %v1711_v43, %v547_v2  ;;  %v609_v2 = vmul.f32 %v1711_v43, %v548_v7 }
  0x4e   : > { %2517 = vst [vmem:[#allocation28_spill] sm:$0xff] %v1841_v55  ;;  %v454_v55 = vld [vmem:[#allocation2 + $0x70] sm:$0xff] }
  0x4f   : > { %2518 = vst [vmem:[#allocation29_spill] sm:$0xff] %v1845_v6  ;;  %v1858_v6 = vmul.f32 %v1665_v19, %v1740_v56  ;;  %v559_v19 = vmul.f32 %v1662_v18, %v546_v35  ;;  %v1896_v35 = vmul.f32 %v1677_v28, %v548_v7  ;;  %v483_v44 = vmul.f32 %v1673_v24, %v454_v55  ;;  %v455_v62 = vld [vmem:[#allocation2 + $0x80] sm:$0xff] }
  0x50   : > { %2519 = vst [vmem:[#allocation30_spill] sm:$0xff] %v1850_v40  ;;  %v520_v40 = vadd.f32 %v512_v32, %v503_v13  ;;  %v529_v13 = vmul.f32 %v1773_v4, %v452_v52  ;;  %v464_v32 = vmul.f32 %v1653_v14, %v451_v20  ;;  %v514_v20 = vmul.f32 %v1701_v38, %v453_v50 }
  0x51   : > { %2520 = vst [vmem:[#allocation31_spill] sm:$0xff] %v1858_v6  ;;  %v1893_v6 = vmul.f32 %v1662_v18, %v548_v7 }
  0x52   : > { %2521 = vst [vmem:[#allocation32_spill] sm:$0xff] %v1861_v17  ;;  %v537_v56 = vadd.f32 %v529_v13, %v520_v40  ;;  %v593_v40 = vmul.f32 %v1690_v33, %v548_v7  ;;  %v482_v13 = vmul.f32 %v1673_v24, %v453_v50  ;;  %v466_v17 = vmul.f32 %v1653_v14, %v453_v50 }
  0x53   : > { %2522 = vst [vmem:[#allocation33_spill] sm:$0xff] %v1864_v3  ;;  %v582_v3 = vadd.f32 %v1810_v22, %v565_v9  ;;  %v498_v22 = vmul.f32 %v1681_v30, %v453_v50 }
  0x54   : > { %2523 = vst [vmem:[#allocation34_spill] sm:$0xff] %v1867_v41  ;;  %v505_v41 = vadd.f32 %v497_v10, %v488_v8  ;;  %v566_v63 = vadd.f32 %v1807_v21, %v537_v56  ;;  %v625_v8 = vmul.f32 %v1776_v5, %v548_v7  ;;  %v1909_v56 = vmul.f32 %v1662_v18, %v549_v27 }
  0x55   : > { %2524 = vst [vmem:[#allocation35_spill] sm:$0xff] %v1871_v11  ;;  %v481_v11 = vmul.f32 %v1673_v24, %v452_v52  ;;  %v578_v21 = vmul.f32 %v1677_v28, %v549_v27  ;;  %v599_v51 = vadd.f32 %v591_v36, %v582_v3  ;;  %v467_v7 = vmul.f32 %v1653_v14, %v454_v55 }
  0x56   : > { %2525 = vst [vmem:[#allocation36_spill] sm:$0xff] %v1877_v26  ;;  %v521_v26 = vadd.f32 %v513_v48, %v504_v25  ;;  %v530_v25 = vmul.f32 %v1773_v4, %v453_v50  ;;  %v465_v48 = vmul.f32 %v1653_v14, %v452_v52  ;;  %v522_v58 = vadd.f32 %v514_v20, %v505_v41  ;;  %v550_v41 = vld [vmem:[#allocation2 + $0x61] sm:$0xff] }
  0x57   : > { %v489_v10 = vadd.f32 %v481_v11, %v464_v32  ;;  %v583_v15 = vadd.f32 %v575_v16, %v566_v63  ;;  %v499_v11 = vmul.f32 %v1681_v30, %v454_v55  ;;  %v594_v32 = vmul.f32 %v1690_v33, %v549_v27 }
  0x58   : > { %v538_v9 = vadd.f32 %v530_v25, %v521_v26  ;;  %v490_v61 = vadd.f32 %v482_v13, %v465_v48  ;;  %v531_v26 = vmul.f32 %v1773_v4, %v454_v55  ;;  %v515_v50 = vmul.f32 %v1701_v38, %v454_v55 }
  0x59   : > { %v506_v25 = vadd.f32 %v498_v22, %v489_v10  ;;  %v610_v3 = vmul.f32 %v1711_v43, %v549_v27  ;;  %v626_v63 = vmul.f32 %v1776_v5, %v549_v27  ;;  %v484_v16 = vmul.f32 %v1673_v24, %v455_v62  ;;  %v551_v10 = vld [vmem:[#allocation2 + $0x71] sm:$0xff] }
  0x5a   : > { %v567_v52 = vadd.f32 %v559_v19, %v538_v9  ;;  %v539_v19 = vadd.f32 %v531_v26, %v522_v58  ;;  %v616_v36 = vadd.f32 %v608_v1, %v599_v51  ;;  %v600_v14 = vadd.f32 %v592_v29, %v583_v15 }
  0x5b   : > { %v491_v20 = vadd.f32 %v483_v44, %v466_v17  ;;  %v500_v48 = vmul.f32 %v1681_v30, %v455_v62  ;;  %v492_v9 = vadd.f32 %v484_v16, %v467_v7  ;;  %v507_v60 = vadd.f32 %v499_v11, %v490_v61  ;;  %v552_v11 = vld [vmem:[#allocation2 + $0x81] sm:$0xff] }
  0x5c   : > { %v584_v23 = vadd.f32 %v576_v12, %v567_v52  ;;  %v516_v12 = vmul.f32 %v1701_v38, %v455_v62  ;;  %v563_v55 = vmul.f32 %v1662_v18, %v550_v41  ;;  %v523_v52 = vadd.f32 %v515_v50, %v506_v25 }
  0x5d   : > { %v508_v22 = vadd.f32 %v500_v48, %v491_v20  ;;  %v532_v27 = vmul.f32 %v1773_v4, %v455_v62  ;;  %v579_v58 = vmul.f32 %v1677_v28, %v550_v41  ;;  %v595_v24 = vmul.f32 %v1690_v33, %v550_v41 }
  0x5e   : > { %v601_v13 = vadd.f32 %v593_v40, %v584_v23  ;;  %v611_v15 = vmul.f32 %v1711_v43, %v550_v41  ;;  %v568_v44 = vadd.f32 %v1885_v47, %v539_v19  ;;  %v456_v23 = vld [vmem:[#allocation2 + $0x90] sm:$0xff]  ;;  %v617_v51 = vadd.f32 %v609_v2, %v600_v14 }
  0x5f   : > { %v627_v61 = vmul.f32 %v1776_v5, %v550_v41  ;;  %v524_v17 = vadd.f32 %v516_v12, %v507_v60  ;;  %v540_v29 = vadd.f32 %v532_v27, %v523_v52  ;;  %v633_v1 = vadd.f32 %v625_v8, %v616_v36 }
  0x60   : > { %v618_v40 = vadd.f32 %v610_v3, %v601_v13  ;;  %v564_v7 = vmul.f32 %v1662_v18, %v551_v10  ;;  %v580_v62 = vmul.f32 %v1677_v28, %v551_v10  ;;  %v501_v25 = vmul.f32 %v1681_v30, %v456_v23 }
  0x61   : > { %v569_v26 = vadd.f32 %v1893_v6, %v540_v29  ;;  %v517_v50 = vmul.f32 %v1701_v38, %v456_v23  ;;  %v533_v47 = vmul.f32 %v1773_v4, %v456_v23  ;;  %v585_v2 = vadd.f32 %v1896_v35, %v568_v44  ;;  %v553_v38 = vld [vmem:[#allocation2 + $0x91] sm:$0xff] }
  0x62   : > { %v596_v60 = vmul.f32 %v1690_v33, %v551_v10  ;;  %v612_v8 = vmul.f32 %v1711_v43, %v551_v10  ;;  %v628_v3 = vmul.f32 %v1776_v5, %v551_v10  ;;  %v634_v18 = vadd.f32 %v626_v63, %v617_v51 }
  0x63   : > { %v509_v41 = vadd.f32 %v501_v25, %v492_v9  ;;  %v525_v19 = vadd.f32 %v517_v50, %v508_v22  ;;  %v541_v16 = vadd.f32 %v533_v47, %v524_v17  ;;  %v581_v6 = vmul.f32 %v1677_v28, %v552_v11  ;;  %v2528_v17 = vld [vmem:[#allocation14_spill] sm:$0xff]  ;;  %v1985_v50 = vld [vmem:[#allocation2 + $0x23] sm:$0xff] }
  0x64   : > { %v586_v36 = vadd.f32 %v578_v21, %v569_v26  ;;  %v597_v30 = vmul.f32 %v1690_v33, %v552_v11  ;;  %v1945_v4 = vmul.f32 %v1693_v34, %v1763_v0  ;;  %v1947_v35 = vadd.f32 %v627_v61, %v618_v40  ;;  %v2530_v40 = vld [vmem:[#allocation6_spill] sm:$0xff]  ;;  %v2531_v47 = vld [vmem:[#allocation4_spill] sm:$0xff] }
  0x65   : > { %v570_v14 = vadd.f32 %v1909_v56, %v541_v16  ;;  %v526_v20 = vadd.f32 %v1823_v45, %v509_v41  ;;  %v542_v63 = vadd.f32 %v1830_v57, %v525_v19  ;;  %v602_v48 = vadd.f32 %v594_v32, %v585_v2  ;;  %v2533_v41 = vld [vmem:[#allocation27_spill] sm:$0xff] }
  0x66   : > { %v613_v13 = vmul.f32 %v1711_v43, %v552_v11  ;;  %v629_v28 = vmul.f32 %v1776_v5, %v552_v11  ;;  %v662_v21 = vadd.f32 %v1697_v37, %v633_v1  ;;  %v598_v12 = vmul.f32 %v1690_v33, %v553_v38  ;;  %v2529_v1 = vld [vmem:[#allocation15_spill] sm:$0xff] }
  0x67   : > { %v587_v9 = vadd.f32 %v579_v58, %v570_v14  ;;  %v543_v10 = vadd.f32 %v1838_v59, %v526_v20  ;;  %v571_v22 = vadd.f32 %v563_v55, %v542_v63  ;;  %v603_v52 = vadd.f32 %v595_v24, %v586_v36  ;;  %v2526_v24 = vld [vmem:[#allocation13_spill] sm:$0xff] }
  0x68   : > { %v1958_v56 = vperm.slane %v1686_v31, 6  ;;  %v663_v45 = vadd.f32 %v1707_v42, %v634_v18  ;;  %v679_v57 = vadd.f32 %v1717_v46, %v662_v21  ;;  %v614_v27 = vmul.f32 %v1711_v43, %v553_v38  ;;  %v2527_v42 = vld [vmem:[#allocation5_spill] sm:$0xff]  ;;  %v2532_v18 = vld [vmem:[#allocation26_spill] sm:$0xff]  ;;  %v2536_v21 = vld [vmem:[#allocation16_spill] sm:$0xff] }
  0x69   : > { %v604_v32 = vadd.f32 %v596_v60, %v587_v9  ;;  %v572_v44 = vadd.f32 %v564_v7, %v543_v10  ;;  %v588_v23 = vadd.f32 %v580_v62, %v571_v22  ;;  %v706_v59 = vmul.f32 %v1723_v49, %v1704_v39  ;;  %v1993_v36 = vld [vmem:[#allocation2 + $0x33] sm:$0xff]  ;;  %v2005_v9 = vld [vmem:[#allocation2 + $0x43] sm:$0xff] }
  0x6a   : > { %v680_v37 = vadd.f32 %v1731_v53, %v663_v45  ;;  %v696_v33 = vadd.f32 %v1734_v54, %v679_v57  ;;  %v722_v55 = vmul.f32 %v1958_v56, %v1704_v39  ;;  %v619_v58 = vadd.f32 %v611_v15, %v602_v48  ;;  %v2535_v48 = vld [vmem:[#allocation28_spill] sm:$0xff]  ;;  %v2539_v10 = vld [vmem:[#allocation34_spill] sm:$0xff] }
  0x6b   : > { %v1971_v51 = vmul.f32 %v2527_v42, %v2526_v24  ;;  %v589_v46 = vadd.f32 %v581_v6, %v572_v44  ;;  %v605_v61 = vadd.f32 %v597_v30, %v588_v23  ;;  %v620_v43 = vadd.f32 %v612_v8, %v603_v52  ;;  %v2534_v30 = vld [vmem:[#allocation32_spill] sm:$0xff] }
  0x6c   : > { %v697_v29 = vadd.f32 %v2528_v17, %v680_v37  ;;  %v713_v53 = vadd.f32 %v2529_v1, %v696_v33  ;;  %v723_v54 = vmul.f32 %v1958_v56, %v2530_v40  ;;  %v1979_v7 = vmul.f32 %v1693_v34, %v2526_v24  ;;  %v2027_v37 = vld [vmem:[#allocation2 + $0x53] sm:$0xff] }
  0x6d   : > { %v621_v39 = vadd.f32 %v613_v13, %v604_v32  ;;  %v606_v15 = vadd.f32 %v598_v12, %v589_v46  ;;  %v622_v62 = vadd.f32 %v614_v27, %v605_v61  ;;  %v1983_v11 = vmul.f32 %v1723_v49, %v2526_v24  ;;  %v2540_v27 = vld [vmem:[#allocation31_spill] sm:$0xff]  ;;  %v2542_v46 = vld [vmem:[#allocation18_spill] sm:$0xff]  ;;  %v2544_v17 = vld [vmem:[#allocation9_spill] sm:$0xff] }
  0x6e   : > { %v714_v26 = vadd.f32 %v706_v59, %v697_v29  ;;  %v730_v25 = vadd.f32 %v722_v55, %v713_v53  ;;  %v1988_v2 = vperm.slane %v2531_v47, 5  ;;  %v636_v60 = vadd.f32 %v628_v3, %v619_v58  ;;  %v2541_v58 = vld [vmem:[#allocation3_spill] sm:$0xff] }
  0x6f   : > { %v630_v8 = vmul.f32 %v1776_v5, %v553_v38  ;;  %v623_v34 = vadd.f32 %v2532_v18, %v606_v15  ;;  %v639_v19 = vadd.f32 %v2533_v41, %v622_v62  ;;  %v637_v16 = vadd.f32 %v629_v28, %v620_v43  ;;  %v2537_v5 = vld [vmem:[#allocation25_spill] sm:$0xff]  ;;  %v835_v53 = vld [vmem:[#allocation2 + $0x4] sm:$0xff]  ;;  %v2546_v41 = vld [vmem:[#allocation10_spill] sm:$0xff] }
  0x70   : > { %v731_v6 = vadd.f32 %v723_v54, %v714_v26  ;;  %v759_v14 = vadd.f32 %v2534_v30, %v730_v25  ;;  %v1997_v20 = vperm.slane %v1686_v31, 2  ;;  %v769_v38 = vmul.f32 %v2537_v5, %v1985_v50  ;;  %v2538_v28 = vld [vmem:[#allocation33_spill] sm:$0xff]  ;;  %v2545_v18 = vld [vmem:[#allocation7_spill] sm:$0xff] }
  0x71   : > { %v638_v63 = vadd.f32 %v630_v8, %v621_v39  ;;  %v640_v13 = vadd.f32 %v2535_v48, %v623_v34  ;;  %v2001_v3 = vadd.f32 %v2536_v21, %v639_v19  ;;  %v785_v52 = vmul.f32 %v1988_v2, %v1985_v50  ;;  %v836_v25 = vld [vmem:[#allocation2 + $0x14] sm:$0xff]  ;;  %v2547_v48 = vld [vmem:[#allocation12_spill] sm:$0xff]  ;;  %v2548_v21 = vld [vmem:[#allocation19_spill] sm:$0xff] }
  0x72   : > { %v760_v12 = vadd.f32 %v2538_v28, %v731_v6  ;;  %v776_v22 = vadd.f32 %v2539_v10, %v759_v14  ;;  %v2012_v45 = vperm.slane %v1686_v31, 7  ;;  %v2016_v57 = vmul.f32 %v1723_v49, %v1763_v0  ;;  %v2549_v28 = vld [vmem:[#allocation8_spill] sm:$0xff] }
  0x73   : > { %v2020_v32 = vmul.f32 %v1958_v56, %v1763_v0  ;;  %v2023_v44 = vadd.f32 %v2540_v27, %v640_v13  ;;  %v786_v23 = vmul.f32 %v1988_v2, %v1993_v36  ;;  %v802_v55 = vmul.f32 %v1997_v20, %v1993_v36  ;;  %v2543_v0 = vld [vmem:[#allocation21_spill] sm:$0xff]  ;;  %v2080_v27 = vld [vmem:[#allocation2 + $0x44] sm:$0xff] }
  0x74   : > { %v777_v33 = vadd.f32 %v769_v38, %v760_v12  ;;  %v793_v59 = vadd.f32 %v785_v52, %v776_v22  ;;  %v2032_v42 = vperm.slane %v2541_v58, 4  ;;  %v2035_v61 = vadd.f32 %v2542_v46, %v637_v16  ;;  %v2071_v12 = vld [vmem:[#allocation2 + $0x34] sm:$0xff]  ;;  %v2553_v58 = vld [vmem:[#allocation11_spill] sm:$0xff] }
  0x75   : > { %v2038_v43 = vadd.f32 %v2543_v0, %v638_v63  ;;  %v2042_v29 = vmul.f32 %v1958_v56, %v2544_v17  ;;  %v803_v1 = vmul.f32 %v1997_v20, %v2005_v9  ;;  %v819_v15 = vmul.f32 %v2012_v45, %v2005_v9  ;;  %v2063_v63 = vld [vmem:[#allocation2 + $0x24] sm:$0xff]  ;;  %v2078_v52 = vld [vmem:[%s2467_s3 + $0x18] ss:$0 sm:$0xff] }
  0x76   : > { %v794_v54 = vadd.f32 %v786_v23, %v777_v33  ;;  %v810_v39 = vadd.f32 %v802_v55, %v793_v59  ;;  %v2049_v62 = vperm.slane %v2531_v47, 1  ;;  %v820_v26 = vmul.f32 %v2012_v45, %v2027_v37  ;;  %2550 = vst [vmem:[#allocation13_spill] sm:$0xff] %v2078_v52  ;;  %v2551_v23 = vld [vmem:[#allocation20_spill] sm:$0xff]  ;;  %v2552_v33 = vld [vmem:[#allocation23_spill] sm:$0xff] }
  0x77   : > { %v2054_v8 = vperm.slane %v2531_v47, 6  ;;  %v664_v34 = vadd.f32 %v2545_v18, %v1947_v35  ;;  %v665_v19 = vadd.f32 %v2546_v41, %v636_v60  ;;  %v848_v30 = vmul.f32 %v2032_v42, %v835_v53 }
  0x78   : > { %v811_v16 = vadd.f32 %v803_v1, %v794_v54  ;;  %v827_v6 = vadd.f32 %v819_v15, %v810_v39  ;;  %v2061_v14 = vperm.slane %v1686_v31, 3  ;;  %v707_v47 = vmul.f32 %v1723_v49, %v2530_v40  ;;  %v2092_v54 = vld [vmem:[#allocation2 + $0x54] sm:$0xff] }
  0x79   : > { %v681_v13 = vadd.f32 %v2547_v48, %v664_v34  ;;  %v682_v38 = vadd.f32 %v2548_v21, %v665_v19  ;;  %v708_v35 = vmul.f32 %v1723_v49, %v2549_v28  ;;  %v849_v10 = vmul.f32 %v2032_v42, %v836_v25 }
  0x7a   : > { %v828_v60 = vadd.f32 %v820_v26, %v811_v16  ;;  %v856_v22 = vadd.f32 %v848_v30, %v827_v6  ;;  %v865_v31 = vmul.f32 %v2049_v62, %v836_v25  ;;  %v724_v55 = vmul.f32 %v1958_v56, %v2549_v28  ;;  %v2554_v30 = vld [vmem:[#allocation24_spill] sm:$0xff]  ;;  %v2111_v28 = vld [vmem:[%s2468_s4] ss:$0 sm:$0xff] }
  0x7b   : > { %v698_v40 = vadd.f32 %v2551_v23, %v681_v13  ;;  %v699_v59 = vadd.f32 %v2552_v33, %v682_v38  ;;  %v725_v46 = vmul.f32 %v1958_v56, %v2553_v58  ;;  %v866_v17 = vmul.f32 %v2049_v62, %v2063_v63 }
  0x7c   : > { %v857_v0 = vadd.f32 %v849_v10, %v828_v60  ;;  %v873_v1 = vadd.f32 %v865_v31, %v856_v22  ;;  %v882_v53 = vmul.f32 %v2054_v8, %v2063_v63  ;;  %v883_v39 = vmul.f32 %v2054_v8, %v2071_v12 }
  0x7d   : > { %v899_v15 = vmul.f32 %v2061_v14, %v2071_v12  ;;  %v715_v26 = vadd.f32 %v707_v47, %v698_v40  ;;  %v716_v25 = vadd.f32 %v708_v35, %v699_v59  ;;  %v900_v41 = vmul.f32 %v2061_v14, %v2080_v27  ;;  %v2113_v35 = vld [vmem:[#allocation2 + $0x63] sm:$0xff] }
  0x7e   : > { %v874_v18 = vadd.f32 %v866_v17, %v857_v0  ;;  %v890_v34 = vadd.f32 %v882_v53, %v873_v1  ;;  %v916_v19 = vmul.f32 %v2078_v52, %v2080_v27  ;;  %v753_v48 = vmul.f32 %v2554_v30, %v1985_v50  ;;  %v2555_v0 = vld [vmem:[#allocation22_spill] sm:$0xff] }
  0x7f   : > { %v732_v16 = vadd.f32 %v724_v55, %v715_v26  ;;  %v733_v6 = vadd.f32 %v725_v46, %v716_v25  ;;  %v754_v13 = vmul.f32 %v2554_v30, %v1993_v36  ;;  %v917_v47 = vmul.f32 %v2078_v52, %v2092_v54 }
  0x80   : > { %v891_v21 = vadd.f32 %v883_v39, %v874_v18  ;;  %v907_v38 = vadd.f32 %v899_v15, %v890_v34  ;;  %v770_v60 = vmul.f32 %v2537_v5, %v1993_v36  ;;  %v771_v22 = vmul.f32 %v2537_v5, %v2005_v9  ;;  %v2132_v39 = vld [vmem:[#allocation2 + $0x73] sm:$0xff] }
  0x81   : > { %v761_v10 = vadd.f32 %v753_v48, %v732_v16  ;;  %v762_v50 = vadd.f32 %v754_v13, %v733_v6  ;;  %v787_v31 = vmul.f32 %v1988_v2, %v2005_v9  ;;  %v788_v33 = vmul.f32 %v1988_v2, %v2027_v37  ;;  %v2556_v15 = vld [vmem:[#allocation29_spill] sm:$0xff]  ;;  %v2557_v16 = vld [vmem:[#allocation30_spill] sm:$0xff]  ;;  %v2558_v13 = vld [vmem:[#allocation36_spill] sm:$0xff] }
  0x82   : > { %v908_v23 = vadd.f32 %v900_v41, %v891_v21  ;;  %v924_v40 = vadd.f32 %v916_v19, %v907_v38  ;;  %v804_v59 = vmul.f32 %v1997_v20, %v2027_v37  ;;  %v805_v36 = vmul.f32 %v1997_v20, %v2113_v35  ;;  %v652_v18 = vld [vmem:[#allocation2 + $0xb2] sm:$0xff] }
  0x83   : > { %v778_v55 = vadd.f32 %v770_v60, %v761_v10  ;;  %v779_v46 = vadd.f32 %v771_v22, %v762_v50  ;;  %v683_v17 = vadd.f32 %v2555_v0, %v2035_v61  ;;  %v684_v26 = vadd.f32 %v2556_v15, %v2038_v43 }
  0x84   : > { %v925_v1 = vadd.f32 %v917_v47, %v908_v23  ;;  %v2130_v53 = vadd.f32 %v2111_v28, %v924_v40  ;;  %v709_v25 = vmul.f32 %v1723_v49, %v2553_v58  ;;  %v821_v19 = vmul.f32 %v2012_v45, %v2113_v35 }
  0x85   : > { %v795_v34 = vadd.f32 %v787_v31, %v778_v55  ;;  %v796_v41 = vadd.f32 %v788_v33, %v779_v46  ;;  %v700_v61 = vadd.f32 %v2557_v16, %v683_v17  ;;  %v701_v21 = vadd.f32 %v2558_v13, %v684_v26 }
  0x86   : > { %v2142_v6 = vadd.f32 %v2111_v28, %v925_v1  ;;  %v2145_v48 = vmul.f32 0.70710677, %v2130_v53  ;;  %v726_v43 = vmul.f32 %v1958_v56, %v2526_v24  ;;  %v822_v38 = vmul.f32 %v2012_v45, %v2132_v39 }
  0x87   : > { %v812_v49 = vadd.f32 %v804_v59, %v795_v34  ;;  %v813_v58 = vadd.f32 %v805_v36, %v796_v41  ;;  %v717_v47 = vadd.f32 %v709_v25, %v700_v61  ;;  %v2153_v60 = vmul.f32 %v1958_v56, %v652_v18 }
  0x88   : > { %v2156_v10 = vmul.f32 0.70710677, %v2142_v6  ;;  %v976_v50 = vand.u32 2147483647, %v2145_v48  ;;  %v850_v22 = vmul.f32 %v2032_v42, %v2063_v63  ;;  %v851_v24 = vmul.f32 %v2032_v42, %v2071_v12 }
  0x89   : > { %v829_v31 = vadd.f32 %v821_v19, %v812_v49  ;;  %v830_v23 = vadd.f32 %v822_v38, %v813_v58  ;;  %v718_v40 = vadd.f32 %v1983_v11, %v701_v21  ;;  %v867_v59 = vmul.f32 %v2049_v62, %v2071_v12  ;;  %v2174_v11 = vld [vmem:[#allocation2 + $0x64] sm:$0xff] }
  0x8a   : > { %v2165_v33 = vand.u32 2147483647, %v2156_v10  ;;  %v984_v56 = vmul.f32 0.3275911, %v976_v50  ;;  %v734_v55 = vadd.f32 %v726_v43, %v717_v47  ;;  %v868_v63 = vmul.f32 %v2049_v62, %v2080_v27 }
  0x8b   : > { %v858_v46 = vadd.f32 %v850_v22, %v829_v31  ;;  %v859_v36 = vadd.f32 %v851_v24, %v830_v23  ;;  %v755_v0 = vmul.f32 %v2554_v30, %v2005_v9  ;;  %v735_v15 = vadd.f32 %v2020_v32, %v718_v40  ;;  %v2183_v9 = vld [vmem:[#allocation2 + $0x74] sm:$0xff]  ;;  %v2197_v23 = vld [vmem:[#allocation2 + $0x83] sm:$0xff] }
  0x8c   : > { %v985_v17 = vmul.f32 0.3275911, %v2165_v33  ;;  %v992_v1 = vadd.f32 1.0, %v984_v56  ;;  %v756_v26 = vmul.f32 %v2554_v30, %v2027_v37  ;;  %v884_v18 = vmul.f32 %v2054_v8, %v2080_v27 }
  0x8d   : > { %v875_v12 = vadd.f32 %v867_v59, %v858_v46  ;;  %v876_v25 = vadd.f32 %v868_v63, %v859_v36  ;;  %v885_v34 = vmul.f32 %v2054_v8, %v2092_v54  ;;  %v763_v19 = vadd.f32 %v755_v0, %v734_v55  ;;  %v2206_v63 = vld [vmem:[#allocation2 + $0x93] sm:$0xff] }
  0x8e   : > { %v993_v41 = vadd.f32 1.0, %v985_v17  ;;  %1495 = vrcp.f32 %v992_v1  ;;  %v764_v16 = vadd.f32 %v756_v26, %v735_v15  ;;  %v901_v32 = vmul.f32 %v2061_v14, %v2092_v54 }
  0x8f   : > { %v892_v61 = vadd.f32 %v884_v18, %v875_v12  ;;  %v893_v13 = vadd.f32 %v885_v34, %v876_v25  ;;  %v902_v21 = vmul.f32 %v2061_v14, %v2174_v11  ;;  %v918_v43 = vmul.f32 %v2078_v52, %v2174_v11 }
  0x90   : > { %1497 = vrcp.f32 %v993_v41  ;;  %v772_v49 = vmul.f32 %v2537_v5, %v2027_v37  ;;  %v773_v58 = vmul.f32 %v2537_v5, %v2113_v35  ;;  %v1104_v38 = vsub.f32 0.0, %v976_v50 }
  0x91   : > { %v909_v47 = vadd.f32 %v901_v32, %v892_v61  ;;  %v910_v22 = vadd.f32 %v902_v21, %v893_v13  ;;  %v919_v31 = vmul.f32 %v2078_v52, %v2183_v9  ;;  %v789_v56 = vmul.f32 %v1988_v2, %v2113_v35 }
  0x92   : > { %v780_v24 = vadd.f32 %v772_v49, %v763_v19  ;;  %v781_v40 = vadd.f32 %v773_v58, %v764_v16  ;;  %v790_v59 = vmul.f32 %v1988_v2, %v2132_v39  ;;  %v2204_v37 = vmul.f32 0.5, %v2130_v53 }
  0x93   : > { %v926_v55 = vadd.f32 %v918_v43, %v909_v47  ;;  %v927_v46 = vadd.f32 %v919_v31, %v910_v22  ;;  %v806_v15 = vmul.f32 %v1997_v20, %v2132_v39  ;;  %v807_v26 = vmul.f32 %v1997_v20, %v2197_v23 }
  0x94   : > { %v1496_v36 = vpop.eup %1495  ;;  %v797_v0 = vadd.f32 %v789_v56, %v780_v24  ;;  %v798_v17 = vadd.f32 %v790_v59, %v781_v40  ;;  %v2213_v12 = vmul.f32 0.5, %v2142_v6  ;;  %v1105_v19 = vsub.f32 0.0, %v2165_v33 }
  0x95   : > { %v1008_v25 = vmul.f32 %v1496_v36, %v992_v1  ;;  %v938_v53 = vadd.f32 %v2111_v28, %v926_v55  ;;  %v2217_v18 = vadd.f32 %v2111_v28, %v927_v46  ;;  %v1112_v16 = vmul.f32 %v1104_v38, %v976_v50 }
  0x96   : > { %v1498_v34 = vpop.eup %1497  ;;  %v814_v61 = vadd.f32 %v806_v15, %v797_v0  ;;  %v815_v13 = vadd.f32 %v807_v26, %v798_v17  ;;  %v823_v43 = vmul.f32 %v2012_v45, %v2197_v23  ;;  %v824_v6 = vmul.f32 %v2012_v45, %v2206_v63 }
  0x97   : > { %v1009_v32 = vmul.f32 %v1498_v34, %v993_v41  ;;  %v1016_v21 = vsub.f32 2.0, %v1008_v25  ;;  %vm960_vm0 = vcmp.ge.f32.partialorder %v2145_v48, 0.0  ;;  %vm961_vm1 = vcmp.ge.f32.partialorder %v2156_v10, 0.0 }
  0x98   : > { %v2226_v1 = vmul.f32 0.70710677, %v938_v53  ;;  %v2229_v49 = vmul.f32 0.70710677, %v2217_v18  ;;  %v831_v41 = vadd.f32 %v823_v43, %v814_v61  ;;  %v832_v38 = vadd.f32 %v824_v6, %v815_v13  ;;  %v2260_v43 = vld [vmem:[#allocation2 + $0x84] sm:$0xff] }
  0x99   : > { %v1017_v50 = vsub.f32 2.0, %v1009_v32  ;;  %v2231_v58 = vmul.f32 %v1496_v36, %v1016_v21  ;;  %v1113_v47 = vmul.f32 %v1105_v19, %v2165_v33  ;;  %v1120_v22 = vmul.f32 1.442695, %v1112_v16 }
  0x9a   : > { %v2235_v31 = vand.u32 2147483647, %v2226_v1  ;;  %v2238_v24 = vand.u32 2147483647, %v2229_v49  ;;  %v852_v59 = vmul.f32 %v2032_v42, %v2080_v27  ;;  %v853_v55 = vmul.f32 %v2032_v42, %v2092_v54 }
  0x9b   : > { %v2240_v40 = vmul.f32 %v1498_v34, %v1017_v50  ;;  %v1032_v56 = vmul.f32 1.0614054, %v2231_v58  ;;  %v869_v36 = vmul.f32 %v2049_v62, %v2092_v54  ;;  %v870_v0 = vmul.f32 %v2049_v62, %v2174_v11 }
  0x9c   : > { %v986_v46 = vmul.f32 0.3275911, %v2235_v31  ;;  %v987_v33 = vmul.f32 0.3275911, %v2238_v24  ;;  %v860_v26 = vadd.f32 %v852_v59, %v831_v41  ;;  %v861_v25 = vadd.f32 %v853_v55, %v832_v38 }
  0x9d   : > { %v1033_v17 = vmul.f32 1.0614054, %v2240_v40  ;;  %v1040_v15 = vadd.f32 -1.4531521, %v1032_v56  ;;  %1499 = vpow2.f32 %v1120_v22  ;;  %v1122_v27 = vmul.f32 1.442695, %v1113_v47 }
  0x9e   : > { %v994_v34 = vadd.f32 1.0, %v986_v46  ;;  %v995_v19 = vadd.f32 1.0, %v987_v33  ;;  %v877_v13 = vadd.f32 %v869_v36, %v860_v26  ;;  %v878_v32 = vadd.f32 %v870_v0, %v861_v25  ;;  %v2276_v46 = vld [vmem:[#allocation2 + $0x94] sm:$0xff] }
  0x9f   : > { %v1041_v16 = vadd.f32 -1.4531521, %v1033_v17  ;;  %v1048_v61 = vmul.f32 %v1040_v15, %v2231_v58  ;;  %v2488_v21 = vmov -1.0   ;;  %v886_v6 = vmul.f32 %v2054_v8, %v2174_v11  ;;  %v2560_v17 = vld [vmem:[#allocation35_spill] sm:$0xff] }
  0xa0   : > { %v2258_v54 = vsel %vm960_vm0, 1.0, %v2488_v21  ;;  %1501 = vrcp.f32 %v994_v34  ;;  %v887_v50 = vmul.f32 %v2054_v8, %v2183_v9  ;;  %v2269_v41 = vsel %vm961_vm1, 1.0, %v2488_v21 }
  0xa1   : > { %v1049_v38 = vmul.f32 %v1041_v16, %v2240_v40  ;;  %v1056_v47 = vadd.f32 1.4214138, %v1048_v61  ;;  %1503 = vrcp.f32 %v995_v19  ;;  %v2272_v48 = vmul.f32 0.5, %v938_v53 }
  0xa2   : > { %1505 = vpow2.f32 %v1122_v27  ;;  %v894_v22 = vadd.f32 %v886_v6, %v877_v13  ;;  %v895_v56 = vadd.f32 %v887_v50, %v878_v32  ;;  %vm962_vm2 = vcmp.ge.f32.partialorder %v2226_v1, 0.0 }
  0xa3   : > { %2559 = vst [vmem:[#allocation5_spill] sm:$0xff] %v2272_v48  ;;  %v1057_v59 = vadd.f32 1.4214138, %v1049_v38  ;;  %v1064_v55 = vmul.f32 %v1056_v47, %v2231_v58  ;;  %v903_v10 = vmul.f32 %v2061_v14, %v2183_v9  ;;  %v904_v33 = vmul.f32 %v2061_v14, %v2260_v43  ;;  %v1500_v36 = vpop.eup %1499 }
  0xa4   : > { %v1106_v0 = vsub.f32 0.0, %v2235_v31  ;;  %v920_v53 = vmul.f32 %v2078_v52, %v2260_v43  ;;  %v685_v15 = vadd.f32 %v2560_v17, %v2001_v3  ;;  %v686_v26 = vadd.f32 %v1971_v51, %v2023_v44 }
  0xa5   : > { %v1065_v25 = vmul.f32 %v1057_v59, %v2240_v40  ;;  %v1072_v27 = vadd.f32 -0.28449672, %v1064_v55  ;;  %v911_v16 = vadd.f32 %v903_v10, %v894_v22  ;;  %v912_v61 = vadd.f32 %v904_v33, %v895_v56  ;;  %v2561_v10 = vld [vmem:[#allocation17_spill] sm:$0xff] }
  0xa6   : > { %v1502_v13 = vpop.eup %1501  ;;  %v1107_v32 = vsub.f32 0.0, %v2238_v24  ;;  %v921_v6 = vmul.f32 %v2078_v52, %v2276_v46  ;;  %v702_v50 = vadd.f32 %v1979_v7, %v685_v15  ;;  %v703_v38 = vadd.f32 %v1945_v4, %v686_v26 }
  0xa7   : > { %v1504_v47 = vpop.eup %1503  ;;  %v1073_v3 = vadd.f32 -0.28449672, %v1065_v25  ;;  %v1080_v17 = vmul.f32 %v1072_v27, %v2231_v58  ;;  %v1010_v51 = vmul.f32 %v1502_v13, %v994_v34  ;;  %v928_v44 = vadd.f32 %v920_v53, %v911_v16 }
  0xa8   : > { %v1506_v59 = vpop.eup %1505  ;;  %v1011_v55 = vmul.f32 %v1504_v47, %v995_v19  ;;  %v929_v22 = vadd.f32 %v921_v6, %v912_v61  ;;  %v719_v56 = vadd.f32 %v2016_v57, %v702_v50  ;;  %v720_v33 = vadd.f32 %v2561_v10, %v703_v38 }
  0xa9   : > { %v1081_v21 = vmul.f32 %v1073_v3, %v2240_v40  ;;  %v1088_v52 = vadd.f32 0.2548296, %v1080_v17  ;;  %v1018_v48 = vsub.f32 2.0, %v1010_v51  ;;  %v2300_v7 = vadd.f32 %v2111_v28, %v928_v44 }
  0xaa   : > { %v1019_v4 = vsub.f32 2.0, %v1011_v55  ;;  %v2303_v15 = vadd.f32 %v2111_v28, %v929_v22  ;;  %v736_v34 = vadd.f32 %v2042_v29, %v719_v56  ;;  %v737_v19 = vadd.f32 %v2153_v60, %v720_v33 }
  0xab   : > { %v1089_v53 = vadd.f32 0.2548296, %v1081_v21  ;;  %v1096_v57 = vmul.f32 %v1088_v52, %v2231_v58  ;;  %vm963_vm3 = vcmp.ge.f32.partialorder %v2229_v49, 0.0  ;;  %v2309_v26 = vmul.f32 %v1502_v13, %v1018_v48 }
  0xac   : > { %v2311_v25 = vmul.f32 %v1504_v47, %v1019_v4  ;;  %v1114_v27 = vmul.f32 %v1106_v0, %v2235_v31  ;;  %v2315_v16 = vmul.f32 0.70710677, %v2300_v7  ;;  %v2318_v61 = vmul.f32 0.70710677, %v2303_v15 }
  0xad   : > { %v1097_v29 = vmul.f32 %v1089_v53, %v2240_v40  ;;  %v1136_v60 = vmul.f32 %v1500_v36, %v1096_v57  ;;  %v2322_v21 = vmul.f32 0.5, %v2217_v18  ;;  %v1034_v52 = vmul.f32 1.0614054, %v2309_v26 }
  0xae   : > { %v2562_v58 = vmov -1.0   ;;  %v1035_v31 = vmul.f32 1.0614054, %v2311_v25  ;;  %v1115_v0 = vmul.f32 %v1107_v32, %v2238_v24  ;;  %v980_v13 = vand.u32 2147483647, %v2315_v16 }
  0xaf   : > { %v2328_v48 = vsel %vm962_vm2, 1.0, %v2562_v58  ;;  %v1137_v6 = vmul.f32 %v1506_v59, %v1097_v29  ;;  %v1144_v50 = vsub.f32 1.0, %v1136_v60  ;;  %v2336_v18 = vsel %vm963_vm3, 1.0, %v2562_v58 }
  0xb0   : > { %v1042_v40 = vadd.f32 -1.4531521, %v1034_v52  ;;  %v1043_v36 = vadd.f32 -1.4531521, %v1035_v31  ;;  %v1124_v38 = vmul.f32 1.442695, %v1114_v27  ;;  %v757_v49 = vmul.f32 %v2554_v30, %v2113_v35 }
  0xb1   : > { %v981_v1 = vand.u32 2147483647, %v2318_v61  ;;  %v1145_v47 = vsub.f32 1.0, %v1137_v6  ;;  %v1152_v3 = vmul.f32 %v1144_v50, %v2258_v54  ;;  %v988_v24 = vmul.f32 0.3275911, %v980_v13 }
  0xb2   : > { %v1050_v17 = vmul.f32 %v1042_v40, %v2309_v26  ;;  %v1051_v32 = vmul.f32 %v1043_v36, %v2311_v25  ;;  %v1126_v51 = vmul.f32 1.442695, %v1115_v0  ;;  %v758_v54 = vmul.f32 %v2554_v30, %v2132_v39  ;;  %v749_v40 = vld [vmem:[#allocation2 + $0xb3] sm:$0xff] }
  0xb3   : > { %v989_v44 = vmul.f32 0.3275911, %v981_v1  ;;  %v1153_v59 = vmul.f32 %v1145_v47, %v2269_v41  ;;  %v1160_v55 = vadd.f32 1.0, %v1152_v3  ;;  %v996_v56 = vadd.f32 1.0, %v988_v24 }
  0xb4   : > { %v1058_v22 = vadd.f32 1.4214138, %v1050_v17  ;;  %v1059_v10 = vadd.f32 1.4214138, %v1051_v32  ;;  %v765_v4 = vadd.f32 %v757_v49, %v736_v34  ;;  %v1108_v27 = vsub.f32 0.0, %v980_v13 }
  0xb5   : > { %v997_v33 = vadd.f32 1.0, %v989_v44  ;;  %v1161_v53 = vadd.f32 1.0, %v1153_v59  ;;  %1507 = vrcp.f32 %v996_v56  ;;  %v766_v35 = vadd.f32 %v758_v54, %v737_v19  ;;  %v748_v19 = vld [vmem:[#allocation2 + $0xa3] sm:$0xff] }
  0xb6   : > { %v1066_v57 = vmul.f32 %v1058_v22, %v2309_v26  ;;  %v1067_v29 = vmul.f32 %v1059_v10, %v2311_v25  ;;  %v774_v41 = vmul.f32 %v2537_v5, %v2132_v39  ;;  %v2352_v60 = vmul.f32 %v1160_v55, %v2204_v37 }
  0xb7   : > { %1509 = vrcp.f32 %v997_v33  ;;  %v2355_v52 = vmul.f32 %v1161_v53, %v2213_v12  ;;  %v1109_v34 = vsub.f32 0.0, %v981_v1  ;;  %v775_v39 = vmul.f32 %v2537_v5, %v2197_v23 }
  0xb8   : > { %v1074_v30 = vadd.f32 -0.28449672, %v1066_v57  ;;  %v1075_v31 = vadd.f32 -0.28449672, %v1067_v29  ;;  %1511 = vpow2.f32 %v1124_v38  ;;  %v782_v37 = vadd.f32 %v774_v41, %v765_v4 }
  0xb9   : > { %v1442_v12 = vpack.c.bf16 %v2355_v52, %v2352_v60  ;;  %1513 = vpow2.f32 %v1126_v51  ;;  %v2369_v6 = vmul.f32 %v1108_v27, %v980_v13  ;;  %v783_v36 = vadd.f32 %v775_v39, %v766_v35 }
  0xba   : > { %v1082_v0 = vmul.f32 %v1074_v30, %v2309_v26  ;;  %v1083_v50 = vmul.f32 %v1075_v31, %v2311_v25  ;;  %v791_v38 = vmul.f32 %v1988_v2, %v2197_v23  ;;  %v792_v47 = vmul.f32 %v1988_v2, %v2206_v63 }
  0xbb   : > { %v1508_v5 = vpop.eup %1507  ;;  %1443 = vst [vmem:[%s2362_s26] sm:$0xff] %v1442_v12   ;;  %v2377_v17 = vmul.f32 %v1109_v34, %v981_v1  ;;  %v808_v24 = vmul.f32 %v1997_v20, %v2206_v63  ;;  %v809_v13 = vmul.f32 %v1997_v20, %v748_v19  ;;  %v825_v2 = vmul.f32 %v2012_v45, %v748_v19 }
  0xbc   : > { %v1090_v3 = vadd.f32 0.2548296, %v1082_v0  ;;  %v1091_v51 = vadd.f32 0.2548296, %v1083_v50  ;;  %v1012_v44 = vmul.f32 %v1508_v5, %v996_v56  ;;  %v799_v49 = vadd.f32 %v791_v38, %v782_v37 }
  0xbd   : > { %v1510_v32 = vpop.eup %1509  ;;  %v800_v59 = vadd.f32 %v792_v47, %v783_v36  ;;  %v826_v22 = vmul.f32 %v2012_v45, %v749_v40  ;;  %v854_v56 = vmul.f32 %v2032_v42, %v2174_v11  ;;  %v872_v30 = vmul.f32 %v2049_v62, %v2260_v43  ;;  %v845_v11 = vld [vmem:[#allocation2 + $0xa4] sm:$0xff] }
  0xbe   : > { %v1098_v23 = vmul.f32 %v1090_v3, %v2309_v26  ;;  %v1013_v55 = vmul.f32 %v1510_v32, %v997_v33  ;;  %v1512_v10 = vpop.eup %1511  ;;  %v1099_v1 = vmul.f32 %v1091_v51, %v2311_v25  ;;  %v1020_v54 = vsub.f32 2.0, %v1012_v44  ;;  %v2564_v51 = vld [vmem:[#allocation13_spill] sm:$0xff] }
  0xbf   : > { %v816_v4 = vadd.f32 %v808_v24, %v799_v49  ;;  %v817_v63 = vadd.f32 %v809_v13, %v800_v59  ;;  %v1514_v53 = vpop.eup %1513  ;;  %v855_v26 = vmul.f32 %v2032_v42, %v2183_v9  ;;  %v871_v25 = vmul.f32 %v2049_v62, %v2183_v9  ;;  %v846_v24 = vld [vmem:[#allocation2 + $0xb4] sm:$0xff] }
  0xc0   : > { %v1138_v20 = vmul.f32 %v1512_v10, %v1098_v23  ;;  %v1021_v57 = vsub.f32 2.0, %v1013_v55  ;;  %v1139_v33 = vmul.f32 %v1514_v53, %v1099_v1  ;;  %v2390_v27 = vmul.f32 %v1508_v5, %v1020_v54 }
  0xc1   : > { %v833_v29 = vadd.f32 %v825_v2, %v816_v4  ;;  %v834_v45 = vadd.f32 %v826_v22, %v817_v63  ;;  %v888_v12 = vmul.f32 %v2054_v8, %v2260_v43  ;;  %v889_v0 = vmul.f32 %v2054_v8, %v2276_v46 }
  0xc2   : > { %v1146_v35 = vsub.f32 1.0, %v1138_v20  ;;  %v1029_v41 = vmul.f32 %v1510_v32, %v1021_v57  ;;  %v1147_v34 = vsub.f32 1.0, %v1139_v33  ;;  %v1036_v31 = vmul.f32 1.0614054, %v2390_v27  ;;  %v2563_v32 = vld [vmem:[#allocation5_spill] sm:$0xff] }
  0xc3   : > { %v862_v19 = vadd.f32 %v854_v56, %v833_v29  ;;  %v863_v39 = vadd.f32 %v855_v26, %v834_v45  ;;  %v905_v47 = vmul.f32 %v2061_v14, %v2276_v46  ;;  %v906_v5 = vmul.f32 %v2061_v14, %v845_v11 }
  0xc4   : > { %v1154_v42 = vmul.f32 %v1146_v35, %v2328_v48  ;;  %v1037_v37 = vmul.f32 1.0614054, %v1029_v41  ;;  %v1155_v9 = vmul.f32 %v1147_v34, %v2336_v18  ;;  %v1044_v50 = vadd.f32 -1.4531521, %v1036_v31 }
  0xc5   : > { %v879_v40 = vadd.f32 %v871_v25, %v862_v19  ;;  %v880_v62 = vadd.f32 %v872_v30, %v863_v39  ;;  %v922_v44 = vmul.f32 %v2564_v51, %v845_v11  ;;  %v1128_v14 = vmul.f32 1.442695, %v2369_v6 }
  0xc6   : > { %v1162_v36 = vadd.f32 1.0, %v1154_v42  ;;  %v1045_v38 = vadd.f32 -1.4531521, %v1037_v37  ;;  %v1163_v48 = vadd.f32 1.0, %v1155_v9  ;;  %v1052_v3 = vmul.f32 %v1044_v50, %v2390_v27 }
  0xc7   : > { %v896_v43 = vadd.f32 %v888_v12, %v879_v40  ;;  %v897_v13 = vadd.f32 %v889_v0, %v880_v62  ;;  %v923_v2 = vmul.f32 %v2564_v51, %v846_v24  ;;  %v1130_v1 = vmul.f32 1.442695, %v2377_v17 }
  0xc8   : > { %v1170_v8 = vmul.f32 %v1162_v36, %v2563_v32  ;;  %v1053_v18 = vmul.f32 %v1045_v38, %v1029_v41  ;;  %v1171_v49 = vmul.f32 %v1163_v48, %v2322_v21  ;;  %v1060_v59 = vadd.f32 1.4214138, %v1052_v3 }
  0xc9   : > { %v913_v23 = vadd.f32 %v905_v47, %v896_v43  ;;  %v914_v55 = vadd.f32 %v906_v5, %v897_v13  ;;  %1515 = vpow2.f32 %v1128_v14  ;;  %v1206_v33 = vmul.f32 %v2355_v52, %v2355_v52 }
  0xca   : > { %v1061_v46 = vadd.f32 1.4214138, %v1053_v18  ;;  %v1447_v22 = vpack.c.bf16 %v1171_v49, %v1170_v8  ;;  %v1068_v10 = vmul.f32 %v1060_v59, %v2390_v27  ;;  %1517 = vpow2.f32 %v1130_v1 }
  0xcb   : > { %v930_v54 = vadd.f32 %v922_v44, %v913_v23  ;;  %v931_v63 = vadd.f32 %v923_v2, %v914_v55  ;;  %v1192_v25 = vadd.f32 %v2355_v52, %v2352_v60  ;;  %v1205_v30 = vmul.f32 %v2352_v60, %v2352_v60 }
  0xcc   : > { %v1069_v4 = vmul.f32 %v1061_v46, %v1029_v41  ;;  %1462 = vst [vmem:[%s2362_s26 + $0x8] sm:$0xff] %v1447_v22   ;;  %v1076_v53 = vadd.f32 -0.28449672, %v1068_v10  ;;  %vm964_vm4 = vcmp.ge.f32.partialorder %v2315_v16, 0.0  ;;  %vm965_vm5 = vcmp.ge.f32.partialorder %v2318_v61, 0.0 }
  0xcd   : > { %v2416_v21 = vadd.f32 %v2111_v28, %v930_v54  ;;  %v2419_v57 = vadd.f32 %v2111_v28, %v931_v63  ;;  %v1213_v37 = vadd.f32 %v1206_v33, %v1205_v30  ;;  %v1193_v52 = vadd.f32 %v1192_v25, %v1170_v8 }
  0xce   : > { %v1077_v20 = vadd.f32 -0.28449672, %v1069_v4  ;;  %v1084_v6 = vmul.f32 %v1076_v53, %v2390_v27  ;;  %v1207_v40 = vmul.f32 %v1170_v8, %v1170_v8  ;;  %v972_v60 = vsel %vm964_vm4, 1.0, %v2562_v58 }
  0xcf   : > { %v2423_v56 = vmul.f32 0.70710677, %v2416_v21  ;;  %v2426_v26 = vmul.f32 0.70710677, %v2419_v57  ;;  %v1516_v11 = vpop.eup %1515  ;;  %v973_v36 = vsel %vm965_vm5, 1.0, %v2562_v58  ;;  %v1194_v16 = vadd.f32 %v1193_v52, %v1171_v49 }
  0xd0   : > { %v1085_v17 = vmul.f32 %v1077_v20, %v1029_v41  ;;  %v1092_v29 = vadd.f32 0.2548296, %v1084_v6  ;;  %v1518_v42 = vpop.eup %1517  ;;  %v1208_v5 = vmul.f32 %v1171_v49, %v1171_v49  ;;  %v948_v48 = vmul.f32 0.5, %v2300_v7 }
  0xd1   : > { %v982_v45 = vand.u32 2147483647, %v2423_v56  ;;  %v983_v28 = vand.u32 2147483647, %v2426_v26  ;;  %v949_v3 = vmul.f32 0.5, %v2303_v15  ;;  %vm966_vm6 = vcmp.ge.f32.partialorder %v2423_v56, 0.0 }
  0xd2   : > { %v1093_v35 = vadd.f32 0.2548296, %v1085_v17  ;;  %v1100_v34 = vmul.f32 %v1092_v29, %v2390_v27  ;;  %vm967_vm7 = vcmp.ge.f32.partialorder %v2426_v26, 0.0 }
  0xd3   : > { %v990_v31 = vmul.f32 0.3275911, %v982_v45  ;;  %v991_v39 = vmul.f32 0.3275911, %v983_v28  ;;  %v1110_v1 = vsub.f32 0.0, %v982_v45  ;;  %v1111_v4 = vsub.f32 0.0, %v983_v28 }
  0xd4   : > { %v1101_v19 = vmul.f32 %v1093_v35, %v1029_v41  ;;  %v1140_v12 = vmul.f32 %v1516_v11, %v1100_v34  ;;  %v1214_v41 = vadd.f32 %v1213_v37, %v1207_v40 }
  0xd5   : > { %v998_v0 = vadd.f32 1.0, %v990_v31  ;;  %v999_v50 = vadd.f32 1.0, %v991_v39  ;;  %v1118_v6 = vmul.f32 %v1110_v1, %v982_v45  ;;  %v1119_v33 = vmul.f32 %v1111_v4, %v983_v28 }
  0xd6   : > { %v1141_v9 = vmul.f32 %v1518_v42, %v1101_v19  ;;  %v1148_v62 = vsub.f32 1.0, %v1140_v12  ;;  %v1215_v13 = vadd.f32 %v1214_v41, %v1208_v5  ;;  %v975_v41 = vsel %vm967_vm7, 1.0, %v2562_v58 }
  0xd7   : > { %1519 = vrcp.f32 %v998_v0  ;;  %v1132_v30 = vmul.f32 1.442695, %v1118_v6  ;;  %v1134_v31 = vmul.f32 1.442695, %v1119_v33  ;;  %v951_v5 = vmul.f32 0.5, %v2419_v57 }
  0xd8   : > { %v1149_v27 = vsub.f32 1.0, %v1141_v9  ;;  %1521 = vrcp.f32 %v999_v50  ;;  %v1156_v38 = vmul.f32 %v1148_v62, %v972_v60  ;;  %v974_v60 = vsel %vm966_vm6, 1.0, %v2562_v58 }
  0xd9   : > { %1523 = vpow2.f32 %v1132_v30 }
  0xda   : > { %v1157_v47 = vmul.f32 %v1149_v27, %v973_v36  ;;  %v1164_v61 = vadd.f32 1.0, %v1156_v38  ;;  %1525 = vpow2.f32 %v1134_v31 }
  0xdc   : > { %v1165_v24 = vadd.f32 1.0, %v1157_v47  ;;  %v1172_v32 = vmul.f32 %v1164_v61, %v948_v48  ;;  %v950_v47 = vmul.f32 0.5, %v2416_v21 }
  0xdd   : > { %v1520_v43 = vpop.eup %1519 }
  0xde   : > { %v1522_v8 = vpop.eup %1521  ;;  %v1173_v18 = vmul.f32 %v1165_v24, %v949_v3  ;;  %v1014_v51 = vmul.f32 %v1520_v43, %v998_v0  ;;  %v1195_v44 = vadd.f32 %v1194_v16, %v1172_v32  ;;  %v1209_v59 = vmul.f32 %v1172_v32, %v1172_v32 }
  0xdf   : > { %v1015_v23 = vmul.f32 %v1522_v8, %v999_v50  ;;  %v1524_v50 = vpop.eup %1523 }
  0xe0   : > { %v1452_v55 = vpack.c.bf16 %v1173_v18, %v1172_v32  ;;  %v1022_v46 = vsub.f32 2.0, %v1014_v51  ;;  %v1196_v14 = vadd.f32 %v1195_v44, %v1173_v18  ;;  %v1210_v49 = vmul.f32 %v1173_v18, %v1173_v18  ;;  %v1526_v52 = vpop.eup %1525 }
  0xe1   : > { %v1216_v2 = vadd.f32 %v1215_v13, %v1209_v59  ;;  %v1023_v7 = vsub.f32 2.0, %v1015_v23 }
  0xe2   : > { %1463 = vst [vmem:[%s2362_s26 + $0x10] sm:$0xff] %v1452_v55   ;;  %v1030_v22 = vmul.f32 %v1520_v43, %v1022_v46 }
  0xe3   : > { %v1217_v15 = vadd.f32 %v1216_v2, %v1210_v49  ;;  %v1031_v10 = vmul.f32 %v1522_v8, %v1023_v7 }
  0xe4   : > { %v1038_v54 = vmul.f32 1.0614054, %v1030_v22 }
  0xe5   : > { %v1039_v63 = vmul.f32 1.0614054, %v1031_v10 }
  0xe6   : > { %v1046_v53 = vadd.f32 -1.4531521, %v1038_v54 }
  0xe7   : > { %v1047_v20 = vadd.f32 -1.4531521, %v1039_v63 }
  0xe8   : > { %v1054_v17 = vmul.f32 %v1046_v53, %v1030_v22 }
  0xe9   : > { %v1055_v29 = vmul.f32 %v1047_v20, %v1031_v10 }
  0xea   : > { %v1062_v35 = vadd.f32 1.4214138, %v1054_v17 }
  0xeb   : > { %v1063_v25 = vadd.f32 1.4214138, %v1055_v29 }
  0xec   : > { %v1070_v34 = vmul.f32 %v1062_v35, %v1030_v22 }
  0xed   : > { %v1071_v11 = vmul.f32 %v1063_v25, %v1031_v10 }
  0xee   : > { %v1078_v19 = vadd.f32 -0.28449672, %v1070_v34 }
  0xef   : > { %v1079_v39 = vadd.f32 -0.28449672, %v1071_v11 }
  0xf0   : > { %v1086_v42 = vmul.f32 %v1078_v19, %v1030_v22 }
  0xf1   : > { %v1087_v37 = vmul.f32 %v1079_v39, %v1031_v10 }
  0xf2   : > { %v1094_v12 = vadd.f32 0.2548296, %v1086_v42 }
  0xf3   : > { %v1095_v0 = vadd.f32 0.2548296, %v1087_v37 }
  0xf4   : > { %v1102_v9 = vmul.f32 %v1094_v12, %v1030_v22 }
  0xf5   : > { %v1103_v45 = vmul.f32 %v1095_v0, %v1031_v10 }
  0xf6   : > { %v1142_v28 = vmul.f32 %v1524_v50, %v1102_v9 }
  0xf7   : > { %v1143_v40 = vmul.f32 %v1526_v52, %v1103_v45 }
  0xf8   : > { %v1150_v62 = vsub.f32 1.0, %v1142_v28 }
  0xf9   : > { %v1151_v27 = vsub.f32 1.0, %v1143_v40 }
  0xfa   : > { %v1158_v36 = vmul.f32 %v1150_v62, %v974_v60 }
  0xfb   : > { %v1159_v38 = vmul.f32 %v1151_v27, %v975_v41 }
  0xfc   : > { %v1166_v16 = vadd.f32 1.0, %v1158_v36 }
  0xfd   : > { %v1167_v48 = vadd.f32 1.0, %v1159_v38 }
  0xfe   : > { %v1174_v56 = vmul.f32 %v1166_v16, %v950_v47 }
  0xff   : > { %v1175_v61 = vmul.f32 %v1167_v48, %v951_v5 }
 0x100   : > { %v1197_v3 = vadd.f32 %v1196_v14, %v1174_v56  ;;  %v1211_v26 = vmul.f32 %v1174_v56, %v1174_v56 }
 0x101   : > { %v1457_v24 = vpack.c.bf16 %v1175_v61, %v1174_v56  ;;  %v1212_v13 = vmul.f32 %v1175_v61, %v1175_v61 }
 0x102   : > { %v1198_v43 = vadd.f32 %v1197_v3, %v1175_v61  ;;  %v1218_v32 = vadd.f32 %v1217_v15, %v1211_v26 }
 0x103   : > { %1464 = vst [vmem:[%s2362_s26 + $0x18] sm:$0xff] %v1457_v24  }
 0x104   : > { %v1199_v8 = vrot.slane %v1198_v43, 4  ;;  %v1219_v58 = vadd.f32 %v1218_v32, %v1212_v13 }
 0x106   : > { %v1200_v18 = vadd.f32 %v1199_v8, %v1198_v43  ;;  %v1220_v51 = vrot.slane %v1219_v58, 4 }
 0x108   : > { %v1201_v44 = vrot.slane %v1200_v18, 2  ;;  %v1221_v21 = vadd.f32 %v1220_v51, %v1219_v58 }
 0x10a   : > { %v1202_v59 = vadd.f32 %v1201_v44, %v1200_v18  ;;  %v1222_v23 = vrot.slane %v1221_v21, 2 }
 0x10c   : > { %v1203_v57 = vrot.slane %v1202_v59, 1  ;;  %v1223_v55 = vadd.f32 %v1222_v23, %v1221_v21 }
 0x10e   : > { %v1224_v46 = vrot.slane %v1223_v55, 1  ;;  %v1204_v14 = vadd.f32 %v1203_v57, %v1202_v59 }
 0x110   : > { %v1225_v49 = vadd.f32 %v1224_v46, %v1223_v55 }
 0x112   : > { %v1227_v2 = vsel %vm1226_vm8, %v1204_v14, %v1225_v49 }
 0x113   : > { %1228 = vst [vmem:[%s360_s29] sm:$0x3] %v1227_v2 }
 0x114 PF: > { %s17_s23 = sadd.s32 1, %s1549_s23   ;;  %s2565_s21 = smov %s1545_s22 }
 0x115   : > { %p14_p5 = scmp.ge.s32.totalorder %s17_s23, 4   ;;  %s2566_s22 = smov %s2568_s24 }
 0x117   :  { %16 = sbr.rel (!%p14_p5) target bundleno = 2 (0x2), region = 96 }

</bundles_post_ra>
